<compile_context>
chip_gen: v6e
topology: v6e:2x2x1
jax: 0.10.0
libtpu: 0.0.40
codegen_flags: <defaults>
</compile_context>

<pallas_src>
import jax
import jax.numpy as jnp
from jax.experimental import pallas as pl
from jax.experimental.pallas import tpu as pltpu

D = 784  # 28 * 28 features


def encoder_kernel(x_ref, w1_ref, w2_ref, ba_ref, out_ref):
    """One batch tile: 2 x (bf16 matmul on MXU, f32 accum, bias + PReLU)."""
    ba = ba_ref[...]                 # (8, 784) f32: rows = [b1, a1, b2, a2, 0...]
    b1 = ba[0:1, :]
    a1 = ba[1:2, :]
    b2 = ba[2:3, :]
    a2 = ba[3:4, :]

    x = x_ref[...]                   # (TB, 784) bf16 — no in-kernel cast needed

    h = jnp.dot(x, w1_ref[...], preferred_element_type=jnp.float32) + b1
    h = jnp.where(h > 0, h, a1 * h)  # PReLU, per-feature alpha

    h = jnp.dot(h.astype(jnp.bfloat16), w2_ref[...],
                preferred_element_type=jnp.float32) + b2
    h = jnp.where(h > 0, h, a2 * h)

    out_ref[...] = h.astype(out_ref.dtype)


def init_torch_like_params(key):
    """PyTorch-layout params: [(W(out,in), b(out,), alpha(out,))] x 2 layers."""
    params = []
    for _ in range(2):
        kw, kb, key = jax.random.split(key, 3)
        bound = 1.0 / jnp.sqrt(D)                      # nn.Linear default range
        w = jax.random.uniform(kw, (D, D), jnp.float32, -bound, bound)  # (out, in)
        b = jax.random.uniform(kb, (D,), jnp.float32, -bound, bound)
        a = jnp.full((D,), 0.25, jnp.float32)          # PReLU default init
        params.append((w, b, a))
    return params


def prepare_params(raw_params):
    """Transpose weights to (in, out) and cast to bf16; pack biases/alphas.

    Biases and PReLU alphas are packed (f32) into one (8, 784) array:
      row 0: b1, row 1: a1, row 2: b2, row 3: a2, rows 4-7: zeros.
    One small DMA instead of four.
    """
    (w1, b1, a1), (w2, b2, a2) = raw_params
    w1t = w1.T.astype(jnp.bfloat16)                    # (784, 784)
    w2t = w2.T.astype(jnp.bfloat16)
    ba = jnp.zeros((8, D), jnp.float32)
    ba = ba.at[0].set(b1).at[1].set(a1).at[2].set(b2).at[3].set(a2)
    return w1t, w2t, ba


def lossless_encoder_forward(x_nchw, packed_params):
    """x_nchw: (B, 1, 28, 28) float32 -> encoded (B, 784) float32."""
    w1t, w2t, ba = packed_params
    B = x_nchw.shape[0]

    # nn.Flatten + single cheap cast pass; no zero-padded staging buffer.
    x_flat = x_nchw.reshape(B, D).astype(jnp.bfloat16)

    # Batch tiling:
    #   B <= 256: one block covering the whole batch (block dim == array dim,
    #             so any B is legal; grid of 1).
    #   B  > 256: 256-row tiles; ragged tail handled by Pallas edge-block
    #             masking (garbage tail rows are computed but never stored).
    TB = B if B <= 256 else 256
    grid = (pl.cdiv(B, TB),)

    out = pl.pallas_call(
        encoder_kernel,
        out_shape=jax.ShapeDtypeStruct((B, D), jnp.float32),
        grid=grid,
        in_specs=[
            pl.BlockSpec((TB, D), lambda i: (i, 0)),   # activations (bf16)
            pl.BlockSpec((D, D), lambda i: (0, 0)),    # W1 (VMEM-resident)
            pl.BlockSpec((D, D), lambda i: (0, 0)),    # W2 (VMEM-resident)
            pl.BlockSpec((8, D), lambda i: (0, 0)),    # packed bias / alpha
        ],
        out_specs=pl.BlockSpec((TB, D), lambda i: (i, 0)),
        compiler_params=pltpu.CompilerParams(
            dimension_semantics=("parallel",)),        # megacore on v7x
    )(x_flat, w1t, w2t, ba)

    return out


def reference_forward(x_nchw, raw_params):
    """Pure-JAX reference using the same bf16-operand / f32-accum numerics."""
    (w1, b1, a1), (w2, b2, a2) = raw_params
    B = x_nchw.shape[0]
    h = x_nchw.reshape(B, D).astype(jnp.bfloat16)

    h = jnp.dot(h, w1.T.astype(jnp.bfloat16),
                preferred_element_type=jnp.float32) + b1
    h = jnp.where(h > 0, h, a1 * h)
    h = jnp.dot(h.astype(jnp.bfloat16), w2.T.astype(jnp.bfloat16),
                preferred_element_type=jnp.float32) + b2
    h = jnp.where(h > 0, h, a2 * h)
    return h


if __name__ == "__main__":
    key = jax.random.PRNGKey(0)
    kx, kp = jax.random.split(key)

    B = 2
    x = jax.random.normal(kx, (B, 1, 28, 28), jnp.float32)

    raw_params = init_torch_like_params(kp)
    packed_params = prepare_params(raw_params)

    out = lossless_encoder_forward(x, packed_params)
    out = jax.block_until_ready(out)

    ref = reference_forward(x, raw_params)
    assert out.shape == (B, D), f"bad output shape {out.shape}"
    assert jnp.allclose(out, ref, atol=1e-3, rtol=1e-3), "mismatch vs reference"

    print("KERNEL_OK")
</pallas_src>

<mosaic_0001>
module attributes {stable_mosaic.version = 11 : i64} {
  func.func @encoder_kernel(%arg0: i32, %arg1: memref<2x784xbf16, #tpu.memory_space<vmem>>, %arg2: memref<784x784xbf16, #tpu.memory_space<vmem>>, %arg3: memref<784x784xbf16, #tpu.memory_space<vmem>>, %arg4: memref<8x784xf32, #tpu.memory_space<vmem>>, %arg5: memref<2x784xf32, #tpu.memory_space<vmem>>) attributes {dimension_semantics = [#tpu.dimension_semantics<parallel>], iteration_bounds = array<i64: 1>, scalar_prefetch = 0 : i64, scratch_operands = 0 : i64, tpu.core_type = #tpu.core_type<tc>, window_params = [{transform_indices = @transform_0, window_bounds = array<i64: 2, 784>}, {pipeline_mode = #tpu.pipeline_mode<synchronous>, transform_indices = @transform_1, window_bounds = array<i64: 784, 784>}, {pipeline_mode = #tpu.pipeline_mode<synchronous>, transform_indices = @transform_2, window_bounds = array<i64: 784, 784>}, {pipeline_mode = #tpu.pipeline_mode<synchronous>, transform_indices = @transform_3, window_bounds = array<i64: 8, 784>}, {transform_indices = @transform_4, window_bounds = array<i64: 2, 784>}]} {
    %c0 = arith.constant 0 : index
    %c0_0 = arith.constant 0 : index
    %0 = vector.load %arg4[%c0, %c0_0] : memref<8x784xf32, #tpu.memory_space<vmem>>, vector<8x784xf32>
    %1 = vector.extract_strided_slice %0 {offsets = [0, 0], sizes = [1, 784], strides = [1, 1]} : vector<8x784xf32> to vector<1x784xf32>
    %2 = vector.extract_strided_slice %0 {offsets = [1, 0], sizes = [1, 784], strides = [1, 1]} : vector<8x784xf32> to vector<1x784xf32>
    %3 = vector.extract_strided_slice %0 {offsets = [2, 0], sizes = [1, 784], strides = [1, 1]} : vector<8x784xf32> to vector<1x784xf32>
    %4 = vector.extract_strided_slice %0 {offsets = [3, 0], sizes = [1, 784], strides = [1, 1]} : vector<8x784xf32> to vector<1x784xf32>
    %c0_1 = arith.constant 0 : index
    %c0_2 = arith.constant 0 : index
    %5 = vector.load %arg1[%c0_1, %c0_2] : memref<2x784xbf16, #tpu.memory_space<vmem>>, vector<2x784xbf16>
    %c0_3 = arith.constant 0 : index
    %c0_4 = arith.constant 0 : index
    %6 = vector.load %arg2[%c0_3, %c0_4] : memref<784x784xbf16, #tpu.memory_space<vmem>>, vector<784x784xbf16>
    %cst = arith.constant dense<0.000000e+00> : vector<2x784xf32>
    %7 = tpu.matmul %5, %6, %cst {dimension_numbers = #tpu.dot_dimension_numbers<[1], [0], [0], [1], [0, 0, 1, 1], [], []>} : vector<2x784xbf16>, vector<784x784xbf16>, vector<2x784xf32> -> vector<2x784xf32>
    %8 = vector.broadcast %1 : vector<1x784xf32> to vector<2x784xf32>
    %9 = arith.addf %7, %8 : vector<2x784xf32>
    %cst_5 = arith.constant 0.000000e+00 : f32
    %10 = vector.broadcast %cst_5 : f32 to vector<2x784xf32>
    %11 = arith.cmpf ogt, %9, %10 : vector<2x784xf32>
    %12 = vector.broadcast %2 : vector<1x784xf32> to vector<2x784xf32>
    %13 = arith.mulf %12, %9 : vector<2x784xf32>
    %14 = arith.select %11, %9, %13 : vector<2x784xi1>, vector<2x784xf32>
    %15 = arith.truncf %14 : vector<2x784xf32> to vector<2x784xbf16>
    %c0_6 = arith.constant 0 : index
    %c0_7 = arith.constant 0 : index
    %16 = vector.load %arg3[%c0_6, %c0_7] : memref<784x784xbf16, #tpu.memory_space<vmem>>, vector<784x784xbf16>
    %cst_8 = arith.constant dense<0.000000e+00> : vector<2x784xf32>
    %17 = tpu.matmul %15, %16, %cst_8 {dimension_numbers = #tpu.dot_dimension_numbers<[1], [0], [0], [1], [0, 0, 1, 1], [], []>} : vector<2x784xbf16>, vector<784x784xbf16>, vector<2x784xf32> -> vector<2x784xf32>
    %18 = vector.broadcast %3 : vector<1x784xf32> to vector<2x784xf32>
    %19 = arith.addf %17, %18 : vector<2x784xf32>
    %cst_9 = arith.constant 0.000000e+00 : f32
    %20 = vector.broadcast %cst_9 : f32 to vector<2x784xf32>
    %21 = arith.cmpf ogt, %19, %20 : vector<2x784xf32>
    %22 = vector.broadcast %4 : vector<1x784xf32> to vector<2x784xf32>
    %23 = arith.mulf %22, %19 : vector<2x784xf32>
    %24 = arith.select %21, %19, %23 : vector<2x784xi1>, vector<2x784xf32>
    %c0_10 = arith.constant 0 : index
    %c0_11 = arith.constant 0 : index
    %25 = vector.load %arg5[%c0_10, %c0_11] : memref<2x784xf32, #tpu.memory_space<vmem>>, vector<2x784xf32>
    tpu.vector_store %arg5[%c0_10, %c0_11], %24 {strides = array<i32>} : memref<2x784xf32, #tpu.memory_space<vmem>>, vector<2x784xf32>,
    return
  }
  func.func @transform_0(%arg0: i32) -> (i32, i32) {
    %c0_i32 = arith.constant 0 : i32
    %c0_i32_0 = arith.constant 0 : i32
    return %arg0, %c0_i32 : i32, i32
  }
  func.func @transform_1(%arg0: i32) -> (i32, i32) {
    %c0_i32 = arith.constant 0 : i32
    %c0_i32_0 = arith.constant 0 : i32
    %c0_i32_1 = arith.constant 0 : i32
    return %c0_i32, %c0_i32_0 : i32, i32
  }
  func.func @transform_2(%arg0: i32) -> (i32, i32) {
    %c0_i32 = arith.constant 0 : i32
    %c0_i32_0 = arith.constant 0 : i32
    %c0_i32_1 = arith.constant 0 : i32
    return %c0_i32, %c0_i32_0 : i32, i32
  }
  func.func @transform_3(%arg0: i32) -> (i32, i32) {
    %c0_i32 = arith.constant 0 : i32
    %c0_i32_0 = arith.constant 0 : i32
    %c0_i32_1 = arith.constant 0 : i32
    return %c0_i32, %c0_i32_0 : i32, i32
  }
  func.func @transform_4(%arg0: i32) -> (i32, i32) {
    %c0_i32 = arith.constant 0 : i32
    %c0_i32_0 = arith.constant 0 : i32
    return %arg0, %c0_i32 : i32, i32
  }
}

</mosaic_0001>

<bundles_post_ra>
// kernel: tpu_custom_call.1
= control target key start
LH: loop header
LB: loop body
LE: loop exit
PB: predicated region body
PF: predicated region fallthrough
CT: control target
= control target key end

     0   :  { %9 = vsyncpa [#allocation3], 0  ;;  %s8232_s0 = inlined_call_operand.hbm [shape: bf16[2,784], index: 0, kind: input, shape index: {}]   ;;  %s8233_s1 = inlined_call_operand.hbm [shape: bf16[784,784], index: 1, kind: input, shape index: {}]   ;;  %s8234_s2 = inlined_call_operand.hbm [shape: bf16[784,784], index: 2, kind: input, shape index: {}]   ;;  %s8235_s3 = inlined_call_operand.hbm [shape: f32[8,784], index: 3, kind: input, shape index: {}]   ;;  %s8236_s4 = inlined_call_operand.hbm [shape: f32[2,784], index: 4, kind: output, shape index: {}]  }
   0x1   :  { %10 = vsyncpa [#allocation6], 0 }
   0x2   :  { %11 = vsyncpa [#allocation9], 0 }
   0x3   :  { %12 = vsyncpa [#allocation4], 0  ;;  %s7934_s15 = smov [#allocation5]  }
   0x4   :  { %s28_s16 = sshll.u32 %s7934_s15, 4  ;;  %s29_s16 = int_to_ptr.vmem [resolvable:$true] %s28_s16 }
   0x5   :  { %s7834_s17 = scalar_lea.vmem %s29_s16, 43904  ;;  %p7839_p1 = scmp.lt.s32.totalorder %s29_s16, %s29_s16 }
   0x6   :  { %p7835_p0 = scmp.ne.s32.totalorder %s29_s16, %s7834_s17  ;;  %p7840_p2 = scmp.lt.s32.totalorder %s7834_s17, %s7834_s17 }
   0x8   :  { %p7841_p3 = por %p7840_p2, %p7839_p1 }
   0xa   :  { %p7842_p4 = pnand %p7841_p3, %p7835_p0 }
   0xc   :  { %7845 = shalt.err (!%p7842_p4)
}
   0xd   :  { %s7935_s18 = smov 448   ;;  %s7936_s19 = smov 28  }
   0xe   :  { %34 = dma.hbm_to_vmem [thread:$0]  %s8233_s1, 43904, %s29_s16, [#allocation6], %s7935_s18, %s7935_s18, %s7936_s19  }
   0xf   :  { %s7937_s22 = smov [#allocation2]   ;;  %s7938_s24 = smov [#allocation7]  }
  0x10   :  { %s19_s23 = sshll.u32 %s7937_s22, 4  ;;  %s40_s25 = sshll.u32 %s7938_s24, 4  ;;  %s20_s23 = int_to_ptr.vmem [resolvable:$true] %s19_s23  ;;  %s41_s25 = int_to_ptr.vmem [resolvable:$true] %s40_s25 }
  0x11   :  { %s7854_s26 = scalar_lea.vmem %s20_s23, 112  ;;  %s7858_s27 = scalar_lea.vmem %s20_s23, 128 }
  0x12   :  { %p7855_p5 = scmp.ne.s32.totalorder %s20_s23, %s7854_s26  ;;  %p7859_p6 = scmp.lt.s32.totalorder %s20_s23, %s20_s23 }
  0x13   :  { %p7860_p7 = scmp.lt.s32.totalorder %s7858_s27, %s7854_s26 }
  0x15   :  { %p7861_p8 = por %p7860_p7, %p7859_p6 }
  0x17   :  { %p7862_p9 = pnand %p7861_p8, %p7855_p5 }
  0x19   :  { %7865 = shalt.err (!%p7862_p9)
}
  0x1a   :  { %22 = dma.hbm_to_vmem [thread:$0]  %s8232_s0, 112, %s20_s23, [#allocation3]  }
  0x1b   :  { %s7874_s30 = scalar_lea.vmem %s41_s25, 43904  ;;  %p7879_p11 = scmp.lt.s32.totalorder %s41_s25, %s41_s25 }
  0x1c   :  { %p7875_p10 = scmp.ne.s32.totalorder %s41_s25, %s7874_s30  ;;  %p7880_p12 = scmp.lt.s32.totalorder %s7874_s30, %s7874_s30 }
  0x1e   :  { %p7881_p13 = por %p7880_p12, %p7879_p11 }
  0x20   :  { %p7882_p0 = pnand %p7881_p13, %p7875_p10 }
  0x22   :  { %7885 = shalt.err (!%p7882_p0)
}
  0x23   :  { %46 = dma.hbm_to_vmem [thread:$0]  %s8234_s2, 43904, %s41_s25, [#allocation6], %s7935_s18, %s7935_s18, %s7936_s19  }
  0x24   :  { %s7939_s6 = smov [#allocation8]  }
  0x25   :  { %s53_s7 = sshll.u32 %s7939_s6, 4  ;;  %s54_s7 = int_to_ptr.vmem [resolvable:$true] %s53_s7 }
  0x26   :  { %s7894_s8 = scalar_lea.vmem %s54_s7, 896  ;;  %p7899_p2 = scmp.lt.s32.totalorder %s54_s7, %s54_s7 }
  0x27   :  { %p7895_p1 = scmp.ne.s32.totalorder %s54_s7, %s7894_s8  ;;  %p7900_p3 = scmp.lt.s32.totalorder %s7894_s8, %s7894_s8 }
  0x29   :  { %p7901_p4 = por %p7900_p3, %p7899_p2 }
  0x2b   :  { %p7902_p5 = pnand %p7901_p4, %p7895_p1 }
  0x2d   :  { %7905 = shalt.err (!%p7902_p5)
}
  0x2e   :  { %56 = dma.hbm_to_vmem [thread:$0]  %s8235_s3, 896, %s54_s7, [#allocation9]  }
  0x2f   :  { %7926 = dma.done.wait [#allocation3], 112  }
  0x30   :  { %7927 = vsyncadd [#allocation3], 4294967184 }
  0x31   :  { %7928 = dma.done.wait [#allocation6], 87808  }
  0x32   :  { %7929 = vsyncadd [#allocation6], 4294879488 }
  0x33   :  { %7930 = dma.done.wait [#allocation9], 896  }
  0x34   :  { %7931 = vsyncadd [#allocation9], 4294966400  ;;  %v6837_v0 = vld [vmem:[#allocation5 + $0x18c] ss:$28 sps:$4 sm:$0xff]   ;;  %v6843_v4 = vld [vmem:[#allocation5 + $0x154] ss:$28 sps:$4 sm:$0xff]   ;;  %v470_v36 = vlaneseq }
  0x35   :  { %v6839_v1 = vld [vmem:[#allocation5 + $0x50c] ss:$28 sps:$4 sm:$0xff]   ;;  %2321 = vmatprep.subr.bf16.mxu0 %v6837_v0  ;;  %v6845_v5 = vld [vmem:[#allocation5 + $0x4d4] ss:$28 sps:$4 sm:$0xff]   ;;  %v6849_v8 = vld [vmem:[#allocation5 + $0x11c] ss:$28 sps:$4 sm:$0xff]  }
  0x36   :  { %v6841_v2 = vld [vmem:[#allocation5 + $0x188] ss:$28 sps:$4 sm:$0xff]   ;;  %2362 = vmatprep.subr.bf16.mxu1 %v6839_v1  ;;  %v6847_v6 = vld [vmem:[#allocation5 + $0x150] ss:$28 sps:$4 sm:$0xff]   ;;  %v6851_v9 = vld [vmem:[#allocation5 + $0x49c] ss:$28 sps:$4 sm:$0xff]  }
  0x37   :  { %v6842_v3 = vld [vmem:[#allocation5 + $0x508] ss:$28 sps:$4 sm:$0xff]   ;;  %2322 = vmatpush1.bf16.msra.mxu0 %v6841_v2  ;;  %v6848_v7 = vld [vmem:[#allocation5 + $0x4d0] ss:$28 sps:$4 sm:$0xff]   ;;  %v6853_v10 = vld [vmem:[#allocation5 + $0x118] ss:$28 sps:$4 sm:$0xff]  }
  0x38   :  { %2363 = vmatpush1.bf16.msra.mxu1 %v6842_v3  ;;  %2323 = vmatprep.subr.bf16.mxu0 %v6843_v4  ;;  %v6854_v11 = vld [vmem:[#allocation5 + $0x498] ss:$28 sps:$4 sm:$0xff]   ;;  %v6855_v12 = vld [vmem:[#allocation5 + $0xe4] ss:$28 sps:$4 sm:$0xff]   ;;  %v6861_v16 = vld [vmem:[#allocation5 + $0xac] ss:$28 sps:$4 sm:$0xff]  }
  0x39   :  { %2364 = vmatprep.subr.bf16.mxu1 %v6845_v5  ;;  %v6857_v13 = vld [vmem:[#allocation5 + $0x464] ss:$28 sps:$4 sm:$0xff]   ;;  %v6863_v17 = vld [vmem:[#allocation5 + $0x42c] ss:$28 sps:$4 sm:$0xff]   ;;  %v6867_v20 = vld [vmem:[#allocation5 + $0x74] ss:$28 sps:$4 sm:$0xff]  }
  0x3a   :  { %v6859_v14 = vld [vmem:[#allocation5 + $0xe0] ss:$28 sps:$4 sm:$0xff]   ;;  %v6865_v18 = vld [vmem:[#allocation5 + $0xa8] ss:$28 sps:$4 sm:$0xff]   ;;  %v6869_v21 = vld [vmem:[#allocation5 + $0x3f4] ss:$28 sps:$4 sm:$0xff]  }
  0x3b   :  { %2324 = vmatpush1.bf16.msra.mxu0 %v6847_v6  ;;  %v6860_v15 = vld [vmem:[#allocation5 + $0x460] ss:$28 sps:$4 sm:$0xff]   ;;  %v6866_v19 = vld [vmem:[#allocation5 + $0x428] ss:$28 sps:$4 sm:$0xff]   ;;  %v6871_v22 = vld [vmem:[#allocation5 + $0x70] ss:$28 sps:$4 sm:$0xff]  }
  0x3c   :  { %2365 = vmatpush1.bf16.msra.mxu1 %v6848_v7  ;;  %2325 = vmatprep.subr.bf16.mxu0 %v6849_v8  ;;  %v6872_v23 = vld [vmem:[#allocation5 + $0x3f0] ss:$28 sps:$4 sm:$0xff]   ;;  %v6873_v24 = vld [vmem:[#allocation5 + $0x3c] ss:$28 sps:$4 sm:$0xff]   ;;  %v6879_v28 = vld [vmem:[#allocation5 + $0x4] ss:$28 sps:$4 sm:$0xff]  }
  0x3d   :  { %2366 = vmatprep.subr.bf16.mxu1 %v6851_v9  ;;  %v6875_v25 = vld [vmem:[#allocation5 + $0x3bc] ss:$28 sps:$4 sm:$0xff]   ;;  %v6881_v29 = vld [vmem:[#allocation5 + $0x384] ss:$28 sps:$4 sm:$0xff]   ;;  %v6885_v32 = vld [vmem:[#allocation5 + $0x34c] ss:$28 sps:$4 sm:$0xff]  }
  0x3e   :  { %v6877_v26 = vld [vmem:[#allocation5 + $0x38] ss:$28 sps:$4 sm:$0xff]   ;;  %v6883_v30 = vld [vmem:[#allocation5] ss:$28 sps:$4 sm:$0xff]   ;;  %v6887_v33 = vld [vmem:[#allocation5 + $0x6cc] ss:$28 sps:$4 sm:$0xff]  }
  0x3f   :  { %2326 = vmatpush1.bf16.msra.mxu0 %v6853_v10  ;;  %v6878_v27 = vld [vmem:[#allocation5 + $0x3b8] ss:$28 sps:$4 sm:$0xff]   ;;  %v6884_v31 = vld [vmem:[#allocation5 + $0x380] ss:$28 sps:$4 sm:$0xff]   ;;  %v6889_v34 = vld [vmem:[#allocation5 + $0x348] ss:$28 sps:$4 sm:$0xff]  }
  0x40   :  { %2367 = vmatpush1.bf16.msra.mxu1 %v6854_v11  ;;  %2327 = vmatprep.subr.bf16.mxu0 %v6855_v12  ;;  %v6890_v35 = vld [vmem:[#allocation5 + $0x6c8] ss:$28 sps:$4 sm:$0xff]   ;;  %v7940_v37 = vmov 1966171168   ;;  %v6891_v39 = vld [vmem:[#allocation5 + $0x314] ss:$28 sps:$4 sm:$0xff]  }
  0x41   :  { %2368 = vmatprep.subr.bf16.mxu1 %v6857_v13  ;;  %v501_v38 = vunpack.c.l.s4 %v7940_v37  ;;  %v6893_v40 = vld [vmem:[#allocation5 + $0x694] ss:$28 sps:$4 sm:$0xff]   ;;  %v7983_v42 = vshrl.u32 %v470_v36, 7  ;;  %v6897_v45 = vld [vmem:[#allocation5 + $0x2dc] ss:$28 sps:$4 sm:$0xff]   ;;  %vm2317_vm0 = vcmask 130048  }
  0x42   :  { %v6895_v41 = vld [vmem:[#allocation5 + $0x310] ss:$28 sps:$4 sm:$0xff]   ;;  %v6899_v46 = vld [vmem:[#allocation5 + $0x65c] ss:$28 sps:$4 sm:$0xff]   ;;  %v6903_v50 = vld [vmem:[#allocation5 + $0x2a4] ss:$28 sps:$4 sm:$0xff]  }
  0x43   :  { %2328 = vmatpush1.bf16.msra.mxu0 %v6859_v14  ;;  %v502_v43 = vunpack.c.0.s8 %v501_v38  ;;  %v6896_v44 = vld [vmem:[#allocation5 + $0x690] ss:$28 sps:$4 sm:$0xff]   ;;  %v6901_v47 = vld [vmem:[#allocation5 + $0x2d8] ss:$28 sps:$4 sm:$0xff]   ;;  %v6905_v51 = vld [vmem:[#allocation5 + $0x624] ss:$28 sps:$4 sm:$0xff]  }
  0x44   :  { %2369 = vmatpush1.bf16.msra.mxu1 %v6860_v15  ;;  %2329 = vmatprep.subr.bf16.mxu0 %v6861_v16  ;;  %v6902_v48 = vld [vmem:[#allocation5 + $0x658] ss:$28 sps:$4 sm:$0xff]   ;;  %v6907_v53 = vld [vmem:[#allocation5 + $0x2a0] ss:$28 sps:$4 sm:$0xff]   ;;  %v6909_v56 = vld [vmem:[#allocation5 + $0x26c] ss:$28 sps:$4 sm:$0xff]  }
  0x45   :  { %2370 = vmatprep.subr.bf16.mxu1 %v6863_v17  ;;  %v7986_v49 = vsub.s32 %v502_v43, %v7983_v42  ;;  %v77_v52 = vld [vmem:[#allocation2] sm:$0x7f]  ;;  %v6911_v57 = vld [vmem:[#allocation5 + $0x5ec] ss:$28 sps:$4 sm:$0xff]   ;;  %v6915_v62 = vld [vmem:[#allocation5 + $0x234] ss:$28 sps:$4 sm:$0xff]  }
  0x46   :  { %v6908_v55 = vld [vmem:[#allocation5 + $0x620] ss:$28 sps:$4 sm:$0xff]   ;;  %v6913_v59 = vld [vmem:[#allocation5 + $0x268] ss:$28 sps:$4 sm:$0xff]   ;;  %v6917_v63 = vld [vmem:[#allocation5 + $0x5b4] ss:$28 sps:$4 sm:$0xff]   ;;  %v499_v7 = vcombine.high %v77_v52, %v77_v52 }
  0x47   :  { %2330 = vmatpush1.bf16.msra.mxu0 %v6865_v18  ;;  %v506_v54 = vrot.slane %v77_v52, %v7986_v49  ;;  %v6914_v61 = vld [vmem:[#allocation5 + $0x5e8] ss:$28 sps:$4 sm:$0xff]   ;;  %v6919_v1 = vld [vmem:[#allocation5 + $0x230] ss:$28 sps:$4 sm:$0xff]   ;;  %v6921_v3 = vld [vmem:[#allocation5 + $0x1fc] ss:$28 sps:$4 sm:$0xff]  }
  0x48   :  { %2371 = vmatpush1.bf16.msra.mxu1 %v6866_v19  ;;  %2331 = vmatprep.subr.bf16.mxu0 %v6867_v20  ;;  %v6920_v2 = vld [vmem:[#allocation5 + $0x5b0] ss:$28 sps:$4 sm:$0xff]   ;;  %v6923_v4 = vld [vmem:[#allocation5 + $0x57c] ss:$28 sps:$4 sm:$0xff]   ;;  %v6927_v8 = vld [vmem:[#allocation5 + $0x1c4] ss:$28 sps:$4 sm:$0xff]   ;;  %v513_v13 = vrot.slane %v499_v7, %v7986_v49 }
  0x49   :  { %2372 = vmatprep.subr.bf16.mxu1 %v6869_v21  ;;  %v514_v58 = vcombine.high %v506_v54, %v506_v54  ;;  %v6925_v5 = vld [vmem:[#allocation5 + $0x1f8] ss:$28 sps:$4 sm:$0xff]   ;;  %v6929_v9 = vld [vmem:[#allocation5 + $0x544] ss:$28 sps:$4 sm:$0xff]   ;;  %v7999_v11 = vrot.slane %v506_v54, %v7986_v49  ;;  %v6936_v14 = vld [vmem:[#allocation5 + $0x88c] ss:$28 sps:$4 sm:$0xff]  }
  0x4a   :  { %v6926_v6 = vld [vmem:[#allocation5 + $0x578] ss:$28 sps:$4 sm:$0xff]   ;;  %v6931_v10 = vld [vmem:[#allocation5 + $0x1c0] ss:$28 sps:$4 sm:$0xff]   ;;  %v515_v16 = vcombine.high %v513_v13, %v513_v13  ;;  %v6934_v18 = vld [vmem:[#allocation5 + $0x888] ss:$28 sps:$4 sm:$0xff]  }
  0x4b   :  { %2332 = vmatpush1.bf16.msra.mxu0 %v6871_v22  ;;  %v7990_v60 = vrot.slane %v514_v58, %v7986_v49  ;;  %v6932_v12 = vld [vmem:[#allocation5 + $0x540] ss:$28 sps:$4 sm:$0xff]   ;;  %v8004_v17 = vcombine.high %v7999_v11, %v7999_v11  ;;  %v6942_v20 = vld [vmem:[#allocation5 + $0x854] ss:$28 sps:$4 sm:$0xff]   ;;  %v6958_v37 = vld [vmem:[#allocation5 + $0x7a8] ss:$28 sps:$4 sm:$0xff]  }
  0x4c   :  { %2373 = vmatpush1.bf16.msra.mxu1 %v6872_v23  ;;  %2333 = vmatprep.subr.bf16.mxu0 %v6873_v24  ;;  %v6939_v15 = vld [vmem:[#allocation5 + $0xa84] ss:$28 sps:$4 sm:$0xff]   ;;  %v6945_v21 = vld [vmem:[#allocation5 + $0x194] ss:$28 sps:$4 sm:$0xff]   ;;  %v8007_v22 = vrot.slane %v515_v16, %v7986_v49  ;;  %v8010_v23 = vrot.slane %v513_v13, %v7986_v49  ;;  %v6963_v38 = vld [vmem:[#allocation5 + $0xec] ss:$28 sps:$4 sm:$0xff]  }
  0x4d   :  { %2374 = vmatprep.subr.bf16.mxu1 %v6875_v25  ;;  %v7994_v0 = vcombine.high %v7990_v60, %v7990_v60  ;;  %2353 = vmatprep.mubr.bf16.mxu0 %v7990_v60  ;;  %v6937_v19 = vld [vmem:[#allocation5 + $0xa80] ss:$28 sps:$4 sm:$0xff]   ;;  %v6940_v24 = vld [vmem:[#allocation5 + $0x850] ss:$28 sps:$4 sm:$0xff]   ;;  %v7941_v25 = vmov 0   ;;  %vm7943_vm2 = vmmov 0  }
  0x4e   :  { %v6955_v36 = vld [vmem:[#allocation5 + $0x120] ss:$28 sps:$4 sm:$0xff]   ;;  %v6969_v43 = vld [vmem:[#allocation5 + $0xb4] ss:$28 sps:$4 sm:$0xff]   ;;  %v6984_v52 = vld [vmem:[#allocation5 + $0xa4c] ss:$28 sps:$4 sm:$0xff]  }
  0x4f   :  { %2334 = vmatpush1.bf16.msra.mxu0 %v6877_v26  ;;  %2394 = vmatprep.mubr.bf16.mxu1 %v7994_v0  ;;  %v6948_v26 = vld [vmem:[#allocation5 + $0x81c] ss:$28 sps:$4 sm:$0xff]   ;;  %v6982_v54 = vld [vmem:[#allocation5 + $0xa48] ss:$28 sps:$4 sm:$0xff]   ;;  %v6988_v58 = vld [vmem:[#allocation5 + $0xa10] ss:$28 sps:$4 sm:$0xff]  }
  0x50   :  { %2375 = vmatpush1.bf16.msra.mxu1 %v6878_v27  ;;  %2335 = vmatprep.subr.bf16.mxu0 %v6879_v28  ;;  %v6943_v27 = vld [vmem:[#allocation5 + $0x190] ss:$28 sps:$4 sm:$0xff]   ;;  %v8018_v28 = vcombine.high %v8010_v23, %v8010_v23  ;;  %v6973_v49 = vld [vmem:[#allocation5 + $0x78] ss:$28 sps:$4 sm:$0xff]   ;;  %v7003_v7 = vld [vmem:[#allocation5 + $0x2e0] ss:$28 sps:$4 sm:$0xff]  }
  0x51   :  { %2376 = vmatprep.subr.bf16.mxu1 %v6881_v29  ;;  %v6946_v29 = vld [vmem:[#allocation5 + $0x818] ss:$28 sps:$4 sm:$0xff]   ;;  %v7012_v13 = vld [vmem:[#allocation5 + $0x930] ss:$28 sps:$4 sm:$0xff]   ;;  %vm5960_vm15 = vcmask 1041408   ;;  %s7945_s2 = smov [#allocation10]  }
  0x52   :  { %v7015_v16 = vld [vmem:[#allocation5 + $0x270] ss:$28 sps:$4 sm:$0xff]   ;;  %s5972_s3 = sshll.u32 %s7945_s2, 4  ;;  %s5973_s3 = int_to_ptr.vmem [resolvable:$true] %s5972_s3 }
  0x53   :  { %2336 = vmatpush1.bf16.msra.mxu0 %v6883_v30  ;;  %v6951_v30 = vld [vmem:[#allocation5 + $0x15c] ss:$28 sps:$4 sm:$0xff]   ;;  %s7906_s10 = scalar_lea.vmem %s5973_s3, 224  ;;  %p7911_p7 = scmp.lt.s32.totalorder %s5973_s3, %s5973_s3 }
  0x54   :  { %2377 = vmatpush1.bf16.msra.mxu1 %v6884_v31  ;;  %2337 = vmatprep.subr.bf16.mxu0 %v6885_v32  ;;  %v6954_v31 = vld [vmem:[#allocation5 + $0x7e4] ss:$28 sps:$4 sm:$0xff]   ;;  %v6949_v32 = vld [vmem:[#allocation5 + $0x158] ss:$28 sps:$4 sm:$0xff]   ;;  %p7907_p6 = scmp.ne.s32.totalorder %s5973_s3, %s7906_s10  ;;  %p7912_p8 = scmp.lt.s32.totalorder %s7906_s10, %s7906_s10 }
  0x55   :  { %2378 = vmatprep.subr.bf16.mxu1 %v6887_v33  ;;  %v6952_v33 = vld [vmem:[#allocation5 + $0x7e0] ss:$28 sps:$4 sm:$0xff]  }
  0x56   :  { %p7913_p9 = por %p7912_p8, %p7911_p7 }
  0x57   :  { %2338 = vmatpush2.bf16.msra.mxu0 %v6889_v34  ;;  %v6957_v34 = vld [vmem:[#allocation5 + $0x124] ss:$28 sps:$4 sm:$0xff]  }
  0x58   :  { %2379 = vmatpush2.bf16.msra.mxu1 %v6890_v35  ;;  %2339 = vmatprep.subr.bf16.mxu0 %v6891_v39  ;;  %v6960_v35 = vld [vmem:[#allocation5 + $0x7ac] ss:$28 sps:$4 sm:$0xff]   ;;  %v6966_v39 = vld [vmem:[#allocation5 + $0x774] ss:$28 sps:$4 sm:$0xff]   ;;  %p7914_p10 = pnand %p7913_p9, %p7907_p6 }
  0x59   :  { %2380 = vmatprep.subr.bf16.mxu1 %v6893_v40  ;;  %v6961_v40 = vld [vmem:[#allocation5 + $0xe8] ss:$28 sps:$4 sm:$0xff]  }
  0x5b   :  { %2340 = vmatpush2.bf16.msra.mxu0 %v6895_v41  ;;  %v6964_v41 = vld [vmem:[#allocation5 + $0x770] ss:$28 sps:$4 sm:$0xff]  }
  0x5c   :  { %2381 = vmatpush2.bf16.msra.mxu1 %v6896_v44  ;;  %2341 = vmatprep.subr.bf16.mxu0 %v6897_v45  ;;  %v6972_v44 = vld [vmem:[#allocation5 + $0x73c] ss:$28 sps:$4 sm:$0xff]   ;;  %v6967_v45 = vld [vmem:[#allocation5 + $0xb0] ss:$28 sps:$4 sm:$0xff]  }
  0x5d   :  { %2382 = vmatprep.subr.bf16.mxu1 %v6899_v46  ;;  %v6970_v46 = vld [vmem:[#allocation5 + $0x738] ss:$28 sps:$4 sm:$0xff]  }
  0x5f   :  { %2342 = vmatpush2.bf16.msra.mxu0 %v6901_v47  ;;  %v6975_v47 = vld [vmem:[#allocation5 + $0x7c] ss:$28 sps:$4 sm:$0xff]  }
  0x60   :  { %2383 = vmatpush2.bf16.msra.mxu1 %v6902_v48  ;;  %2343 = vmatprep.subr.bf16.mxu0 %v6903_v50  ;;  %v6978_v48 = vld [vmem:[#allocation5 + $0x704] ss:$28 sps:$4 sm:$0xff]  }
  0x61   :  { %2384 = vmatprep.subr.bf16.mxu1 %v6905_v51  ;;  %v6976_v50 = vld [vmem:[#allocation5 + $0x700] ss:$28 sps:$4 sm:$0xff]  }
  0x62   :  { %v6981_v51 = vld [vmem:[#allocation5 + $0x44] ss:$28 sps:$4 sm:$0xff]  }
  0x63   :  { %2344 = vmatpush2.bf16.msra.mxu0 %v6907_v53  ;;  %v6979_v53 = vld [vmem:[#allocation5 + $0x40] ss:$28 sps:$4 sm:$0xff]  }
  0x64   :  { %2385 = vmatpush2.bf16.msra.mxu1 %v6908_v55  ;;  %2345 = vmatprep.subr.bf16.mxu0 %v6909_v56  ;;  %v6987_v55 = vld [vmem:[#allocation5 + $0xc] ss:$28 sps:$4 sm:$0xff]   ;;  %v6990_v56 = vld [vmem:[#allocation5 + $0xa14] ss:$28 sps:$4 sm:$0xff]  }
  0x65   :  { %2386 = vmatprep.subr.bf16.mxu1 %v6911_v57  ;;  %v6985_v57 = vld [vmem:[#allocation5 + $0x8] ss:$28 sps:$4 sm:$0xff]  }
  0x67   :  { %2346 = vmatpush2.bf16.msra.mxu0 %v6913_v59  ;;  %v6993_v59 = vld [vmem:[#allocation5 + $0x354] ss:$28 sps:$4 sm:$0xff]  }
  0x68   :  { %2387 = vmatpush2.bf16.msra.mxu1 %v6914_v61  ;;  %2347 = vmatprep.subr.bf16.mxu0 %v6915_v62  ;;  %v6996_v61 = vld [vmem:[#allocation5 + $0x9dc] ss:$28 sps:$4 sm:$0xff]   ;;  %v6991_v62 = vld [vmem:[#allocation5 + $0x350] ss:$28 sps:$4 sm:$0xff]  }
  0x69   :  { %2388 = vmatprep.subr.bf16.mxu1 %v6917_v63  ;;  %v6994_v63 = vld [vmem:[#allocation5 + $0x9d8] ss:$28 sps:$4 sm:$0xff]  }
  0x6b   :  { %2348 = vmatpush2.bf16.msra.mxu0 %v6919_v1  ;;  %v6999_v1 = vld [vmem:[#allocation5 + $0x31c] ss:$28 sps:$4 sm:$0xff]  }
  0x6c   :  { %2389 = vmatpush2.bf16.msra.mxu1 %v6920_v2  ;;  %2349 = vmatprep.subr.bf16.mxu0 %v6921_v3  ;;  %v7002_v2 = vld [vmem:[#allocation5 + $0x9a4] ss:$28 sps:$4 sm:$0xff]   ;;  %v6997_v3 = vld [vmem:[#allocation5 + $0x318] ss:$28 sps:$4 sm:$0xff]  }
  0x6d   :  { %2390 = vmatprep.subr.bf16.mxu1 %v6923_v4  ;;  %v7000_v4 = vld [vmem:[#allocation5 + $0x9a0] ss:$28 sps:$4 sm:$0xff]  }
  0x6f   :  { %2350 = vmatpush2.bf16.msra.mxu0 %v6925_v5  ;;  %v7005_v5 = vld [vmem:[#allocation5 + $0x2e4] ss:$28 sps:$4 sm:$0xff]  }
  0x70   :  { %2391 = vmatpush2.bf16.msra.mxu1 %v6926_v6  ;;  %2351 = vmatprep.subr.bf16.mxu0 %v6927_v8  ;;  %v7008_v6 = vld [vmem:[#allocation5 + $0x96c] ss:$28 sps:$4 sm:$0xff]  }
  0x71   :  { %2392 = vmatprep.subr.bf16.mxu1 %v6929_v9  ;;  %v7006_v8 = vld [vmem:[#allocation5 + $0x968] ss:$28 sps:$4 sm:$0xff]  }
  0x72   :  { %v7011_v9 = vld [vmem:[#allocation5 + $0x2ac] ss:$28 sps:$4 sm:$0xff]  }
  0x73   :  { %2352 = vmatpush2.bf16.msra.mxu0 %v6931_v10  ;;  %v7014_v10 = vld [vmem:[#allocation5 + $0x934] ss:$28 sps:$4 sm:$0xff]  }
  0x74   :  { %2393 = vmatpush2.bf16.msra.mxu1 %v6932_v12  ;;  %2403 = vmatprep.subr.bf16.mxu0 %v6936_v14  ;;  %v7009_v12 = vld [vmem:[#allocation5 + $0x2a8] ss:$28 sps:$4 sm:$0xff]   ;;  %v7017_v14 = vld [vmem:[#allocation5 + $0x274] ss:$28 sps:$4 sm:$0xff]  }
  0x75   :  { %2458 = vmatprep.subr.bf16.mxu1 %v6939_v15  ;;  %v7020_v15 = vld [vmem:[#allocation5 + $0x8fc] ss:$28 sps:$4 sm:$0xff]  }
  0x76   :  { %2354 = vmatmul.mubr.bf16.vlgmr.msra.gmra.mxu0 %v7999_v11 }
  0x77   :  { %2395 = vmatmul.mubr.bf16.vlgmr.msra.gmra.mxu1 %v8004_v17  ;;  %2404 = vmatpush1.bf16.msra.mxu0 %v6934_v18  ;;  %v7018_v18 = vld [vmem:[#allocation5 + $0x8f8] ss:$28 sps:$4 sm:$0xff]  }
  0x78   :  { %2459 = vmatpush1.bf16.msra.mxu1 %v6937_v19  ;;  %2405 = vmatprep.subr.bf16.mxu0 %v6942_v20  ;;  %v7023_v19 = vld [vmem:[#allocation5 + $0x23c] ss:$28 sps:$4 sm:$0xff]   ;;  %v7026_v20 = vld [vmem:[#allocation5 + $0x8c4] ss:$28 sps:$4 sm:$0xff]  }
  0x79   :  { %2476 = vmatprep.mubr.bf16.mxu1 %v7941_v25  ;;  %2485 = vmatprep.subr.bf16.mxu1 %v6945_v21  ;;  %v7021_v21 = vld [vmem:[#allocation5 + $0x238] ss:$28 sps:$4 sm:$0xff]  }
  0x7a   :  { %2435 = vmatprep.mubr.bf16.mxu0 %v8007_v22 }
  0x7b   :  { %2406 = vmatpush1.bf16.msra.mxu0 %v6940_v24  ;;  %v7024_v24 = vld [vmem:[#allocation5 + $0x8c0] ss:$28 sps:$4 sm:$0xff]  }
  0x7c   :  { %2407 = vmatprep.subr.bf16.mxu0 %v6948_v26  ;;  %v7029_v26 = vld [vmem:[#allocation5 + $0x204] ss:$28 sps:$4 sm:$0xff]  }
  0x7f   :  { %6326 = vmatmul.mubr.msk.bf16.vlgmr.msra.gmra.mxu1 %vm2317_vm0, %v8018_v28  ;;  %2408 = vmatpush1.bf16.msra.mxu0 %v6946_v29  ;;  %v7027_v29 = vld [vmem:[#allocation5 + $0x200] ss:$28 sps:$4 sm:$0xff]  }
  0x80   :  { %2486 = vmatpush1.bf16.msra.mxu1 %v6943_v27  ;;  %2409 = vmatprep.subr.bf16.mxu0 %v6954_v31  ;;  %v7032_v27 = vld [vmem:[#allocation5 + $0x514] ss:$28 sps:$4 sm:$0xff]   ;;  %v7035_v31 = vld [vmem:[#allocation5 + $0x1cc] ss:$28 sps:$4 sm:$0xff]  }
  0x81   :  { %2487 = vmatprep.subr.bf16.mxu1 %v6951_v30  ;;  %2517 = vmatprep.mubr.bf16.mxu1 %v7990_v60  ;;  %v7030_v30 = vld [vmem:[#allocation5 + $0x510] ss:$28 sps:$4 sm:$0xff]  }
  0x83   :  { %2410 = vmatpush1.bf16.msra.mxu0 %v6952_v33  ;;  %v7033_v33 = vld [vmem:[#allocation5 + $0x1c8] ss:$28 sps:$4 sm:$0xff]  }
  0x84   :  { %2488 = vmatpush1.bf16.msra.mxu1 %v6949_v32  ;;  %2411 = vmatprep.subr.bf16.mxu0 %v6960_v35  ;;  %v7038_v32 = vld [vmem:[#allocation5 + $0x4dc] ss:$28 sps:$4 sm:$0xff]   ;;  %v7041_v35 = vld [vmem:[#allocation5 + $0x894] ss:$28 sps:$4 sm:$0xff]  }
  0x85   :  { %2489 = vmatprep.subr.bf16.mxu1 %v6957_v34  ;;  %v7036_v34 = vld [vmem:[#allocation5 + $0x4d8] ss:$28 sps:$4 sm:$0xff]  }
  0x87   :  { %2412 = vmatpush1.bf16.msra.mxu0 %v6958_v37  ;;  %v7039_v37 = vld [vmem:[#allocation5 + $0x890] ss:$28 sps:$4 sm:$0xff]  }
  0x88   :  { %2490 = vmatpush1.bf16.msra.mxu1 %v6955_v36  ;;  %2413 = vmatprep.subr.bf16.mxu0 %v6966_v39  ;;  %v7044_v36 = vld [vmem:[#allocation5 + $0x4a4] ss:$28 sps:$4 sm:$0xff]   ;;  %v7047_v39 = vld [vmem:[#allocation5 + $0x85c] ss:$28 sps:$4 sm:$0xff]  }
  0x89   :  { %2491 = vmatprep.subr.bf16.mxu1 %v6963_v38  ;;  %v7042_v38 = vld [vmem:[#allocation5 + $0x4a0] ss:$28 sps:$4 sm:$0xff]  }
  0x8b   :  { %2414 = vmatpush1.bf16.msra.mxu0 %v6964_v41  ;;  %v7045_v41 = vld [vmem:[#allocation5 + $0x858] ss:$28 sps:$4 sm:$0xff]  }
  0x8c   :  { %2492 = vmatpush1.bf16.msra.mxu1 %v6961_v40  ;;  %2415 = vmatprep.subr.bf16.mxu0 %v6972_v44  ;;  %v7050_v40 = vld [vmem:[#allocation5 + $0x46c] ss:$28 sps:$4 sm:$0xff]   ;;  %v7053_v44 = vld [vmem:[#allocation5 + $0x824] ss:$28 sps:$4 sm:$0xff]  }
  0x8d   :  { %2493 = vmatprep.subr.bf16.mxu1 %v6969_v43  ;;  %v7048_v43 = vld [vmem:[#allocation5 + $0x468] ss:$28 sps:$4 sm:$0xff]  }
  0x8f   :  { %2416 = vmatpush1.bf16.msra.mxu0 %v6970_v46  ;;  %v7051_v46 = vld [vmem:[#allocation5 + $0x820] ss:$28 sps:$4 sm:$0xff]  }
  0x90   :  { %2494 = vmatpush1.bf16.msra.mxu1 %v6967_v45  ;;  %2417 = vmatprep.subr.bf16.mxu0 %v6978_v48  ;;  %v7056_v45 = vld [vmem:[#allocation5 + $0x434] ss:$28 sps:$4 sm:$0xff]   ;;  %v7059_v48 = vld [vmem:[#allocation5 + $0x7ec] ss:$28 sps:$4 sm:$0xff]  }
  0x91   :  { %2495 = vmatprep.subr.bf16.mxu1 %v6975_v47  ;;  %v7054_v47 = vld [vmem:[#allocation5 + $0x430] ss:$28 sps:$4 sm:$0xff]  }
  0x93   :  { %2418 = vmatpush1.bf16.msra.mxu0 %v6976_v50  ;;  %v7057_v50 = vld [vmem:[#allocation5 + $0x7e8] ss:$28 sps:$4 sm:$0xff]  }
  0x94   :  { %2496 = vmatpush1.bf16.msra.mxu1 %v6973_v49  ;;  %2419 = vmatprep.subr.bf16.mxu0 %v6984_v52  ;;  %v7062_v49 = vld [vmem:[#allocation5 + $0x3fc] ss:$28 sps:$4 sm:$0xff]   ;;  %v7065_v52 = vld [vmem:[#allocation5 + $0x7b4] ss:$28 sps:$4 sm:$0xff]  }
  0x95   :  { %2497 = vmatprep.subr.bf16.mxu1 %v6981_v51  ;;  %v7060_v51 = vld [vmem:[#allocation5 + $0x3f8] ss:$28 sps:$4 sm:$0xff]  }
  0x97   :  { %2420 = vmatpush2.bf16.msra.mxu0 %v6982_v54  ;;  %v7063_v54 = vld [vmem:[#allocation5 + $0x7b0] ss:$28 sps:$4 sm:$0xff]  }
  0x98   :  { %2498 = vmatpush1.bf16.msra.mxu1 %v6979_v53  ;;  %2421 = vmatprep.subr.bf16.mxu0 %v6990_v56  ;;  %v7068_v53 = vld [vmem:[#allocation5 + $0x3c4] ss:$28 sps:$4 sm:$0xff]   ;;  %v7071_v56 = vld [vmem:[#allocation5 + $0x77c] ss:$28 sps:$4 sm:$0xff]  }
  0x99   :  { %2499 = vmatprep.subr.bf16.mxu1 %v6987_v55  ;;  %v7066_v55 = vld [vmem:[#allocation5 + $0x3c0] ss:$28 sps:$4 sm:$0xff]  }
  0x9b   :  { %2422 = vmatpush2.bf16.msra.mxu0 %v6988_v58  ;;  %v7069_v58 = vld [vmem:[#allocation5 + $0x778] ss:$28 sps:$4 sm:$0xff]  }
  0x9c   :  { %2500 = vmatpush1.bf16.msra.mxu1 %v6985_v57  ;;  %2423 = vmatprep.subr.bf16.mxu0 %v6996_v61  ;;  %v7074_v57 = vld [vmem:[#allocation5 + $0x38c] ss:$28 sps:$4 sm:$0xff]   ;;  %v7077_v61 = vld [vmem:[#allocation5 + $0x744] ss:$28 sps:$4 sm:$0xff]  }
  0x9d   :  { %2501 = vmatprep.subr.bf16.mxu1 %v6993_v59  ;;  %v7072_v59 = vld [vmem:[#allocation5 + $0x388] ss:$28 sps:$4 sm:$0xff]  }
  0x9f   :  { %2424 = vmatpush2.bf16.msra.mxu0 %v6994_v63  ;;  %v7075_v63 = vld [vmem:[#allocation5 + $0x740] ss:$28 sps:$4 sm:$0xff]  }
  0xa0   :  { %2502 = vmatpush2.bf16.msra.mxu1 %v6991_v62  ;;  %2425 = vmatprep.subr.bf16.mxu0 %v7002_v2  ;;  %v7080_v62 = vld [vmem:[#allocation5 + $0x6d4] ss:$28 sps:$4 sm:$0xff]   ;;  %v7083_v2 = vld [vmem:[#allocation5 + $0x70c] ss:$28 sps:$4 sm:$0xff]  }
  0xa1   :  { %2503 = vmatprep.subr.bf16.mxu1 %v6999_v1  ;;  %v7078_v1 = vld [vmem:[#allocation5 + $0x6d0] ss:$28 sps:$4 sm:$0xff]  }
  0xa3   :  { %2426 = vmatpush2.bf16.msra.mxu0 %v7000_v4  ;;  %v7081_v4 = vld [vmem:[#allocation5 + $0x708] ss:$28 sps:$4 sm:$0xff]  }
  0xa4   :  { %2504 = vmatpush2.bf16.msra.mxu1 %v6997_v3  ;;  %2427 = vmatprep.subr.bf16.mxu0 %v7008_v6  ;;  %v7086_v3 = vld [vmem:[#allocation5 + $0x69c] ss:$28 sps:$4 sm:$0xff]   ;;  %v7089_v6 = vld [vmem:[#allocation5 + $0xa54] ss:$28 sps:$4 sm:$0xff]  }
  0xa5   :  { %2505 = vmatprep.subr.bf16.mxu1 %v7005_v5  ;;  %v7084_v5 = vld [vmem:[#allocation5 + $0x698] ss:$28 sps:$4 sm:$0xff]  }
  0xa7   :  { %2428 = vmatpush2.bf16.msra.mxu0 %v7006_v8  ;;  %v7087_v8 = vld [vmem:[#allocation5 + $0xa50] ss:$28 sps:$4 sm:$0xff]  }
  0xa8   :  { %2506 = vmatpush2.bf16.msra.mxu1 %v7003_v7  ;;  %2429 = vmatprep.subr.bf16.mxu0 %v7014_v10  ;;  %v7092_v7 = vld [vmem:[#allocation5 + $0x664] ss:$28 sps:$4 sm:$0xff]   ;;  %v7095_v10 = vld [vmem:[#allocation5 + $0xa1c] ss:$28 sps:$4 sm:$0xff]  }
  0xa9   :  { %2507 = vmatprep.subr.bf16.mxu1 %v7011_v9  ;;  %v7090_v9 = vld [vmem:[#allocation5 + $0x660] ss:$28 sps:$4 sm:$0xff]  }
  0xab   :  { %2430 = vmatpush2.bf16.msra.mxu0 %v7012_v13  ;;  %v7093_v13 = vld [vmem:[#allocation5 + $0xa18] ss:$28 sps:$4 sm:$0xff]  }
  0xac   :  { %2508 = vmatpush2.bf16.msra.mxu1 %v7009_v12  ;;  %2431 = vmatprep.subr.bf16.mxu0 %v7020_v15  ;;  %v7098_v12 = vld [vmem:[#allocation5 + $0x62c] ss:$28 sps:$4 sm:$0xff]   ;;  %v7101_v15 = vld [vmem:[#allocation5 + $0x9e4] ss:$28 sps:$4 sm:$0xff]  }
  0xad   :  { %2509 = vmatprep.subr.bf16.mxu1 %v7017_v14  ;;  %v7096_v14 = vld [vmem:[#allocation5 + $0x628] ss:$28 sps:$4 sm:$0xff]  }
  0xaf   :  { %2432 = vmatpush2.bf16.msra.mxu0 %v7018_v18  ;;  %v7099_v18 = vld [vmem:[#allocation5 + $0x9e0] ss:$28 sps:$4 sm:$0xff]  }
  0xb0   :  { %2510 = vmatpush2.bf16.msra.mxu1 %v7015_v16  ;;  %2433 = vmatprep.subr.bf16.mxu0 %v7026_v20  ;;  %v7104_v16 = vld [vmem:[#allocation5 + $0x5f4] ss:$28 sps:$4 sm:$0xff]   ;;  %v7107_v20 = vld [vmem:[#allocation5 + $0x9ac] ss:$28 sps:$4 sm:$0xff]  }
  0xb1   :  { %2511 = vmatprep.subr.bf16.mxu1 %v7023_v19  ;;  %v7102_v19 = vld [vmem:[#allocation5 + $0x5f0] ss:$28 sps:$4 sm:$0xff]  }
  0xb3   :  { %2434 = vmatpush2.bf16.msra.mxu0 %v7024_v24  ;;  %v7105_v24 = vld [vmem:[#allocation5 + $0x9a8] ss:$28 sps:$4 sm:$0xff]  }
  0xb4   :  { %2512 = vmatpush2.bf16.msra.mxu1 %v7021_v21  ;;  %2526 = vmatprep.subr.bf16.mxu0 %v7032_v27  ;;  %v7110_v21 = vld [vmem:[#allocation5 + $0x5bc] ss:$28 sps:$4 sm:$0xff]   ;;  %v7113_v27 = vld [vmem:[#allocation5 + $0x974] ss:$28 sps:$4 sm:$0xff]  }
  0xb5   :  { %2513 = vmatprep.subr.bf16.mxu1 %v7029_v26  ;;  %v7108_v26 = vld [vmem:[#allocation5 + $0x5b8] ss:$28 sps:$4 sm:$0xff]  }
  0xb6   :  { %2436 = vmatmul.mubr.bf16.vlgmr.msra.gmra.mxu0 %v8010_v23 }
  0xb7   :  { %2527 = vmatpush1.bf16.msra.mxu0 %v7030_v30  ;;  %2558 = vmatprep.mubr.bf16.mxu0 %v7994_v0  ;;  %v7111_v30 = vld [vmem:[#allocation5 + $0x970] ss:$28 sps:$4 sm:$0xff]  }
  0xb8   :  { %2514 = vmatpush2.bf16.msra.mxu1 %v7027_v29  ;;  %2528 = vmatprep.subr.bf16.mxu0 %v7038_v32  ;;  %v7116_v29 = vld [vmem:[#allocation5 + $0x584] ss:$28 sps:$4 sm:$0xff]   ;;  %v7119_v32 = vld [vmem:[#allocation5 + $0x93c] ss:$28 sps:$4 sm:$0xff]  }
  0xb9   :  { %2515 = vmatprep.subr.bf16.mxu1 %v7035_v31  ;;  %v7114_v31 = vld [vmem:[#allocation5 + $0x580] ss:$28 sps:$4 sm:$0xff]  }
  0xbb   :  { %2529 = vmatpush1.bf16.msra.mxu0 %v7036_v34  ;;  %v7117_v34 = vld [vmem:[#allocation5 + $0x938] ss:$28 sps:$4 sm:$0xff]  }
  0xbc   :  { %2516 = vmatpush2.bf16.msra.mxu1 %v7033_v33  ;;  %2530 = vmatprep.subr.bf16.mxu0 %v7044_v36  ;;  %v7122_v33 = vld [vmem:[#allocation5 + $0x54c] ss:$28 sps:$4 sm:$0xff]   ;;  %v7125_v36 = vld [vmem:[#allocation5 + $0x904] ss:$28 sps:$4 sm:$0xff]  }
  0xbd   :  { %2567 = vmatprep.subr.bf16.mxu1 %v7041_v35  ;;  %v7120_v35 = vld [vmem:[#allocation5 + $0x548] ss:$28 sps:$4 sm:$0xff]  }
  0xbf   :  { %2518 = vmatmul.mubr.bf16.vlgmr.msra.gmra.mxu1 %v7999_v11  ;;  %2531 = vmatpush1.bf16.msra.mxu0 %v7042_v38  ;;  %v7123_v38 = vld [vmem:[#allocation5 + $0x900] ss:$28 sps:$4 sm:$0xff]  }
  0xc0   :  { %2568 = vmatpush1.bf16.msra.mxu1 %v7039_v37  ;;  %2532 = vmatprep.subr.bf16.mxu0 %v7050_v40  ;;  %v7128_v37 = vld [vmem:[#allocation5 + $0xa8c] ss:$28 sps:$4 sm:$0xff]  }
  0xc1   :  { %2569 = vmatprep.subr.bf16.mxu1 %v7047_v39  ;;  %2599 = vmatprep.mubr.bf16.mxu1 %v8007_v22  ;;  %v7126_v39 = vld [vmem:[#allocation5 + $0xa88] ss:$28 sps:$4 sm:$0xff]  }
  0xc2   :  { %v7131_v40 = vld [vmem:[#allocation5 + $0x8cc] ss:$28 sps:$4 sm:$0xff]  }
  0xc3   :  { %2533 = vmatpush1.bf16.msra.mxu0 %v7048_v43  ;;  %v7129_v43 = vld [vmem:[#allocation5 + $0x8c8] ss:$28 sps:$4 sm:$0xff]  }
  0xc4   :  { %2570 = vmatpush1.bf16.msra.mxu1 %v7045_v41  ;;  %2534 = vmatprep.subr.bf16.mxu0 %v7056_v45  ;;  %v7134_v41 = vld [vmem:[#allocation5 + $0x19c] ss:$28 sps:$4 sm:$0xff]  }
  0xc5   :  { %2571 = vmatprep.subr.bf16.mxu1 %v7053_v44  ;;  %v7137_v44 = vld [vmem:[#allocation5 + $0x51c] ss:$28 sps:$4 sm:$0xff]  }
  0xc6   :  { %v7132_v45 = vld [vmem:[#allocation5 + $0x198] ss:$28 sps:$4 sm:$0xff]  }
  0xc7   :  { %2535 = vmatpush1.bf16.msra.mxu0 %v7054_v47  ;;  %v7140_v47 = vld [vmem:[#allocation5 + $0x164] ss:$28 sps:$4 sm:$0xff]  }
  0xc8   :  { %2572 = vmatpush1.bf16.msra.mxu1 %v7051_v46  ;;  %2536 = vmatprep.subr.bf16.mxu0 %v7062_v49  ;;  %v7135_v46 = vld [vmem:[#allocation5 + $0x518] ss:$28 sps:$4 sm:$0xff]   ;;  %v7138_v49 = vld [vmem:[#allocation5 + $0x160] ss:$28 sps:$4 sm:$0xff]  }
  0xc9   :  { %2573 = vmatprep.subr.bf16.mxu1 %v7059_v48  ;;  %v7143_v48 = vld [vmem:[#allocation5 + $0x4e4] ss:$28 sps:$4 sm:$0xff]  }
  0xcb   :  { %2537 = vmatpush1.bf16.msra.mxu0 %v7060_v51  ;;  %v7146_v51 = vld [vmem:[#allocation5 + $0x12c] ss:$28 sps:$4 sm:$0xff]  }
  0xcc   :  { %2574 = vmatpush1.bf16.msra.mxu1 %v7057_v50  ;;  %2538 = vmatprep.subr.bf16.mxu0 %v7068_v53  ;;  %v7141_v50 = vld [vmem:[#allocation5 + $0x4e0] ss:$28 sps:$4 sm:$0xff]   ;;  %v7144_v53 = vld [vmem:[#allocation5 + $0x128] ss:$28 sps:$4 sm:$0xff]  }
  0xcd   :  { %2575 = vmatprep.subr.bf16.mxu1 %v7065_v52  ;;  %v7149_v52 = vld [vmem:[#allocation5 + $0x4ac] ss:$28 sps:$4 sm:$0xff]  }
  0xcf   :  { %2539 = vmatpush1.bf16.msra.mxu0 %v7066_v55  ;;  %v7152_v55 = vld [vmem:[#allocation5 + $0xf4] ss:$28 sps:$4 sm:$0xff]  }
  0xd0   :  { %2576 = vmatpush1.bf16.msra.mxu1 %v7063_v54  ;;  %2540 = vmatprep.subr.bf16.mxu0 %v7074_v57  ;;  %v7147_v54 = vld [vmem:[#allocation5 + $0x4a8] ss:$28 sps:$4 sm:$0xff]   ;;  %v7150_v57 = vld [vmem:[#allocation5 + $0xf0] ss:$28 sps:$4 sm:$0xff]  }
  0xd1   :  { %2577 = vmatprep.subr.bf16.mxu1 %v7071_v56  ;;  %v7155_v56 = vld [vmem:[#allocation5 + $0x474] ss:$28 sps:$4 sm:$0xff]  }
  0xd3   :  { %2541 = vmatpush1.bf16.msra.mxu0 %v7072_v59  ;;  %v7158_v59 = vld [vmem:[#allocation5 + $0xbc] ss:$28 sps:$4 sm:$0xff]  }
  0xd4   :  { %2578 = vmatpush1.bf16.msra.mxu1 %v7069_v58  ;;  %2542 = vmatprep.subr.bf16.mxu0 %v7080_v62  ;;  %v7153_v58 = vld [vmem:[#allocation5 + $0x470] ss:$28 sps:$4 sm:$0xff]   ;;  %v7156_v62 = vld [vmem:[#allocation5 + $0xb8] ss:$28 sps:$4 sm:$0xff]  }
  0xd5   :  { %2579 = vmatprep.subr.bf16.mxu1 %v7077_v61  ;;  %v7161_v61 = vld [vmem:[#allocation5 + $0x43c] ss:$28 sps:$4 sm:$0xff]  }
  0xd7   :  { %2543 = vmatpush2.bf16.msra.mxu0 %v7078_v1  ;;  %v7164_v1 = vld [vmem:[#allocation5 + $0x84] ss:$28 sps:$4 sm:$0xff]  }
  0xd8   :  { %2580 = vmatpush1.bf16.msra.mxu1 %v7075_v63  ;;  %2544 = vmatprep.subr.bf16.mxu0 %v7086_v3  ;;  %v7159_v63 = vld [vmem:[#allocation5 + $0x438] ss:$28 sps:$4 sm:$0xff]   ;;  %v7162_v3 = vld [vmem:[#allocation5 + $0x80] ss:$28 sps:$4 sm:$0xff]  }
  0xd9   :  { %2581 = vmatprep.subr.bf16.mxu1 %v7083_v2  ;;  %v7167_v2 = vld [vmem:[#allocation5 + $0x404] ss:$28 sps:$4 sm:$0xff]  }
  0xdb   :  { %2545 = vmatpush2.bf16.msra.mxu0 %v7084_v5  ;;  %v7170_v5 = vld [vmem:[#allocation5 + $0x4c] ss:$28 sps:$4 sm:$0xff]  }
  0xdc   :  { %2582 = vmatpush1.bf16.msra.mxu1 %v7081_v4  ;;  %2546 = vmatprep.subr.bf16.mxu0 %v7092_v7  ;;  %v7165_v4 = vld [vmem:[#allocation5 + $0x400] ss:$28 sps:$4 sm:$0xff]   ;;  %v7168_v7 = vld [vmem:[#allocation5 + $0x48] ss:$28 sps:$4 sm:$0xff]  }
  0xdd   :  { %2583 = vmatprep.subr.bf16.mxu1 %v7089_v6  ;;  %v7173_v6 = vld [vmem:[#allocation5 + $0x3cc] ss:$28 sps:$4 sm:$0xff]  }
  0xdf   :  { %2547 = vmatpush2.bf16.msra.mxu0 %v7090_v9  ;;  %v7176_v9 = vld [vmem:[#allocation5 + $0x14] ss:$28 sps:$4 sm:$0xff]  }
  0xe0   :  { %2584 = vmatpush2.bf16.msra.mxu1 %v7087_v8  ;;  %2548 = vmatprep.subr.bf16.mxu0 %v7098_v12  ;;  %v7171_v8 = vld [vmem:[#allocation5 + $0x3c8] ss:$28 sps:$4 sm:$0xff]   ;;  %v7174_v12 = vld [vmem:[#allocation5 + $0x10] ss:$28 sps:$4 sm:$0xff]  }
  0xe1   :  { %2585 = vmatprep.subr.bf16.mxu1 %v7095_v10  ;;  %v7179_v10 = vld [vmem:[#allocation5 + $0x394] ss:$28 sps:$4 sm:$0xff]  }
  0xe3   :  { %2549 = vmatpush2.bf16.msra.mxu0 %v7096_v14  ;;  %v7182_v14 = vld [vmem:[#allocation5 + $0x35c] ss:$28 sps:$4 sm:$0xff]  }
  0xe4   :  { %2586 = vmatpush2.bf16.msra.mxu1 %v7093_v13  ;;  %2550 = vmatprep.subr.bf16.mxu0 %v7104_v16  ;;  %v7177_v13 = vld [vmem:[#allocation5 + $0x390] ss:$28 sps:$4 sm:$0xff]   ;;  %v7180_v16 = vld [vmem:[#allocation5 + $0x358] ss:$28 sps:$4 sm:$0xff]  }
  0xe5   :  { %2587 = vmatprep.subr.bf16.mxu1 %v7101_v15  ;;  %v7185_v15 = vld [vmem:[#allocation5 + $0x6dc] ss:$28 sps:$4 sm:$0xff]  }
  0xe7   :  { %2551 = vmatpush2.bf16.msra.mxu0 %v7102_v19  ;;  %v7188_v19 = vld [vmem:[#allocation5 + $0x324] ss:$28 sps:$4 sm:$0xff]  }
  0xe8   :  { %2588 = vmatpush2.bf16.msra.mxu1 %v7099_v18  ;;  %2552 = vmatprep.subr.bf16.mxu0 %v7110_v21  ;;  %v7183_v18 = vld [vmem:[#allocation5 + $0x6d8] ss:$28 sps:$4 sm:$0xff]   ;;  %v7186_v21 = vld [vmem:[#allocation5 + $0x320] ss:$28 sps:$4 sm:$0xff]  }
  0xe9   :  { %2589 = vmatprep.subr.bf16.mxu1 %v7107_v20  ;;  %v7191_v20 = vld [vmem:[#allocation5 + $0x6a4] ss:$28 sps:$4 sm:$0xff]  }
  0xeb   :  { %2553 = vmatpush2.bf16.msra.mxu0 %v7108_v26  ;;  %v7194_v26 = vld [vmem:[#allocation5 + $0x2ec] ss:$28 sps:$4 sm:$0xff]  }
  0xec   :  { %2590 = vmatpush2.bf16.msra.mxu1 %v7105_v24  ;;  %2554 = vmatprep.subr.bf16.mxu0 %v7116_v29  ;;  %v7189_v24 = vld [vmem:[#allocation5 + $0x6a0] ss:$28 sps:$4 sm:$0xff]   ;;  %v7192_v29 = vld [vmem:[#allocation5 + $0x2e8] ss:$28 sps:$4 sm:$0xff]  }
  0xed   :  { %2591 = vmatprep.subr.bf16.mxu1 %v7113_v27  ;;  %v7197_v27 = vld [vmem:[#allocation5 + $0x66c] ss:$28 sps:$4 sm:$0xff]  }
  0xef   :  { %2555 = vmatpush2.bf16.msra.mxu0 %v7114_v31  ;;  %v7200_v31 = vld [vmem:[#allocation5 + $0x2b4] ss:$28 sps:$4 sm:$0xff]  }
  0xf0   :  { %2592 = vmatpush2.bf16.msra.mxu1 %v7111_v30  ;;  %2556 = vmatprep.subr.bf16.mxu0 %v7122_v33  ;;  %v7195_v30 = vld [vmem:[#allocation5 + $0x668] ss:$28 sps:$4 sm:$0xff]   ;;  %v7198_v33 = vld [vmem:[#allocation5 + $0x2b0] ss:$28 sps:$4 sm:$0xff]  }
  0xf1   :  { %2593 = vmatprep.subr.bf16.mxu1 %v7119_v32  ;;  %v7203_v32 = vld [vmem:[#allocation5 + $0x634] ss:$28 sps:$4 sm:$0xff]  }
  0xf3   :  { %2557 = vmatpush2.bf16.msra.mxu0 %v7120_v35  ;;  %v7206_v35 = vld [vmem:[#allocation5 + $0x27c] ss:$28 sps:$4 sm:$0xff]  }
  0xf4   :  { %2594 = vmatpush2.bf16.msra.mxu1 %v7117_v34  ;;  %2622 = vmatprep.subr.bf16.mxu0 %v7128_v37  ;;  %v7201_v34 = vld [vmem:[#allocation5 + $0x630] ss:$28 sps:$4 sm:$0xff]   ;;  %v7204_v37 = vld [vmem:[#allocation5 + $0x278] ss:$28 sps:$4 sm:$0xff]  }
  0xf5   :  { %2595 = vmatprep.subr.bf16.mxu1 %v7125_v36  ;;  %v7209_v36 = vld [vmem:[#allocation5 + $0x5fc] ss:$28 sps:$4 sm:$0xff]  }
  0xf6   :  { %2559 = vmatmul.mubr.bf16.vlgmr.msra.gmra.mxu0 %v8004_v17 }
  0xf7   :  { %2623 = vmatpush1.bf16.msra.mxu0 %v7126_v39  ;;  %2640 = vmatprep.mubr.bf16.mxu0 %v7941_v25  ;;  %v7212_v39 = vld [vmem:[#allocation5 + $0x244] ss:$28 sps:$4 sm:$0xff]  }
  0xf8   :  { %2596 = vmatpush2.bf16.msra.mxu1 %v7123_v38  ;;  %2649 = vmatprep.subr.bf16.mxu0 %v7134_v41  ;;  %v7207_v38 = vld [vmem:[#allocation5 + $0x5f8] ss:$28 sps:$4 sm:$0xff]   ;;  %v7210_v41 = vld [vmem:[#allocation5 + $0x240] ss:$28 sps:$4 sm:$0xff]  }
  0xf9   :  { %2597 = vmatprep.subr.bf16.mxu1 %v7131_v40  ;;  %v7215_v40 = vld [vmem:[#allocation5 + $0x5c4] ss:$28 sps:$4 sm:$0xff]  }
  0xfc   :  { %2598 = vmatpush2.bf16.msra.mxu1 %v7129_v43  ;;  %v7213_v43 = vld [vmem:[#allocation5 + $0x5c0] ss:$28 sps:$4 sm:$0xff]  }
  0xfd   :  { %2690 = vmatprep.subr.bf16.mxu1 %v7137_v44  ;;  %v7218_v44 = vld [vmem:[#allocation5 + $0x20c] ss:$28 sps:$4 sm:$0xff]  }
  0xfe   :  { %6327 = vmatmul.mubr.msk.bf16.vlgmr.msra.gmra.mxu0 %vm2317_vm0, %v8018_v28 }
  0xff   :  { %2600 = vmatmul.mubr.bf16.vlgmr.msra.gmra.mxu1 %v8010_v23  ;;  %2650 = vmatpush1.bf16.msra.mxu0 %v7132_v45  ;;  %v7221_v45 = vld [vmem:[#allocation5 + $0x58c] ss:$28 sps:$4 sm:$0xff]  }
 0x100   :  { %2691 = vmatpush1.bf16.msra.mxu1 %v7135_v46  ;;  %2651 = vmatprep.subr.bf16.mxu0 %v7140_v47  ;;  %v8035_v46 = vsub.s32 0, %v7983_v42  ;;  %v70_v47 = vld [vmem:[#allocation8] sm:$0xff] }
 0x101   :  { %2692 = vmatprep.subr.bf16.mxu1 %v7143_v48  ;;  %2681 = vmatprep.mubr.bf16.mxu0 %v7990_v60  ;;  %v7216_v48 = vld [vmem:[#allocation5 + $0x208] ss:$28 sps:$4 sm:$0xff]  }
 0x102   :  { %2722 = vmatprep.mubr.bf16.mxu1 %v7994_v0 }
 0x103   :  { %2652 = vmatpush1.bf16.msra.mxu0 %v7138_v49  ;;  %v7219_v49 = vld [vmem:[#allocation5 + $0x588] ss:$28 sps:$4 sm:$0xff]  }
 0x104   :  { %2693 = vmatpush1.bf16.msra.mxu1 %v7141_v50  ;;  %2653 = vmatprep.subr.bf16.mxu0 %v7146_v51  ;;  %v8037_v50 = vld [vmem:[#allocation8 + $0x8] sm:$0xff]  ;;  %v473_v51 = vrot.slane %v70_v47, %v8035_v46  ;;  %v7266_v47 = vld [vmem:[#allocation5 + $0x88] ss:$28 sps:$4 sm:$0xff]  }
 0x105   :  { %2694 = vmatprep.subr.bf16.mxu1 %v7149_v52  ;;  %v7224_v52 = vld [vmem:[#allocation5 + $0x1d4] ss:$28 sps:$4 sm:$0xff]  }
 0x107   :  { %2654 = vmatpush1.bf16.msra.mxu0 %v7144_v53  ;;  %v7227_v53 = vld [vmem:[#allocation5 + $0x554] ss:$28 sps:$4 sm:$0xff]  }
 0x108   :  { %2695 = vmatpush1.bf16.msra.mxu1 %v7147_v54  ;;  %2655 = vmatprep.subr.bf16.mxu0 %v7152_v55  ;;  %v477_v54 = vrot.slane %v8037_v50, %v8035_v46 }
 0x109   :  { %2696 = vmatprep.subr.bf16.mxu1 %v7155_v56 }
 0x10b   :  { %2656 = vmatpush1.bf16.msra.mxu0 %v7150_v57  ;;  %v7222_v57 = vld [vmem:[#allocation5 + $0x1d0] ss:$28 sps:$4 sm:$0xff]  }
 0x10c   :  { %2697 = vmatpush1.bf16.msra.mxu1 %v7153_v58  ;;  %2657 = vmatprep.subr.bf16.mxu0 %v7158_v59  ;;  %v7225_v58 = vld [vmem:[#allocation5 + $0x550] ss:$28 sps:$4 sm:$0xff]  }
 0x10d   :  { %2698 = vmatprep.subr.bf16.mxu1 %v7161_v61  ;;  %v7230_v61 = vld [vmem:[#allocation5 + $0x89c] ss:$28 sps:$4 sm:$0xff]  }
 0x10f   :  { %2658 = vmatpush1.bf16.msra.mxu0 %v7156_v62 }
 0x110   :  { %2699 = vmatpush1.bf16.msra.mxu1 %v7159_v63  ;;  %2659 = vmatprep.subr.bf16.mxu0 %v7164_v1  ;;  %v7233_v1 = vld [vmem:[#allocation5 + $0xa94] ss:$28 sps:$4 sm:$0xff]  }
 0x111   :  { %2700 = vmatprep.subr.bf16.mxu1 %v7167_v2 }
 0x113   :  { %2660 = vmatpush1.bf16.msra.mxu0 %v7162_v3 }
 0x114   :  { %2701 = vmatpush1.bf16.msra.mxu1 %v7165_v4  ;;  %2661 = vmatprep.subr.bf16.mxu0 %v7170_v5  ;;  %v7228_v5 = vld [vmem:[#allocation5 + $0x898] ss:$28 sps:$4 sm:$0xff]  }
 0x115   :  { %2702 = vmatprep.subr.bf16.mxu1 %v7173_v6 }
 0x117   :  { %2662 = vmatpush1.bf16.msra.mxu0 %v7168_v7 }
 0x118   :  { %2703 = vmatpush1.bf16.msra.mxu1 %v7171_v8  ;;  %2663 = vmatprep.subr.bf16.mxu0 %v7176_v9  ;;  %v7231_v8 = vld [vmem:[#allocation5 + $0xa90] ss:$28 sps:$4 sm:$0xff]  }
 0x119   :  { %2704 = vmatprep.subr.bf16.mxu1 %v7179_v10  ;;  %v7236_v10 = vld [vmem:[#allocation5 + $0x864] ss:$28 sps:$4 sm:$0xff]  }
 0x11b   :  { %2664 = vmatpush1.bf16.msra.mxu0 %v7174_v12 }
 0x11c   :  { %2705 = vmatpush1.bf16.msra.mxu1 %v7177_v13  ;;  %2665 = vmatprep.subr.bf16.mxu0 %v7182_v14  ;;  %v7237_v13 = vld [vmem:[#allocation5 + $0x360] ss:$28 sps:$4 sm:$0xff]  }
 0x11d   :  { %2706 = vmatprep.subr.bf16.mxu1 %v7185_v15  ;;  %v7234_v15 = vld [vmem:[#allocation5 + $0x860] ss:$28 sps:$4 sm:$0xff]  }
 0x11f   :  { %2666 = vmatpush2.bf16.msra.mxu0 %v7180_v16  ;;  %v7240_v16 = vld [vmem:[#allocation5 + $0x82c] ss:$28 sps:$4 sm:$0xff]  }
 0x120   :  { %2707 = vmatpush2.bf16.msra.mxu1 %v7183_v18  ;;  %2667 = vmatprep.subr.bf16.mxu0 %v7188_v19  ;;  %v7238_v19 = vld [vmem:[#allocation5 + $0x828] ss:$28 sps:$4 sm:$0xff]  }
 0x121   :  { %2708 = vmatprep.subr.bf16.mxu1 %v7191_v20  ;;  %v7241_v20 = vld [vmem:[#allocation5 + $0x1a0] ss:$28 sps:$4 sm:$0xff]  }
 0x123   :  { %2668 = vmatpush2.bf16.msra.mxu0 %v7186_v21 }
 0x124   :  { %2709 = vmatpush2.bf16.msra.mxu1 %v7189_v24  ;;  %2669 = vmatprep.subr.bf16.mxu0 %v7194_v26  ;;  %v7242_v24 = vld [vmem:[#allocation5 + $0x328] ss:$28 sps:$4 sm:$0xff]   ;;  %v7245_v26 = vld [vmem:[#allocation5 + $0x7f4] ss:$28 sps:$4 sm:$0xff]  }
 0x125   :  { %2710 = vmatprep.subr.bf16.mxu1 %v7197_v27 }
 0x127   :  { %2670 = vmatpush2.bf16.msra.mxu0 %v7192_v29  ;;  %v7243_v29 = vld [vmem:[#allocation5 + $0x7f0] ss:$28 sps:$4 sm:$0xff]  }
 0x128   :  { %2711 = vmatpush2.bf16.msra.mxu1 %v7195_v30  ;;  %2671 = vmatprep.subr.bf16.mxu0 %v7200_v31  ;;  %v7246_v30 = vld [vmem:[#allocation5 + $0x168] ss:$28 sps:$4 sm:$0xff]   ;;  %v7247_v31 = vld [vmem:[#allocation5 + $0x2f0] ss:$28 sps:$4 sm:$0xff]  }
 0x129   :  { %2712 = vmatprep.subr.bf16.mxu1 %v7203_v32  ;;  %v7250_v32 = vld [vmem:[#allocation5 + $0x7bc] ss:$28 sps:$4 sm:$0xff]  }
 0x12b   :  { %2672 = vmatpush2.bf16.msra.mxu0 %v7198_v33  ;;  %v7248_v33 = vld [vmem:[#allocation5 + $0x7b8] ss:$28 sps:$4 sm:$0xff]  }
 0x12c   :  { %2713 = vmatpush2.bf16.msra.mxu1 %v7201_v34  ;;  %2673 = vmatprep.subr.bf16.mxu0 %v7206_v35  ;;  %v7251_v34 = vld [vmem:[#allocation5 + $0x130] ss:$28 sps:$4 sm:$0xff]   ;;  %v7252_v35 = vld [vmem:[#allocation5 + $0x2b8] ss:$28 sps:$4 sm:$0xff]  }
 0x12d   :  { %2714 = vmatprep.subr.bf16.mxu1 %v7209_v36  ;;  %v7255_v36 = vld [vmem:[#allocation5 + $0x784] ss:$28 sps:$4 sm:$0xff]  }
 0x12f   :  { %2674 = vmatpush2.bf16.msra.mxu0 %v7204_v37  ;;  %v7253_v37 = vld [vmem:[#allocation5 + $0x780] ss:$28 sps:$4 sm:$0xff]  }
 0x130   :  { %2715 = vmatpush2.bf16.msra.mxu1 %v7207_v38  ;;  %2675 = vmatprep.subr.bf16.mxu0 %v7212_v39  ;;  %v7256_v38 = vld [vmem:[#allocation5 + $0xf8] ss:$28 sps:$4 sm:$0xff]   ;;  %v7257_v39 = vld [vmem:[#allocation5 + $0x280] ss:$28 sps:$4 sm:$0xff]  }
 0x131   :  { %2716 = vmatprep.subr.bf16.mxu1 %v7215_v40  ;;  %v7260_v40 = vld [vmem:[#allocation5 + $0x74c] ss:$28 sps:$4 sm:$0xff]  }
 0x133   :  { %2676 = vmatpush2.bf16.msra.mxu0 %v7210_v41  ;;  %v7258_v41 = vld [vmem:[#allocation5 + $0x748] ss:$28 sps:$4 sm:$0xff]  }
 0x134   :  { %2717 = vmatpush2.bf16.msra.mxu1 %v7213_v43  ;;  %2677 = vmatprep.subr.bf16.mxu0 %v7218_v44  ;;  %v7261_v43 = vld [vmem:[#allocation5 + $0xc0] ss:$28 sps:$4 sm:$0xff]   ;;  %v7265_v44 = vld [vmem:[#allocation5 + $0x714] ss:$28 sps:$4 sm:$0xff]  }
 0x135   :  { %2718 = vmatprep.subr.bf16.mxu1 %v7221_v45  ;;  %v7263_v45 = vld [vmem:[#allocation5 + $0x710] ss:$28 sps:$4 sm:$0xff]  }
 0x136   :  { %v2355_v55 = vpop.f32.mrf.mxu0 }
 0x137   :  { %v2396_v56 = vpop.f32.mrf.mxu1  ;;  %v2356_v59 = vadd.f32 %v2355_v55, %v473_v51  ;;  %2678 = vmatpush2.bf16.msra.mxu0 %v7216_v48  ;;  %v7267_v48 = vld [vmem:[#allocation5 + $0x210] ss:$28 sps:$4 sm:$0xff]   ;;  %v7268_v51 = vld [vmem:[#allocation5 + $0xa58] ss:$28 sps:$4 sm:$0xff]   ;;  %v7273_v55 = vld [vmem:[#allocation5 + $0xa20] ss:$28 sps:$4 sm:$0xff]  }
 0x138   :  { %2719 = vmatpush2.bf16.msra.mxu1 %v7219_v49  ;;  %v2357_v62 = vpop.f32.mrf.mxu0  ;;  %2679 = vmatprep.subr.bf16.mxu0 %v7224_v52  ;;  %v7270_v49 = vld [vmem:[#allocation5 + $0xa5c] ss:$28 sps:$4 sm:$0xff]   ;;  %v7271_v52 = vld [vmem:[#allocation5 + $0x50] ss:$28 sps:$4 sm:$0xff]  }
 0x139   :  { %2720 = vmatprep.subr.bf16.mxu1 %v7227_v53  ;;  %v2398_v63 = vpop.f32.mrf.mxu1  ;;  %v2358_v2 = vadd.f32 %v2357_v62, %v477_v54  ;;  %v8042_v3 = vadd.f32 %v2396_v56, %v2356_v59  ;;  %v7272_v53 = vld [vmem:[#allocation5 + $0x1d8] ss:$28 sps:$4 sm:$0xff]   ;;  %v7275_v54 = vld [vmem:[#allocation5 + $0xa24] ss:$28 sps:$4 sm:$0xff]  }
 0x13a   :  { %v2359_v4 = vpop.f32.mrf.mxu0  ;;  %v7276_v56 = vld [vmem:[#allocation5 + $0x18] ss:$28 sps:$4 sm:$0xff]   ;;  %v7278_v59 = vld [vmem:[#allocation5 + $0x9e8] ss:$28 sps:$4 sm:$0xff]  }
 0x13b   :  { %v2400_v6 = vpop.f32.mrf.mxu1  ;;  %v8044_v7 = vadd.f32 %v2398_v63, %v2358_v2  ;;  %2680 = vmatpush2.bf16.msra.mxu0 %v7222_v57  ;;  %v7277_v57 = vld [vmem:[#allocation5 + $0x6e0] ss:$28 sps:$4 sm:$0xff]   ;;  %v7282_v62 = vld [vmem:[#allocation5 + $0x6a8] ss:$28 sps:$4 sm:$0xff]   ;;  %v7285_v63 = vld [vmem:[#allocation5 + $0x9b4] ss:$28 sps:$4 sm:$0xff]  }
 0x13c   :  { %2721 = vmatpush2.bf16.msra.mxu1 %v7225_v58  ;;  %v2360_v9 = vpop.f32.mrf.mxu0  ;;  %2731 = vmatprep.subr.bf16.mxu0 %v7230_v61  ;;  %v7280_v58 = vld [vmem:[#allocation5 + $0x9ec] ss:$28 sps:$4 sm:$0xff]   ;;  %v7281_v61 = vld [vmem:[#allocation5 + $0x520] ss:$28 sps:$4 sm:$0xff]   ;;  %v7288_v6 = vld [vmem:[#allocation5 + $0x978] ss:$28 sps:$4 sm:$0xff]  }
 0x13d   :  { %2786 = vmatprep.subr.bf16.mxu1 %v7233_v1  ;;  %v2401_v12 = vpop.f32.mrf.mxu1  ;;  %v7283_v1 = vld [vmem:[#allocation5 + $0x9b0] ss:$28 sps:$4 sm:$0xff]   ;;  %v7286_v2 = vld [vmem:[#allocation5 + $0x4e8] ss:$28 sps:$4 sm:$0xff]   ;;  %v7292_v9 = vld [vmem:[#allocation5 + $0x638] ss:$28 sps:$4 sm:$0xff]  }
 0x13e   :  { %2682 = vmatmul.mubr.bf16.vlgmr.msra.gmra.mxu0 %v7999_v11  ;;  %v7287_v4 = vld [vmem:[#allocation5 + $0x670] ss:$28 sps:$4 sm:$0xff]   ;;  %v7293_v12 = vld [vmem:[#allocation5 + $0x940] ss:$28 sps:$4 sm:$0xff]  }
 0x13f   :  { %2723 = vmatmul.mubr.bf16.vlgmr.msra.gmra.mxu1 %v8004_v17  ;;  %v8048_v14 = vpop.f32.mrf.mxu1  ;;  %2732 = vmatpush1.bf16.msra.mxu0 %v7228_v5  ;;  %v7290_v5 = vld [vmem:[#allocation5 + $0x97c] ss:$28 sps:$4 sm:$0xff]  }
 0x140   :  { %2787 = vmatpush1.bf16.msra.mxu1 %v7231_v8  ;;  %2733 = vmatprep.subr.bf16.mxu0 %v7236_v10  ;;  %v7291_v8 = vld [vmem:[#allocation5 + $0x4b0] ss:$28 sps:$4 sm:$0xff]   ;;  %v7295_v10 = vld [vmem:[#allocation5 + $0x944] ss:$28 sps:$4 sm:$0xff]  }
 0x141   :  { %2804 = vmatprep.mubr.bf16.mxu1 %v7941_v25  ;;  %v8051_v18 = vpop.f32.mrf.mxu1  ;;  %6677 = vmatprep.subr.bf16.mxu1 %v7237_v13  ;;  %v7296_v13 = vld [vmem:[#allocation5 + $0x478] ss:$28 sps:$4 sm:$0xff]  }
 0x142   :  { %2763 = vmatprep.mubr.bf16.mxu0 %v8007_v22 }
 0x143   :  { %v2482_v21 = vpop.f32.mrf.mxu1  ;;  %2734 = vmatpush1.bf16.msra.mxu0 %v7234_v15  ;;  %v7297_v15 = vld [vmem:[#allocation5 + $0x600] ss:$28 sps:$4 sm:$0xff]  }
 0x144   :  { %2735 = vmatprep.subr.bf16.mxu0 %v7240_v16  ;;  %v7298_v16 = vld [vmem:[#allocation5 + $0x908] ss:$28 sps:$4 sm:$0xff]   ;;  %v7305_v21 = vld [vmem:[#allocation5 + $0x8d4] ss:$28 sps:$4 sm:$0xff]  }
 0x145   :  { %v2483_v27 = vpop.f32.mrf.mxu1 }
 0x146   :  { %v7307_v27 = vld [vmem:[#allocation5 + $0x590] ss:$28 sps:$4 sm:$0xff]  }
 0x147   :  { %6328 = vmatmul.mubr.msk.bf16.vlgmr.msra.gmra.mxu1 %vm2317_vm0, %v8018_v28  ;;  %2736 = vmatpush1.bf16.msra.mxu0 %v7238_v19  ;;  %v7301_v19 = vld [vmem:[#allocation5 + $0x440] ss:$28 sps:$4 sm:$0xff]  }
 0x148   :  { %6678 = vmatpush3.bf16.msra.mxu1 %v7241_v20  ;;  %2737 = vmatprep.subr.bf16.mxu0 %v7245_v26  ;;  %v7302_v20 = vld [vmem:[#allocation5 + $0x5c8] ss:$28 sps:$4 sm:$0xff]  }
 0x149   :  { %6679 = vmatprep.subr.bf16.mxu1 %v7242_v24  ;;  %2845 = vmatprep.mubr.bf16.mxu1 %v7990_v60  ;;  %v7262_v60 = vld [vmem:[#allocation5 + $0x248] ss:$28 sps:$4 sm:$0xff]  }
 0x14a   :  { %v7306_v24 = vld [vmem:[#allocation5 + $0x408] ss:$28 sps:$4 sm:$0xff]  }
 0x14b   :  { %2738 = vmatpush1.bf16.msra.mxu0 %v7243_v29  ;;  %v7309_v29 = vld [vmem:[#allocation5 + $0xa60] ss:$28 sps:$4 sm:$0xff]  }
 0x14c   :  { %6680 = vmatpush3.bf16.msra.mxu1 %v7246_v30  ;;  %2739 = vmatprep.subr.bf16.mxu0 %v7250_v32 }
 0x14d   :  { %6681 = vmatprep.subr.bf16.mxu1 %v7247_v31 }
 0x14f   :  { %2740 = vmatpush1.bf16.msra.mxu0 %v7248_v33 }
 0x150   :  { %6682 = vmatpush3.bf16.msra.mxu1 %v7251_v34  ;;  %2741 = vmatprep.subr.bf16.mxu0 %v7255_v36  ;;  %v7308_v34 = vld [vmem:[#allocation5 + $0x3d0] ss:$28 sps:$4 sm:$0xff]  }
 0x151   :  { %6683 = vmatprep.subr.bf16.mxu1 %v7252_v35  ;;  %v7310_v35 = vld [vmem:[#allocation5 + $0x8a0] ss:$28 sps:$4 sm:$0xff]  }
 0x153   :  { %2742 = vmatpush1.bf16.msra.mxu0 %v7253_v37  ;;  %v7311_v37 = vld [vmem:[#allocation5 + $0x558] ss:$28 sps:$4 sm:$0xff]  }
 0x154   :  { %6684 = vmatpush3.bf16.msra.mxu1 %v7256_v38  ;;  %2743 = vmatprep.subr.bf16.mxu0 %v7260_v40  ;;  %v7313_v38 = vld [vmem:[#allocation5 + $0xa28] ss:$28 sps:$4 sm:$0xff]  }
 0x155   :  { %6685 = vmatprep.subr.bf16.mxu1 %v7257_v39 }
 0x157   :  { %2744 = vmatpush1.bf16.msra.mxu0 %v7258_v41  ;;  %v7314_v41 = vld [vmem:[#allocation5 + $0x868] ss:$28 sps:$4 sm:$0xff]  }
 0x158   :  { %6686 = vmatpush3.bf16.msra.mxu1 %v7261_v43  ;;  %2745 = vmatprep.subr.bf16.mxu0 %v7265_v44  ;;  %v8069_v43 = vsub.s32 1, %v7983_v42  ;;  %v7317_v44 = vld [vmem:[#allocation5 + $0xa98] ss:$28 sps:$4 sm:$0xff]  }
 0x159   :  { %6687 = vmatprep.subr.bf16.mxu1 %v7262_v60  ;;  %v7316_v60 = vld [vmem:[#allocation5 + $0x830] ss:$28 sps:$4 sm:$0xff]  }
 0x15b   :  { %2746 = vmatpush1.bf16.msra.mxu0 %v7263_v45  ;;  %v2987_v45 = vrot.slane %v8037_v50, %v8069_v43  ;;  %v7320_v50 = vld [vmem:[#allocation7 + $0x188] ss:$28 sps:$4 sm:$0xff]  }
 0x15c   :  { %6688 = vmatpush3.bf16.msra.mxu1 %v7266_v47  ;;  %2747 = vmatprep.subr.bf16.mxu0 %v7270_v49  ;;  %v7318_v49 = vld [vmem:[#allocation5 + $0x9b8] ss:$28 sps:$4 sm:$0xff]  }
 0x15d   :  { %6689 = vmatprep.subr.bf16.mxu1 %v7267_v48  ;;  %v7942_v48 = vmov 0.0  }
 0x15f   :  { %2748 = vmatpush2.bf16.msra.mxu0 %v7268_v51 }
 0x160   :  { %6690 = vmatpush3.bf16.msra.mxu1 %v7271_v52  ;;  %2749 = vmatprep.subr.bf16.mxu0 %v7275_v54  ;;  %v7322_v52 = vld [vmem:[#allocation7 + $0x18c] ss:$28 sps:$4 sm:$0xff]   ;;  %v7319_v54 = vld [vmem:[#allocation5 + $0x7f8] ss:$28 sps:$4 sm:$0xff]  }
 0x161   :  { %6691 = vmatprep.subr.bf16.mxu1 %v7272_v53 }
 0x163   :  { %2750 = vmatpush2.bf16.msra.mxu0 %v7273_v55 }
 0x164   :  { %6692 = vmatpush3.bf16.msra.mxu1 %v7276_v56  ;;  %2751 = vmatprep.subr.bf16.mxu0 %v7280_v58  ;;  %v7324_v56 = vld [vmem:[#allocation5 + $0x7c0] ss:$28 sps:$4 sm:$0xff]  }
 0x165   :  { %6699 = vmatprep.subr.bf16.mxu1 %v7277_v57  ;;  %v7327_v57 = vld [vmem:[#allocation7 + $0x154] ss:$28 sps:$4 sm:$0xff]  }
 0x167   :  { %2846 = vmatmul.mubr.bf16.vlgmr.msra.gmra.mxu1 %v7999_v11  ;;  %2752 = vmatpush2.bf16.msra.mxu0 %v7278_v59  ;;  %v7300_v11 = vld [vmem:[#allocation5 + $0x90c] ss:$28 sps:$4 sm:$0xff]  }
 0x168   :  { %6700 = vmatpush3.bf16.msra.mxu1 %v7281_v61  ;;  %2753 = vmatprep.subr.bf16.mxu0 %v7285_v63  ;;  %v7325_v59 = vld [vmem:[#allocation7 + $0x150] ss:$28 sps:$4 sm:$0xff]   ;;  %v7333_v63 = vld [vmem:[#allocation5 + $0x910] ss:$28 sps:$4 sm:$0xff]  }
 0x169   :  { %6701 = vmatprep.subr.bf16.mxu1 %v7282_v62  ;;  %2885 = vmatprep.mubr.bf16.mxu1 %v7994_v0  ;;  %v7303_v0 = vld [vmem:[#allocation5 + $0x8d0] ss:$28 sps:$4 sm:$0xff]   ;;  %v7329_v61 = vld [vmem:[#allocation5 + $0x788] ss:$28 sps:$4 sm:$0xff]  }
 0x16a   :  { %v7332_v62 = vld [vmem:[#allocation7 + $0x11c] ss:$28 sps:$4 sm:$0xff]  }
 0x16b   :  { %2754 = vmatpush2.bf16.msra.mxu0 %v7283_v1  ;;  %v7330_v1 = vld [vmem:[#allocation7 + $0x118] ss:$28 sps:$4 sm:$0xff]  }
 0x16c   :  { %6702 = vmatpush3.bf16.msra.mxu1 %v7286_v2  ;;  %2755 = vmatprep.subr.bf16.mxu0 %v7290_v5  ;;  %v7334_v2 = vld [vmem:[#allocation5 + $0x750] ss:$28 sps:$4 sm:$0xff]   ;;  %v7338_v5 = vld [vmem:[#allocation5 + $0x8d8] ss:$28 sps:$4 sm:$0xff]  }
 0x16d   :  { %6703 = vmatprep.subr.bf16.mxu1 %v7287_v4  ;;  %v7337_v4 = vld [vmem:[#allocation7 + $0xe4] ss:$28 sps:$4 sm:$0xff]  }
 0x16f   :  { %2756 = vmatpush2.bf16.msra.mxu0 %v7288_v6  ;;  %v7335_v6 = vld [vmem:[#allocation7 + $0xe0] ss:$28 sps:$4 sm:$0xff]  }
 0x170   :  { %6704 = vmatpush3.bf16.msra.mxu1 %v7291_v8  ;;  %2757 = vmatprep.subr.bf16.mxu0 %v7295_v10  ;;  %v7342_v8 = vld [vmem:[#allocation7 + $0xac] ss:$28 sps:$4 sm:$0xff]  }
 0x171   :  { %6705 = vmatprep.subr.bf16.mxu1 %v7292_v9  ;;  %v7345_v9 = vld [vmem:[#allocation7 + $0x50c] ss:$28 sps:$4 sm:$0xff]  }
 0x172   :  { %v7340_v10 = vld [vmem:[#allocation7 + $0xa8] ss:$28 sps:$4 sm:$0xff]  }
 0x173   :  { %2758 = vmatpush2.bf16.msra.mxu0 %v7293_v12  ;;  %v7343_v12 = vld [vmem:[#allocation7 + $0x508] ss:$28 sps:$4 sm:$0xff]  }
 0x174   :  { %6706 = vmatpush3.bf16.msra.mxu1 %v7296_v13  ;;  %2759 = vmatprep.subr.bf16.mxu0 %v7300_v11  ;;  %v7348_v13 = vld [vmem:[#allocation7 + $0x74] ss:$28 sps:$4 sm:$0xff]  }
 0x175   :  { %6707 = vmatprep.subr.bf16.mxu1 %v7297_v15  ;;  %v7351_v15 = vld [vmem:[#allocation7 + $0x4d4] ss:$28 sps:$4 sm:$0xff]  }
 0x176   :  { %v2437_v26 = vpop.f32.mrf.mxu0  ;;  %v7346_v11 = vld [vmem:[#allocation7 + $0x70] ss:$28 sps:$4 sm:$0xff]  }
 0x177   :  { %v2438_v30 = vadd.f32 %v2437_v26, %v8042_v3  ;;  %2760 = vmatpush2.bf16.msra.mxu0 %v7298_v16  ;;  %v7312_v3 = vld [vmem:[#allocation5 + $0x398] ss:$28 sps:$4 sm:$0xff]   ;;  %v7349_v16 = vld [vmem:[#allocation7 + $0x4d0] ss:$28 sps:$4 sm:$0xff]  }
 0x178   :  { %6708 = vmatpush3.bf16.msra.mxu1 %v7301_v19  ;;  %v2439_v31 = vpop.f32.mrf.mxu0  ;;  %2761 = vmatprep.subr.bf16.mxu0 %v7305_v21  ;;  %v7354_v19 = vld [vmem:[#allocation7 + $0x3c] ss:$28 sps:$4 sm:$0xff]   ;;  %v7363_v26 = vld [vmem:[#allocation7 + $0x464] ss:$28 sps:$4 sm:$0xff]  }
 0x179   :  { %6709 = vmatprep.subr.bf16.mxu1 %v7302_v20  ;;  %v8061_v32 = vadd.f32 %v8048_v14, %v2438_v30  ;;  %v2440_v33 = vadd.f32 %v2439_v31, %v8044_v7  ;;  %v7315_v7 = vld [vmem:[#allocation5 + $0x9f0] ss:$28 sps:$4 sm:$0xff]   ;;  %v7366_v30 = vld [vmem:[#allocation7 + $0x34c] ss:$28 sps:$4 sm:$0xff]  }
 0x17a   :  { %v2441_v36 = vpop.f32.mrf.mxu0  ;;  %v7357_v20 = vld [vmem:[#allocation7 + $0x49c] ss:$28 sps:$4 sm:$0xff]   ;;  %v7369_v31 = vld [vmem:[#allocation7 + $0x42c] ss:$28 sps:$4 sm:$0xff]  }
 0x17b   :  { %v2481_v39 = vadd.f32 %v8051_v18, %v2440_v33  ;;  %2762 = vmatpush2.bf16.msra.mxu0 %v7303_v0  ;;  %v7352_v21 = vld [vmem:[#allocation7 + $0x38] ss:$28 sps:$4 sm:$0xff]   ;;  %v7367_v33 = vld [vmem:[#allocation7 + $0x428] ss:$28 sps:$4 sm:$0xff]   ;;  %v7370_v36 = vld [vmem:[#allocation7 + $0x310] ss:$28 sps:$4 sm:$0xff]  }
 0x17c   :  { %6710 = vmatpush3.bf16.msra.mxu1 %v7306_v24  ;;  %v2442_v40 = vpop.f32.mrf.mxu0  ;;  %6721 = vmatprep.subr.bf16.mxu0 %v7309_v29  ;;  %v7355_v0 = vld [vmem:[#allocation7 + $0x498] ss:$28 sps:$4 sm:$0xff]   ;;  %v7360_v24 = vld [vmem:[#allocation7 + $0x4] ss:$28 sps:$4 sm:$0xff]   ;;  %vm2973_vm4 = vcmp.gt.f32.partialorder %v8061_v32, 0.0 }
 0x17d   :  { %6711 = vmatprep.subr.bf16.mxu1 %v7307_v27  ;;  %v3009_v53 = vmul.f32 %v2987_v45, %v2481_v39  ;;  %vm2974_vm1 = vcmp.gt.f32.partialorder %v2481_v39, 0.0  ;;  %v7358_v27 = vld [vmem:[#allocation7] ss:$28 sps:$4 sm:$0xff]   ;;  %v7376_v40 = vld [vmem:[#allocation7 + $0x2d8] ss:$28 sps:$4 sm:$0xff]  }
 0x17e   :  { %2764 = vmatmul.mubr.bf16.vlgmr.msra.gmra.mxu0 %v8010_v23  ;;  %v7361_v29 = vld [vmem:[#allocation7 + $0x460] ss:$28 sps:$4 sm:$0xff]  }
 0x17f   :  { %v8066_v14 = vpop.f32.mrf.mxu1  ;;  %6722 = vmatpush3.bf16.msra.mxu0 %v7310_v35  ;;  %2925 = vmatprep.mubr.bf16.mxu0 %v8007_v22  ;;  %v7323_v22 = vld [vmem:[#allocation5 + $0x980] ss:$28 sps:$4 sm:$0xff]   ;;  %v3016_v55 = vsel %vm2974_vm1, %v2481_v39, %v3009_v53  ;;  %v7375_v35 = vld [vmem:[#allocation7 + $0x3f4] ss:$28 sps:$4 sm:$0xff]   ;;  %v7381_v39 = vld [vmem:[#allocation7 + $0x3bc] ss:$28 sps:$4 sm:$0xff]  }
 0x180   :  { %6712 = vmatpush3.bf16.msra.mxu1 %v7308_v34  ;;  %6723 = vmatprep.subr.bf16.mxu0 %v7313_v38  ;;  %v8080_v58 = vpack.c.bf16 %v3016_v55, %v3016_v55  ;;  %v7372_v34 = vld [vmem:[#allocation7 + $0x314] ss:$28 sps:$4 sm:$0xff]   ;;  %v7378_v38 = vld [vmem:[#allocation7 + $0x2dc] ss:$28 sps:$4 sm:$0xff]  }
 0x181   :  { %6713 = vmatprep.subr.bf16.mxu1 %v7311_v37  ;;  %v8071_v18 = vpop.f32.mrf.mxu1  ;;  %v7373_v37 = vld [vmem:[#allocation7 + $0x3f0] ss:$28 sps:$4 sm:$0xff]  }
 0x182   :  { %v7396_v55 = vld [vmem:[#allocation7 + $0x234] ss:$28 sps:$4 sm:$0xff]  }
 0x183   :  { %v2523_v47 = vpop.f32.mrf.mxu1  ;;  %6724 = vmatpush3.bf16.msra.mxu0 %v7314_v41  ;;  %v7384_v41 = vld [vmem:[#allocation7 + $0x2a4] ss:$28 sps:$4 sm:$0xff]  }
 0x184   :  { %6714 = vmatpush3.bf16.msra.mxu1 %v7312_v3  ;;  %6725 = vmatprep.subr.bf16.mxu0 %v7315_v7  ;;  %v7379_v3 = vld [vmem:[#allocation7 + $0x3b8] ss:$28 sps:$4 sm:$0xff]   ;;  %v7387_v7 = vld [vmem:[#allocation7 + $0x384] ss:$28 sps:$4 sm:$0xff]  }
 0x185   :  { %6813 = vmatprep.subr.bf16.mxu1 %v7942_v48  ;;  %v2524_v51 = vpop.f32.mrf.mxu1  ;;  %v7385_v47 = vld [vmem:[#allocation7 + $0x380] ss:$28 sps:$4 sm:$0xff]  }
 0x186   :  { %v7393_v51 = vld [vmem:[#allocation7 + $0x6cc] ss:$28 sps:$4 sm:$0xff]  }
 0x187   :  { %2886 = vmatmul.mubr.bf16.vlgmr.msra.gmra.mxu1 %v8004_v17  ;;  %6726 = vmatpush3.bf16.msra.mxu0 %v7316_v60  ;;  %v7328_v17 = vld [vmem:[#allocation5 + $0x948] ss:$28 sps:$4 sm:$0xff]  }
 0x188   :  { %6814 = vmatpush3.bf16.msra.mxu1 %v7317_v44  ;;  %6727 = vmatprep.subr.bf16.mxu0 %v7318_v49  ;;  %v73_v60 = vld [vmem:[#allocation8 + $0x18] sm:$0xff]  ;;  %v7382_v44 = vld [vmem:[#allocation7 + $0x2a0] ss:$28 sps:$4 sm:$0xff]   ;;  %v7390_v49 = vld [vmem:[#allocation7 + $0x26c] ss:$28 sps:$4 sm:$0xff]  }
 0x189   :  { %6815 = vmatprep.mubr.msk.bf16.mxu1 %vm7943_vm2, %v7942_v48  ;;  %5216 = vmatprep.subr.bf16.mxu1 %v7322_v52  ;;  %v485_v53 = vrot.slane %v73_v60, %v8035_v46 }
 0x18b   :  { %6728 = vmatpush3.bf16.msra.mxu0 %v7319_v54  ;;  %v7388_v54 = vld [vmem:[#allocation7 + $0x268] ss:$28 sps:$4 sm:$0xff]  }
 0x18c   :  { %6729 = vmatprep.subr.bf16.mxu0 %v7323_v22 }
 0x18f   :  { %6816 = vmatmul.mubr.msk.bf16.vlgmr.msra.gmra.mxu1 %vm2317_vm0, %v8018_v28  ;;  %6730 = vmatpush3.bf16.msra.mxu0 %v7324_v56  ;;  %v7339_v28 = vld [vmem:[#allocation5 + $0x718] ss:$28 sps:$4 sm:$0xff]   ;;  %v7399_v56 = vld [vmem:[#allocation7 + $0x694] ss:$28 sps:$4 sm:$0xff]  }
 0x190   :  { %5217 = vmatpush1.bf16.msra.mxu1 %v7320_v50  ;;  %5248 = vmatprep.mubr.bf16.mxu1 %v8080_v58  ;;  %v7391_v50 = vld [vmem:[#allocation7 + $0x6c8] ss:$28 sps:$4 sm:$0xff]  }
 0x191   :  { %5218 = vmatprep.subr.bf16.mxu1 %v7327_v57  ;;  %6731 = vmatprep.subr.bf16.mxu0 %v7328_v17  ;;  %v2522_v17 = vadd.f32 %v8071_v18, %v485_v53  ;;  %v8096_v18 = vld [vmem:[#allocation8 + $0x10] sm:$0xff]  ;;  %v7423_v53 = vld [vmem:[#allocation7 + $0x544] ss:$28 sps:$4 sm:$0xff]  }
 0x193   :  { %6732 = vmatpush3.bf16.msra.mxu0 %v7329_v61 }
 0x194   :  { %5219 = vmatpush1.bf16.msra.mxu1 %v7325_v59  ;;  %6733 = vmatprep.subr.bf16.mxu0 %v7333_v63  ;;  %v7394_v59 = vld [vmem:[#allocation7 + $0x230] ss:$28 sps:$4 sm:$0xff]  }
 0x195   :  { %5220 = vmatprep.subr.bf16.mxu1 %v7332_v62  ;;  %v7397_v63 = vld [vmem:[#allocation7 + $0x690] ss:$28 sps:$4 sm:$0xff]  }
 0x197   :  { %6734 = vmatpush3.bf16.msra.mxu0 %v7334_v2 }
 0x198   :  { %5221 = vmatpush1.bf16.msra.mxu1 %v7330_v1  ;;  %6735 = vmatprep.subr.bf16.mxu0 %v7338_v5  ;;  %v7402_v1 = vld [vmem:[#allocation7 + $0x1fc] ss:$28 sps:$4 sm:$0xff]  }
 0x199   :  { %5222 = vmatprep.subr.bf16.mxu1 %v7337_v4  ;;  %v7405_v4 = vld [vmem:[#allocation7 + $0x65c] ss:$28 sps:$4 sm:$0xff]  }
 0x19b   :  { %6736 = vmatpush3.bf16.msra.mxu0 %v7339_v28  ;;  %v8092_v28 = vld [vmem:[#allocation8] sm:$0xff] }
 0x19c   :  { %5223 = vmatpush1.bf16.msra.mxu1 %v7335_v6  ;;  %5257 = vmatprep.subr.bf16.mxu0 %v7345_v9 }
 0x19d   :  { %5224 = vmatprep.subr.bf16.mxu1 %v7342_v8  ;;  %v2983_v8 = vrot.slane %v8092_v28, %v8069_v43 }
 0x19e   :  { %2926 = vmatmul.mubr.bf16.vlgmr.msra.gmra.mxu0 %v8010_v23  ;;  %v7364_v23 = vld [vmem:[#allocation7 + $0x348] ss:$28 sps:$4 sm:$0xff]  }
 0x19f   :  { %5258 = vmatpush1.bf16.msra.mxu0 %v7343_v12  ;;  %v7400_v12 = vld [vmem:[#allocation7 + $0x1f8] ss:$28 sps:$4 sm:$0xff]  }
 0x1a0   :  { %5225 = vmatpush1.bf16.msra.mxu1 %v7340_v10  ;;  %5259 = vmatprep.subr.bf16.mxu0 %v7351_v15  ;;  %v2995_v10 = vrot.slane %v73_v60, %v8069_v43  ;;  %v7403_v15 = vld [vmem:[#allocation7 + $0x658] ss:$28 sps:$4 sm:$0xff]  }
 0x1a1   :  { %5226 = vmatprep.subr.bf16.mxu1 %v7348_v13  ;;  %v7432_v60 = vld [vmem:[#allocation7 + $0x81c] ss:$28 sps:$4 sm:$0xff]  }
 0x1a3   :  { %5260 = vmatpush1.bf16.msra.mxu0 %v7349_v16 }
 0x1a4   :  { %5227 = vmatpush1.bf16.msra.mxu1 %v7346_v11  ;;  %5261 = vmatprep.subr.bf16.mxu0 %v7357_v20  ;;  %v7411_v20 = vld [vmem:[#allocation7 + $0x624] ss:$28 sps:$4 sm:$0xff]  }
 0x1a5   :  { %5228 = vmatprep.subr.bf16.mxu1 %v7354_v19  ;;  %v7408_v19 = vld [vmem:[#allocation7 + $0x1c4] ss:$28 sps:$4 sm:$0xff]  }
 0x1a7   :  { %5262 = vmatpush1.bf16.msra.mxu0 %v7355_v0 }
 0x1a8   :  { %5229 = vmatpush1.bf16.msra.mxu1 %v7352_v21  ;;  %5263 = vmatprep.subr.bf16.mxu0 %v7363_v26 }
 0x1a9   :  { %5230 = vmatprep.subr.bf16.mxu1 %v7360_v24  ;;  %v3008_v24 = vmul.f32 %v2983_v8, %v8061_v32  ;;  %v7448_v8 = vld [vmem:[#allocation7 + $0xa48] ss:$28 sps:$4 sm:$0xff]  }
 0x1ab   :  { %5264 = vmatpush1.bf16.msra.mxu0 %v7361_v29  ;;  %v481_v29 = vrot.slane %v8096_v18, %v8035_v46 }
 0x1ac   :  { %5231 = vmatpush1.bf16.msra.mxu1 %v7358_v27  ;;  %5265 = vmatprep.subr.bf16.mxu0 %v7369_v31  ;;  %v7406_v27 = vld [vmem:[#allocation7 + $0x1c0] ss:$28 sps:$4 sm:$0xff]  }
 0x1ad   :  { %5232 = vmatprep.subr.bf16.mxu1 %v7366_v30  ;;  %v7409_v30 = vld [vmem:[#allocation7 + $0x620] ss:$28 sps:$4 sm:$0xff]  }
 0x1af   :  { %5266 = vmatpush1.bf16.msra.mxu0 %v7367_v33  ;;  %v7426_v33 = vld [vmem:[#allocation7 + $0x88c] ss:$28 sps:$4 sm:$0xff]  }
 0x1b0   :  { %5233 = vmatpush2.bf16.msra.mxu1 %v7364_v23  ;;  %5267 = vmatprep.subr.bf16.mxu0 %v7375_v35  ;;  %v7414_v23 = vld [vmem:[#allocation7 + $0x5ec] ss:$28 sps:$4 sm:$0xff]   ;;  %v3015_v35 = vsel %vm2973_vm4, %v8061_v32, %v3008_v24 }
 0x1b1   :  { %5234 = vmatprep.subr.bf16.mxu1 %v7372_v34  ;;  %v7427_v32 = vld [vmem:[#allocation7 + $0x850] ss:$28 sps:$4 sm:$0xff]  }
 0x1b2   :  { %v7463_v24 = vld [vmem:[#allocation7 + $0x930] ss:$28 sps:$4 sm:$0xff]  }
 0x1b3   :  { %5268 = vmatpush1.bf16.msra.mxu0 %v7373_v37  ;;  %v7412_v37 = vld [vmem:[#allocation7 + $0x5e8] ss:$28 sps:$4 sm:$0xff]  }
 0x1b4   :  { %5235 = vmatpush2.bf16.msra.mxu1 %v7370_v36  ;;  %5269 = vmatprep.subr.bf16.mxu0 %v7381_v39  ;;  %v2520_v36 = vadd.f32 %v8066_v14, %v481_v29  ;;  %v8108_v39 = vpack.c.bf16 %v3015_v35, %v3015_v35  ;;  %v7415_v14 = vld [vmem:[#allocation7 + $0x5b0] ss:$28 sps:$4 sm:$0xff]   ;;  %v7468_v29 = vld [vmem:[#allocation7 + $0x8fc] ss:$28 sps:$4 sm:$0xff]  }
 0x1b5   :  { %5236 = vmatprep.subr.bf16.mxu1 %v7378_v38  ;;  %v7424_v38 = vld [vmem:[#allocation7 + $0x888] ss:$28 sps:$4 sm:$0xff]  }
 0x1b6   :  { %v8086_v45 = vpop.f32.mrf.mxu0 }
 0x1b7   :  { %5270 = vmatpush1.bf16.msra.mxu0 %v7379_v3  ;;  %v7417_v3 = vld [vmem:[#allocation7 + $0x5b4] ss:$28 sps:$4 sm:$0xff]  }
 0x1b8   :  { %5237 = vmatpush2.bf16.msra.mxu1 %v7376_v40  ;;  %v2562_v52 = vpop.f32.mrf.mxu0  ;;  %5271 = vmatprep.subr.bf16.mxu0 %v7387_v7  ;;  %v2561_v40 = vadd.f32 %v8086_v45, %v2520_v36  ;;  %v2991_v45 = vrot.slane %v8096_v18, %v8069_v43  ;;  %v7504_v18 = vld [vmem:[#allocation7 + $0x194] ss:$28 sps:$4 sm:$0xff]   ;;  %v7471_v36 = vld [vmem:[#allocation7 + $0x8c4] ss:$28 sps:$4 sm:$0xff]  }
 0x1b9   :  { %5238 = vmatprep.subr.bf16.mxu1 %v7384_v41  ;;  %v2563_v2 = vadd.f32 %v2562_v52, %v2522_v17  ;;  %v7429_v41 = vld [vmem:[#allocation7 + $0x854] ss:$28 sps:$4 sm:$0xff]   ;;  %v7435_v52 = vld [vmem:[#allocation7 + $0x7e4] ss:$28 sps:$4 sm:$0xff]  }
 0x1ba   :  { %v2564_v22 = vpop.f32.mrf.mxu0  ;;  %v7441_v17 = vld [vmem:[#allocation7 + $0x774] ss:$28 sps:$4 sm:$0xff]  }
 0x1bb   :  { %5272 = vmatpush1.bf16.msra.mxu0 %v7385_v47  ;;  %v7433_v22 = vld [vmem:[#allocation7 + $0x7e0] ss:$28 sps:$4 sm:$0xff]  }
 0x1bc   :  { %5239 = vmatpush2.bf16.msra.mxu1 %v7382_v44  ;;  %v2565_v57 = vpop.f32.mrf.mxu0  ;;  %5273 = vmatprep.subr.bf16.mxu0 %v7393_v51  ;;  %v7420_v44 = vld [vmem:[#allocation7 + $0x57c] ss:$28 sps:$4 sm:$0xff]  }
 0x1bd   :  { %5240 = vmatprep.subr.bf16.mxu1 %v7390_v49  ;;  %v7430_v49 = vld [vmem:[#allocation7 + $0x818] ss:$28 sps:$4 sm:$0xff]   ;;  %v7436_v57 = vld [vmem:[#allocation7 + $0x7a8] ss:$28 sps:$4 sm:$0xff]  }
 0x1be   :  { %v8090_v62 = vpop.f32.mrf.mxu0  ;;  %v7418_v51 = vld [vmem:[#allocation7 + $0x578] ss:$28 sps:$4 sm:$0xff]  }
 0x1bf   :  { %v2601_v61 = vpop.f32.mrf.mxu1  ;;  %5274 = vmatpush2.bf16.msra.mxu0 %v7391_v50  ;;  %v7421_v50 = vld [vmem:[#allocation7 + $0x540] ss:$28 sps:$4 sm:$0xff]  }
 0x1c0   :  { %5241 = vmatpush2.bf16.msra.mxu1 %v7388_v54  ;;  %v2644_v6 = vpop.f32.mrf.mxu0  ;;  %5275 = vmatprep.subr.bf16.mxu0 %v7399_v56  ;;  %v2602_v7 = vadd.f32 %v2601_v61, %v2561_v40  ;;  %v7439_v61 = vld [vmem:[#allocation7 + $0x770] ss:$28 sps:$4 sm:$0xff]  }
 0x1c1   :  { %v2603_v5 = vpop.f32.mrf.mxu1  ;;  %5242 = vmatprep.subr.bf16.mxu1 %v7396_v55  ;;  %v7438_v55 = vld [vmem:[#allocation7 + $0x7ac] ss:$28 sps:$4 sm:$0xff]  }
 0x1c2   :  { %v2604_v9 = vadd.f32 %v2603_v5, %v2563_v2  ;;  %v2646_v13 = vpop.f32.mrf.mxu0  ;;  %v2643_v47 = vadd.f32 %v8090_v62, %v2602_v7  ;;  %v7444_v62 = vld [vmem:[#allocation7 + $0x73c] ss:$28 sps:$4 sm:$0xff]   ;;  %v7450_v5 = vld [vmem:[#allocation7 + $0xa4c] ss:$28 sps:$4 sm:$0xff]  }
 0x1c3   :  { %v2605_v11 = vpop.f32.mrf.mxu1  ;;  %5276 = vmatpush2.bf16.msra.mxu0 %v7397_v63  ;;  %v7442_v63 = vld [vmem:[#allocation7 + $0x738] ss:$28 sps:$4 sm:$0xff]   ;;  %v7445_v2 = vld [vmem:[#allocation7 + $0x700] ss:$28 sps:$4 sm:$0xff]  }
 0x1c4   :  { %v2645_v16 = vadd.f32 %v2644_v6, %v2604_v9  ;;  %5243 = vmatpush2.bf16.msra.mxu1 %v7394_v59  ;;  %v2647_v21 = vpop.f32.mrf.mxu0  ;;  %5277 = vmatprep.subr.bf16.mxu0 %v7405_v4  ;;  %v3010_v54 = vmul.f32 %v2991_v45, %v2643_v47  ;;  %vm2975_vm5 = vcmp.gt.f32.partialorder %v2643_v47, 0.0  ;;  %v7495_v4 = vld [vmem:[#allocation7 + $0xa84] ss:$28 sps:$4 sm:$0xff]   ;;  %v7453_v9 = vld [vmem:[#allocation7 + $0xa14] ss:$28 sps:$4 sm:$0xff]  }
 0x1c5   :  { %5244 = vmatprep.subr.bf16.mxu1 %v7402_v1  ;;  %v2606_v0 = vpop.f32.mrf.mxu1  ;;  %v7447_v1 = vld [vmem:[#allocation7 + $0x704] ss:$28 sps:$4 sm:$0xff]   ;;  %v7454_v13 = vld [vmem:[#allocation7 + $0x9d8] ss:$28 sps:$4 sm:$0xff]  }
 0x1c6   :  { %vm2976_vm3 = vcmp.gt.f32.partialorder %v2645_v16, 0.0  ;;  %v3011_v26 = vmul.f32 %v2995_v10, %v2645_v16  ;;  %v3017_v56 = vsel %vm2975_vm5, %v2643_v47, %v3010_v54  ;;  %v7493_v6 = vld [vmem:[#allocation7 + $0xa80] ss:$28 sps:$4 sm:$0xff]   ;;  %v7451_v10 = vld [vmem:[#allocation7 + $0xa10] ss:$28 sps:$4 sm:$0xff]  }
 0x1c7   :  { %5278 = vmatpush2.bf16.msra.mxu0 %v7403_v15  ;;  %v8115_v59 = vpack.c.bf16 %v3017_v56, %v3017_v56  ;;  %v7459_v15 = vld [vmem:[#allocation7 + $0x9a4] ss:$28 sps:$4 sm:$0xff]   ;;  %v74_v47 = vld [vmem:[#allocation8 + $0x20] sm:$0xff] }
 0x1c8   :  { %v3018_v31 = vsel %vm2976_vm3, %v2645_v16, %v3011_v26  ;;  %5245 = vmatpush2.bf16.msra.mxu1 %v7400_v12  ;;  %5279 = vmatprep.subr.bf16.mxu0 %v7411_v20  ;;  %v7456_v12 = vld [vmem:[#allocation7 + $0x9dc] ss:$28 sps:$4 sm:$0xff]   ;;  %v7462_v16 = vld [vmem:[#allocation7 + $0x96c] ss:$28 sps:$4 sm:$0xff]   ;;  %v7465_v20 = vld [vmem:[#allocation7 + $0x934] ss:$28 sps:$4 sm:$0xff]   ;;  %v2999_v56 = vrot.slane %v74_v47, %v8069_v43 }
 0x1c9   :  { %v8103_v34 = vpack.c.bf16 %v3018_v31, %v3018_v31  ;;  %5246 = vmatprep.subr.bf16.mxu1 %v7408_v19  ;;  %v7457_v11 = vld [vmem:[#allocation7 + $0x9a0] ss:$28 sps:$4 sm:$0xff]   ;;  %v7460_v19 = vld [vmem:[#allocation7 + $0x968] ss:$28 sps:$4 sm:$0xff]   ;;  %vm5963_vm3 = vcmask 128004  }
 0x1ca   :  { %v75_v45 = vld [vmem:[#allocation8 + $0x28] sm:$0xff] }
 0x1cb   :  { %5289 = vmatprep.mubr.bf16.mxu0 %v8103_v34  ;;  %5280 = vmatpush2.bf16.msra.mxu0 %v7409_v30 }
 0x1cc   :  { %5247 = vmatpush2.bf16.msra.mxu1 %v7406_v27  ;;  %5281 = vmatprep.subr.bf16.mxu0 %v7414_v23  ;;  %v7466_v23 = vld [vmem:[#allocation7 + $0x8f8] ss:$28 sps:$4 sm:$0xff]  }
 0x1cd   :  { %5298 = vmatprep.subr.bf16.mxu1 %v7426_v33 }
 0x1cf   :  { %5249 = vmatmul.mubr.bf16.vlgmr.msra.gmra.mxu1 %v8108_v39  ;;  %5282 = vmatpush2.bf16.msra.mxu0 %v7412_v37 }
 0x1d0   :  { %5299 = vmatpush1.bf16.msra.mxu1 %v7424_v38  ;;  %5283 = vmatprep.subr.bf16.mxu0 %v7417_v3  ;;  %v7469_v38 = vld [vmem:[#allocation7 + $0x8c0] ss:$28 sps:$4 sm:$0xff]   ;;  %v7474_v3 = vld [vmem:[#allocation7 + $0x514] ss:$28 sps:$4 sm:$0xff]  }
 0x1d1   :  { %5300 = vmatprep.subr.bf16.mxu1 %v7429_v41 }
 0x1d3   :  { %5284 = vmatpush2.bf16.msra.mxu0 %v7415_v14 }
 0x1d4   :  { %5301 = vmatpush1.bf16.msra.mxu1 %v7427_v32  ;;  %5285 = vmatprep.subr.bf16.mxu0 %v7420_v44 }
 0x1d5   :  { %5302 = vmatprep.subr.bf16.mxu1 %v7432_v60 }
 0x1d7   :  { %5286 = vmatpush2.bf16.msra.mxu0 %v7418_v51  ;;  %v493_v51 = vrot.slane %v75_v45, %v8035_v46 }
 0x1d8   :  { %5303 = vmatpush1.bf16.msra.mxu1 %v7430_v49  ;;  %5287 = vmatprep.subr.bf16.mxu0 %v7423_v53  ;;  %v489_v49 = vrot.slane %v74_v47, %v8035_v46  ;;  %v7498_v47 = vld [vmem:[#allocation7 + $0x38c] ss:$28 sps:$4 sm:$0xff]  }
 0x1d9   :  { %5304 = vmatprep.subr.bf16.mxu1 %v7435_v52 }
 0x1db   :  { %5288 = vmatpush2.bf16.msra.mxu0 %v7421_v50 }
 0x1dc   :  { %5305 = vmatpush1.bf16.msra.mxu1 %v7433_v22  ;;  %5353 = vmatprep.subr.bf16.mxu0 %v7495_v4 }
 0x1dd   :  { %5306 = vmatprep.subr.bf16.mxu1 %v7438_v55 }
 0x1de   :  { %5290 = vmatmul.mubr.bf16.vlgmr.msra.gmra.mxu0 %v8115_v59 }
 0x1df   :  { %5371 = vmatprep.mubr.bf16.mxu0 %v7941_v25  ;;  %5354 = vmatpush1.bf16.msra.mxu0 %v7493_v6 }
 0x1e0   :  { %5307 = vmatpush1.bf16.msra.mxu1 %v7436_v57  ;;  %5380 = vmatprep.subr.bf16.mxu0 %v7504_v18 }
 0x1e1   :  { %5308 = vmatprep.subr.bf16.mxu1 %v7441_v17 }
 0x1e4   :  { %5309 = vmatpush1.bf16.msra.mxu1 %v7439_v61 }
 0x1e5   :  { %5310 = vmatprep.subr.bf16.mxu1 %v7444_v62  ;;  %v3003_v62 = vrot.slane %v75_v45, %v8069_v43 }
 0x1e8   :  { %5311 = vmatpush1.bf16.msra.mxu1 %v7442_v63 }
 0x1e9   :  { %5312 = vmatprep.subr.bf16.mxu1 %v7447_v1 }
 0x1ec   :  { %5313 = vmatpush1.bf16.msra.mxu1 %v7445_v2 }
 0x1ed   :  { %5314 = vmatprep.subr.bf16.mxu1 %v7450_v5 }
 0x1f0   :  { %5315 = vmatpush2.bf16.msra.mxu1 %v7448_v8 }
 0x1f1   :  { %5316 = vmatprep.subr.bf16.mxu1 %v7453_v9 }
 0x1f4   :  { %5317 = vmatpush2.bf16.msra.mxu1 %v7451_v10 }
 0x1f5   :  { %5318 = vmatprep.subr.bf16.mxu1 %v7456_v12  ;;  %v7472_v12 = vld [vmem:[#allocation7 + $0x510] ss:$28 sps:$4 sm:$0xff]  }
 0x1f8   :  { %5319 = vmatpush2.bf16.msra.mxu1 %v7454_v13 }
 0x1f9   :  { %5320 = vmatprep.subr.bf16.mxu1 %v7459_v15  ;;  %v7477_v15 = vld [vmem:[#allocation7 + $0x4dc] ss:$28 sps:$4 sm:$0xff]  }
 0x1fc   :  { %5321 = vmatpush2.bf16.msra.mxu1 %v7457_v11 }
 0x1fd   :  { %5322 = vmatprep.subr.bf16.mxu1 %v7462_v16  ;;  %v7475_v16 = vld [vmem:[#allocation7 + $0x4d8] ss:$28 sps:$4 sm:$0xff]  }
 0x1fe   :  { %v2683_v21 = vpop.f32.mrf.mxu0 }
 0x1ff   :  { %v2724_v0 = vpop.f32.mrf.mxu1  ;;  %v2684_v52 = vadd.f32 %v2683_v21, %v489_v49 }
 0x200   :  { %5323 = vmatpush2.bf16.msra.mxu1 %v7460_v19  ;;  %v2685_v26 = vpop.f32.mrf.mxu0 }
 0x201   :  { %v2726_v27 = vpop.f32.mrf.mxu1  ;;  %5324 = vmatprep.subr.bf16.mxu1 %v7465_v20  ;;  %v2686_v53 = vadd.f32 %v2685_v26, %v493_v51  ;;  %v2725_v54 = vadd.f32 %v2724_v0, %v2684_v52  ;;  %v7480_v20 = vld [vmem:[#allocation7 + $0x4a4] ss:$28 sps:$4 sm:$0xff]   ;;  %v7483_v26 = vld [vmem:[#allocation7 + $0x46c] ss:$28 sps:$4 sm:$0xff]  }
 0x202   :  { %v2687_v30 = vpop.f32.mrf.mxu0  ;;  %v7478_v0 = vld [vmem:[#allocation7 + $0x4a0] ss:$28 sps:$4 sm:$0xff]  }
 0x203   :  { %v2728_v31 = vpop.f32.mrf.mxu1  ;;  %v2727_v50 = vadd.f32 %v2726_v27, %v2686_v53 }
 0x204   :  { %5325 = vmatpush2.bf16.msra.mxu1 %v7463_v24  ;;  %v2688_v33 = vpop.f32.mrf.mxu0  ;;  %v7486_v31 = vld [vmem:[#allocation7 + $0x434] ss:$28 sps:$4 sm:$0xff]  }
 0x205   :  { %v2729_v35 = vpop.f32.mrf.mxu1  ;;  %5326 = vmatprep.subr.bf16.mxu1 %v7468_v29  ;;  %v7481_v29 = vld [vmem:[#allocation7 + $0x468] ss:$28 sps:$4 sm:$0xff]  }
 0x206   :  { %v76_v33 = vld [vmem:[#allocation8 + $0x30] sm:$0xff]  ;;  %v7489_v35 = vld [vmem:[#allocation7 + $0x3fc] ss:$28 sps:$4 sm:$0xff]  }
 0x207   :  { %v2806_v37 = vpop.f32.mrf.mxu1  ;;  %v3007_v53 = vrot.slane %v76_v33, %v8069_v43  ;;  %v7513_v43 = vld [vmem:[#allocation7 + $0x664] ss:$28 sps:$4 sm:$0xff]  }
 0x208   :  { %5327 = vmatpush2.bf16.msra.mxu1 %v7466_v23  ;;  %v7484_v23 = vld [vmem:[#allocation7 + $0x430] ss:$28 sps:$4 sm:$0xff]  }
 0x209   :  { %v2808_v40 = vpop.f32.mrf.mxu1  ;;  %5328 = vmatprep.subr.bf16.mxu1 %v7471_v36  ;;  %v497_v36 = vrot.slane %v76_v33, %v8035_v46  ;;  %v7496_v46 = vld [vmem:[#allocation7 + $0x388] ss:$28 sps:$4 sm:$0xff]  }
 0x20a   :  { %v7544_v33 = vld [vmem:[#allocation7 + $0x8] ss:$28 sps:$4 sm:$0xff]  }
 0x20b   :  { %v2810_v41 = vpop.f32.mrf.mxu1 }
 0x20c   :  { %5329 = vmatpush2.bf16.msra.mxu1 %v7469_v38  ;;  %v7487_v38 = vld [vmem:[#allocation7 + $0x3f8] ss:$28 sps:$4 sm:$0xff]  }
 0x20d   :  { %v2811_v7 = vpop.f32.mrf.mxu1  ;;  %5421 = vmatprep.subr.bf16.mxu1 %v7474_v3 }
 0x227   :  { %v6693_v32 = vpop.f32.mrf.mxu1 }
 0x229   :  { %v6694_v14 = vpop.f32.mrf.mxu1 }
 0x22b   :  { %v6696_v60 = vpop.f32.mrf.mxu1 }
 0x22c   :  { %v7490_v60 = vld [vmem:[#allocation7 + $0x3c0] ss:$28 sps:$4 sm:$0xff]  }
 0x22d   :  { %v6697_v44 = vpop.f32.mrf.mxu1 }
 0x23e   :  { %v2765_v22 = vpop.f32.mrf.mxu0 }
 0x23f   :  { %v2766_v55 = vadd.f32 %v2765_v22, %v2725_v54 }
 0x240   :  { %v2767_v57 = vpop.f32.mrf.mxu0 }
 0x241   :  { %v2807_v17 = vadd.f32 %v2806_v37, %v2766_v55  ;;  %v2768_v61 = vadd.f32 %v2767_v57, %v2727_v50  ;;  %v6695_v37 = vadd.f32 %v6694_v14, %v6693_v32  ;;  %v7501_v14 = vld [vmem:[#allocation7 + $0x6d4] ss:$28 sps:$4 sm:$0xff]   ;;  %v7507_v55 = vld [vmem:[#allocation7 + $0x69c] ss:$28 sps:$4 sm:$0xff]  }
 0x242   :  { %v2769_v63 = vpop.f32.mrf.mxu0  ;;  %v7499_v50 = vld [vmem:[#allocation7 + $0x6d0] ss:$28 sps:$4 sm:$0xff]  }
 0x243   :  { %vm2977_vm6 = vcmp.gt.f32.partialorder %v2807_v17, 0.0  ;;  %v3012_v1 = vmul.f32 %v2999_v56, %v2807_v17  ;;  %v2809_v2 = vadd.f32 %v2808_v40, %v2768_v61  ;;  %v7492_v40 = vld [vmem:[#allocation7 + $0x3c4] ss:$28 sps:$4 sm:$0xff]   ;;  %v2848_v7 = vadd.f32 %v6695_v37, %v497_v36  ;;  %v7502_v57 = vld [vmem:[#allocation7 + $0x190] ss:$28 sps:$4 sm:$0xff]  }
 0x244   :  { %v2770_v4 = vpop.f32.mrf.mxu0  ;;  %v7510_v61 = vld [vmem:[#allocation7 + $0x15c] ss:$28 sps:$4 sm:$0xff]   ;;  %v7550_v36 = vld [vmem:[#allocation7 + $0xa88] ss:$28 sps:$4 sm:$0xff]  }
 0x245   :  { %vm2978_vm7 = vcmp.gt.f32.partialorder %v2809_v2, 0.0  ;;  %v3013_v5 = vmul.f32 %v3003_v62, %v2809_v2  ;;  %v3019_v6 = vsel %vm2977_vm6, %v2807_v17, %v3012_v1  ;;  %v7505_v62 = vld [vmem:[#allocation7 + $0x698] ss:$28 sps:$4 sm:$0xff]   ;;  %v7516_v1 = vld [vmem:[#allocation7 + $0x124] ss:$28 sps:$4 sm:$0xff]  }
 0x246   :  { %v8125_v13 = vpack.c.bf16 %v3019_v6, %v3019_v6  ;;  %v7508_v63 = vld [vmem:[#allocation7 + $0x158] ss:$28 sps:$4 sm:$0xff]   ;;  %v7519_v4 = vld [vmem:[#allocation7 + $0x62c] ss:$28 sps:$4 sm:$0xff]  }
 0x247   :  { %v6715_v8 = vpop.f32.mrf.mxu1  ;;  %v3020_v18 = vsel %vm2978_vm7, %v2809_v2, %v3013_v5  ;;  %v7511_v2 = vld [vmem:[#allocation7 + $0x660] ss:$28 sps:$4 sm:$0xff]   ;;  %v7522_v6 = vld [vmem:[#allocation7 + $0xec] ss:$28 sps:$4 sm:$0xff]  }
 0x248   :  { %v8123_v9 = vpack.c.bf16 %v3020_v18, %v3020_v18  ;;  %v7514_v5 = vld [vmem:[#allocation7 + $0x120] ss:$28 sps:$4 sm:$0xff]   ;;  %v7525_v18 = vld [vmem:[#allocation7 + $0x5f4] ss:$28 sps:$4 sm:$0xff]  }
 0x249   :  { %v6716_v10 = vpop.f32.mrf.mxu1  ;;  %v7558_v37 = vld [vmem:[#allocation7 + $0x19c] ss:$28 sps:$4 sm:$0xff]  }
 0x24a   :  { %5330 = vmatprep.mubr.bf16.mxu1 %v8123_v9  ;;  %v6717_v3 = vadd.f32 %v6716_v10, %v6715_v8  ;;  %v7517_v8 = vld [vmem:[#allocation7 + $0x628] ss:$28 sps:$4 sm:$0xff]  }
 0x24b   :  { %v6718_v11 = vpop.f32.mrf.mxu1  ;;  %5331 = vmatmul.mubr.bf16.vlgmr.msra.gmra.mxu1 %v8125_v13  ;;  %v7520_v10 = vld [vmem:[#allocation7 + $0xe8] ss:$28 sps:$4 sm:$0xff]  }
 0x24c   :  { %5422 = vmatpush1.bf16.msra.mxu1 %v7472_v12  ;;  %5453 = vmatprep.mubr.bf16.mxu1 %v8103_v34  ;;  %v2888_v45 = vadd.f32 %v6717_v3, %v2848_v7  ;;  %v7528_v12 = vld [vmem:[#allocation7 + $0xb4] ss:$28 sps:$4 sm:$0xff]   ;;  %v7531_v11 = vld [vmem:[#allocation7 + $0x5bc] ss:$28 sps:$4 sm:$0xff]   ;;  %v7561_v7 = vld [vmem:[#allocation7 + $0x2e4] ss:$28 sps:$4 sm:$0xff]  }
 0x24d   :  { %v6719_v19 = vpop.f32.mrf.mxu1  ;;  %5423 = vmatprep.subr.bf16.mxu1 %v7477_v15  ;;  %v7523_v15 = vld [vmem:[#allocation7 + $0x5f0] ss:$28 sps:$4 sm:$0xff]  }
 0x24e   :  { %v7534_v19 = vld [vmem:[#allocation7 + $0x7c] ss:$28 sps:$4 sm:$0xff]  }
 0x24f   :  { %v2967_v21 = vpop.f32.mrf.mxu1 }
 0x250   :  { %5424 = vmatpush1.bf16.msra.mxu1 %v7475_v16  ;;  %v7526_v16 = vld [vmem:[#allocation7 + $0xb0] ss:$28 sps:$4 sm:$0xff]  }
 0x251   :  { %v6817_v24 = vpop.f32.mrf.mxu1  ;;  %5425 = vmatprep.subr.bf16.mxu1 %v7480_v20  ;;  %v7529_v20 = vld [vmem:[#allocation7 + $0x5b8] ss:$28 sps:$4 sm:$0xff]  }
 0x252   :  { %v7540_v24 = vld [vmem:[#allocation7 + $0x44] ss:$28 sps:$4 sm:$0xff]  }
 0x253   :  { %v2970_v27 = vpop.f32.mrf.mxu1 }
 0x254   :  { %5426 = vmatpush1.bf16.msra.mxu1 %v7478_v0  ;;  %v7532_v0 = vld [vmem:[#allocation7 + $0x78] ss:$28 sps:$4 sm:$0xff]   ;;  %v7543_v27 = vld [vmem:[#allocation7 + $0x54c] ss:$28 sps:$4 sm:$0xff]  }
 0x255   :  { %v6818_v30 = vpop.f32.mrf.mxu1  ;;  %5427 = vmatprep.subr.bf16.mxu1 %v7483_v26  ;;  %v7535_v26 = vld [vmem:[#allocation7 + $0x580] ss:$28 sps:$4 sm:$0xff]  }
 0x256   :  { %v7546_v30 = vld [vmem:[#allocation7 + $0xc] ss:$28 sps:$4 sm:$0xff]  }
 0x258   :  { %5428 = vmatpush1.bf16.msra.mxu1 %v7481_v29  ;;  %v7538_v29 = vld [vmem:[#allocation7 + $0x40] ss:$28 sps:$4 sm:$0xff]  }
 0x259   :  { %5429 = vmatprep.subr.bf16.mxu1 %v7486_v31  ;;  %v7541_v31 = vld [vmem:[#allocation7 + $0x548] ss:$28 sps:$4 sm:$0xff]  }
 0x25c   :  { %5430 = vmatpush1.bf16.msra.mxu1 %v7484_v23  ;;  %v7552_v23 = vld [vmem:[#allocation7 + $0xa8c] ss:$28 sps:$4 sm:$0xff]  }
 0x25d   :  { %5431 = vmatprep.subr.bf16.mxu1 %v7489_v35  ;;  %v7549_v35 = vld [vmem:[#allocation7 + $0x354] ss:$28 sps:$4 sm:$0xff]  }
 0x25e   :  { %v6737_v41 = vpop.f32.mrf.mxu0 }
 0x260   :  { %5432 = vmatpush1.bf16.msra.mxu1 %v7487_v38  ;;  %v6738_v44 = vpop.f32.mrf.mxu0  ;;  %v7547_v38 = vld [vmem:[#allocation7 + $0x350] ss:$28 sps:$4 sm:$0xff]  }
 0x261   :  { %5433 = vmatprep.subr.bf16.mxu1 %v7492_v40  ;;  %v6739_v49 = vadd.f32 %v6738_v44, %v6737_v41  ;;  %v7555_v40 = vld [vmem:[#allocation7 + $0x31c] ss:$28 sps:$4 sm:$0xff]  }
 0x262   :  { %v6740_v51 = vpop.f32.mrf.mxu0  ;;  %v7553_v41 = vld [vmem:[#allocation7 + $0x318] ss:$28 sps:$4 sm:$0xff]  }
 0x263   :  { %v2928_v52 = vadd.f32 %v6739_v49, %v2888_v45  ;;  %v7556_v44 = vld [vmem:[#allocation7 + $0x198] ss:$28 sps:$4 sm:$0xff]   ;;  %v7559_v49 = vld [vmem:[#allocation7 + $0x2e0] ss:$28 sps:$4 sm:$0xff]   ;;  %v7567_v51 = vld [vmem:[#allocation7 + $0x2ac] ss:$28 sps:$4 sm:$0xff]  }
 0x264   :  { %5434 = vmatpush1.bf16.msra.mxu1 %v7490_v60  ;;  %v6741_v32 = vpop.f32.mrf.mxu0 }
 0x265   :  { %5435 = vmatprep.subr.bf16.mxu1 %v7498_v47  ;;  %v2968_v54 = vadd.f32 %v2967_v21, %v2928_v52  ;;  %v7537_v21 = vld [vmem:[#allocation7 + $0x584] ss:$28 sps:$4 sm:$0xff]   ;;  %v8143_v32 = vsub.s32 2, %v7983_v42 }
 0x266   :  { %v7564_v47 = vld [vmem:[#allocation7 + $0x164] ss:$28 sps:$4 sm:$0xff]  }
 0x267   :  { %vm2979_vm8 = vcmp.gt.f32.partialorder %v2968_v54, 0.0  ;;  %v3014_v22 = vmul.f32 %v3007_v53, %v2968_v54  ;;  %v7562_v53 = vld [vmem:[#allocation7 + $0x160] ss:$28 sps:$4 sm:$0xff]  }
 0x268   :  { %5436 = vmatpush1.bf16.msra.mxu1 %v7496_v46  ;;  %v7570_v46 = vld [vmem:[#allocation7 + $0x12c] ss:$28 sps:$4 sm:$0xff]  }
 0x269   :  { %5437 = vmatprep.subr.bf16.mxu1 %v7501_v14  ;;  %v3021_v56 = vsel %vm2979_vm8, %v2968_v54, %v3014_v22  ;;  %v7565_v14 = vld [vmem:[#allocation7 + $0x2a8] ss:$28 sps:$4 sm:$0xff]   ;;  %v7573_v54 = vld [vmem:[#allocation7 + $0x274] ss:$28 sps:$4 sm:$0xff]  }
 0x26a   :  { %v8132_v17 = vpack.c.bf16 %v3021_v56, %v3021_v56  ;;  %v7568_v22 = vld [vmem:[#allocation7 + $0x128] ss:$28 sps:$4 sm:$0xff]   ;;  %v7571_v56 = vld [vmem:[#allocation7 + $0x270] ss:$28 sps:$4 sm:$0xff]  }
 0x26c   :  { %5438 = vmatpush2.bf16.msra.mxu1 %v7499_v50  ;;  %6673 = vmatmul.mubr.msk.bf16.vlgmr.msra.gmra.mxu0 %vm2317_vm0, %v8132_v17  ;;  %v7576_v50 = vld [vmem:[#allocation7 + $0xf4] ss:$28 sps:$4 sm:$0xff]  }
 0x26d   :  { %5439 = vmatprep.subr.bf16.mxu1 %v7507_v55  ;;  %5381 = vmatpush1.bf16.msra.mxu0 %v7502_v57  ;;  %v3424_v55 = vrot.slane %v8092_v28, %v8143_v32  ;;  %v7579_v57 = vld [vmem:[#allocation7 + $0x23c] ss:$28 sps:$4 sm:$0xff]  }
 0x26e   :  { %5412 = vmatprep.mubr.bf16.mxu0 %v8080_v58  ;;  %5382 = vmatprep.subr.bf16.mxu0 %v7510_v61  ;;  %v8147_v61 = vld [vmem:[#allocation8 + $0x8] sm:$0xff] }
 0x270   :  { %5440 = vmatpush2.bf16.msra.mxu1 %v7505_v62  ;;  %v3428_v62 = vrot.slane %v8147_v61, %v8143_v32 }
 0x271   :  { %5441 = vmatprep.subr.bf16.mxu1 %v7513_v43  ;;  %5383 = vmatpush1.bf16.msra.mxu0 %v7508_v63  ;;  %v7574_v43 = vld [vmem:[#allocation7 + $0xf0] ss:$28 sps:$4 sm:$0xff]   ;;  %v7582_v63 = vld [vmem:[#allocation7 + $0xbc] ss:$28 sps:$4 sm:$0xff]  }
 0x272   :  { %5384 = vmatprep.subr.bf16.mxu0 %v7516_v1 }
 0x274   :  { %5442 = vmatpush2.bf16.msra.mxu1 %v7511_v2  ;;  %v7577_v2 = vld [vmem:[#allocation7 + $0x238] ss:$28 sps:$4 sm:$0xff]  }
 0x275   :  { %5443 = vmatprep.subr.bf16.mxu1 %v7519_v4  ;;  %5385 = vmatpush1.bf16.msra.mxu0 %v7514_v5  ;;  %v7585_v5 = vld [vmem:[#allocation7 + $0x204] ss:$28 sps:$4 sm:$0xff]  }
 0x276   :  { %5386 = vmatprep.subr.bf16.mxu0 %v7522_v6 }
 0x278   :  { %5444 = vmatpush2.bf16.msra.mxu1 %v7517_v8  ;;  %v7580_v8 = vld [vmem:[#allocation7 + $0xb8] ss:$28 sps:$4 sm:$0xff]  }
 0x279   :  { %5445 = vmatprep.subr.bf16.mxu1 %v7525_v18  ;;  %5387 = vmatpush1.bf16.msra.mxu0 %v7520_v10  ;;  %v7588_v10 = vld [vmem:[#allocation7 + $0x84] ss:$28 sps:$4 sm:$0xff]  }
 0x27a   :  { %5388 = vmatprep.subr.bf16.mxu0 %v7528_v12 }
 0x27c   :  { %5446 = vmatpush2.bf16.msra.mxu1 %v7523_v15  ;;  %v7583_v15 = vld [vmem:[#allocation7 + $0x200] ss:$28 sps:$4 sm:$0xff]  }
 0x27d   :  { %5447 = vmatprep.subr.bf16.mxu1 %v7531_v11  ;;  %5389 = vmatpush1.bf16.msra.mxu0 %v7526_v16  ;;  %v7591_v16 = vld [vmem:[#allocation7 + $0x1cc] ss:$28 sps:$4 sm:$0xff]  }
 0x27e   :  { %5390 = vmatprep.subr.bf16.mxu0 %v7534_v19  ;;  %v7586_v19 = vld [vmem:[#allocation7 + $0x80] ss:$28 sps:$4 sm:$0xff]  }
 0x280   :  { %5448 = vmatpush2.bf16.msra.mxu1 %v7529_v20 }
 0x281   :  { %5449 = vmatprep.subr.bf16.mxu1 %v7537_v21  ;;  %5391 = vmatpush1.bf16.msra.mxu0 %v7532_v0  ;;  %v7594_v21 = vld [vmem:[#allocation7 + $0x4c] ss:$28 sps:$4 sm:$0xff]  }
 0x282   :  { %5392 = vmatprep.subr.bf16.mxu0 %v7540_v24  ;;  %v7589_v0 = vld [vmem:[#allocation7 + $0x1c8] ss:$28 sps:$4 sm:$0xff]   ;;  %v7597_v24 = vld [vmem:[#allocation7 + $0x894] ss:$28 sps:$4 sm:$0xff]  }
 0x284   :  { %5450 = vmatpush2.bf16.msra.mxu1 %v7535_v26  ;;  %v7592_v26 = vld [vmem:[#allocation7 + $0x48] ss:$28 sps:$4 sm:$0xff]  }
 0x285   :  { %5451 = vmatprep.subr.bf16.mxu1 %v7543_v27  ;;  %5393 = vmatpush1.bf16.msra.mxu0 %v7538_v29  ;;  %v7600_v27 = vld [vmem:[#allocation7 + $0x14] ss:$28 sps:$4 sm:$0xff]  }
 0x286   :  { %5394 = vmatprep.subr.bf16.mxu0 %v7546_v30  ;;  %v7595_v29 = vld [vmem:[#allocation7 + $0x890] ss:$28 sps:$4 sm:$0xff]   ;;  %v7603_v30 = vld [vmem:[#allocation7 + $0x85c] ss:$28 sps:$4 sm:$0xff]  }
 0x288   :  { %5452 = vmatpush2.bf16.msra.mxu1 %v7541_v31  ;;  %v7598_v31 = vld [vmem:[#allocation7 + $0x10] ss:$28 sps:$4 sm:$0xff]  }
 0x289   :  { %5517 = vmatprep.subr.bf16.mxu1 %v7552_v23  ;;  %5395 = vmatpush1.bf16.msra.mxu0 %v7544_v33  ;;  %v7606_v23 = vld [vmem:[#allocation7 + $0x35c] ss:$28 sps:$4 sm:$0xff]  }
 0x28a   :  { %5396 = vmatprep.subr.bf16.mxu0 %v7549_v35  ;;  %v7601_v33 = vld [vmem:[#allocation7 + $0x858] ss:$28 sps:$4 sm:$0xff]   ;;  %v7609_v35 = vld [vmem:[#allocation7 + $0x824] ss:$28 sps:$4 sm:$0xff]  }
 0x28b   :  { %5454 = vmatmul.mubr.bf16.vlgmr.msra.gmra.mxu1 %v8115_v59 }
 0x28c   :  { %5518 = vmatpush1.bf16.msra.mxu1 %v7550_v36  ;;  %5535 = vmatprep.mubr.bf16.mxu1 %v7941_v25  ;;  %v7604_v36 = vld [vmem:[#allocation7 + $0x358] ss:$28 sps:$4 sm:$0xff]  }
 0x28d   :  { %5544 = vmatprep.subr.bf16.mxu1 %v7558_v37  ;;  %5397 = vmatpush2.bf16.msra.mxu0 %v7547_v38  ;;  %v7612_v37 = vld [vmem:[#allocation7 + $0x324] ss:$28 sps:$4 sm:$0xff]  }
 0x28e   :  { %5398 = vmatprep.subr.bf16.mxu0 %v7555_v40  ;;  %v7607_v38 = vld [vmem:[#allocation7 + $0x820] ss:$28 sps:$4 sm:$0xff]   ;;  %v7615_v40 = vld [vmem:[#allocation7 + $0x7ec] ss:$28 sps:$4 sm:$0xff]  }
 0x28f   :  { %v5250_v3 = vpop.f32.mrf.mxu1 }
 0x290   :  { %v5251_v1 = vadd.f32 %v5250_v3, %v3424_v55  ;;  %v7610_v3 = vld [vmem:[#allocation7 + $0x320] ss:$28 sps:$4 sm:$0xff]  }
 0x291   :  { %v5252_v60 = vpop.f32.mrf.mxu1  ;;  %5399 = vmatpush2.bf16.msra.mxu0 %v7553_v41  ;;  %v7618_v41 = vld [vmem:[#allocation7 + $0x2ec] ss:$28 sps:$4 sm:$0xff]   ;;  %v7634_v55 = vld [vmem:[#allocation7 + $0x240] ss:$28 sps:$4 sm:$0xff]  }
 0x292   :  { %5400 = vmatprep.subr.bf16.mxu0 %v7561_v7  ;;  %v5253_v28 = vadd.f32 %v5252_v60, %v3428_v62  ;;  %v7613_v7 = vld [vmem:[#allocation7 + $0x7e8] ss:$28 sps:$4 sm:$0xff]   ;;  %v7621_v60 = vld [vmem:[#allocation7 + $0x7b4] ss:$28 sps:$4 sm:$0xff]  }
 0x293   :  { %v5254_v45 = vpop.f32.mrf.mxu1  ;;  %6674 = vmatmul.mubr.msk.bf16.vlgmr.msra.gmra.mxu1 %vm2317_vm0, %v8132_v17  ;;  %v7645_v62 = vld [vmem:[#allocation7 + $0xa54] ss:$28 sps:$4 sm:$0xff]  }
 0x294   :  { %5545 = vmatpush1.bf16.msra.mxu1 %v7556_v44  ;;  %5576 = vmatprep.mubr.bf16.mxu1 %v8080_v58  ;;  %v7616_v44 = vld [vmem:[#allocation7 + $0x2e8] ss:$28 sps:$4 sm:$0xff]   ;;  %v7619_v45 = vld [vmem:[#allocation7 + $0x7b0] ss:$28 sps:$4 sm:$0xff]  }
 0x295   :  { %v5255_v52 = vpop.f32.mrf.mxu1  ;;  %5546 = vmatprep.subr.bf16.mxu1 %v7564_v47  ;;  %5401 = vmatpush2.bf16.msra.mxu0 %v7559_v49  ;;  %v7624_v47 = vld [vmem:[#allocation7 + $0x2b4] ss:$28 sps:$4 sm:$0xff]   ;;  %v7627_v49 = vld [vmem:[#allocation7 + $0x77c] ss:$28 sps:$4 sm:$0xff]  }
 0x296   :  { %5402 = vmatprep.subr.bf16.mxu0 %v7567_v51  ;;  %v7622_v51 = vld [vmem:[#allocation7 + $0x2b0] ss:$28 sps:$4 sm:$0xff]   ;;  %v7630_v52 = vld [vmem:[#allocation7 + $0x27c] ss:$28 sps:$4 sm:$0xff]  }
 0x298   :  { %5547 = vmatpush1.bf16.msra.mxu1 %v7562_v53  ;;  %v7625_v53 = vld [vmem:[#allocation7 + $0x778] ss:$28 sps:$4 sm:$0xff]  }
 0x299   :  { %5548 = vmatprep.subr.bf16.mxu1 %v7570_v46  ;;  %5403 = vmatpush2.bf16.msra.mxu0 %v7565_v14  ;;  %v7633_v46 = vld [vmem:[#allocation7 + $0x744] ss:$28 sps:$4 sm:$0xff]   ;;  %v7628_v14 = vld [vmem:[#allocation7 + $0x278] ss:$28 sps:$4 sm:$0xff]  }
 0x29a   :  { %5404 = vmatprep.subr.bf16.mxu0 %v7573_v54  ;;  %v7636_v54 = vld [vmem:[#allocation7 + $0x244] ss:$28 sps:$4 sm:$0xff]  }
 0x29c   :  { %5549 = vmatpush1.bf16.msra.mxu1 %v7568_v22  ;;  %v7631_v22 = vld [vmem:[#allocation7 + $0x740] ss:$28 sps:$4 sm:$0xff]  }
 0x29d   :  { %5550 = vmatprep.subr.bf16.mxu1 %v7576_v50  ;;  %5405 = vmatpush2.bf16.msra.mxu0 %v7571_v56  ;;  %v7639_v50 = vld [vmem:[#allocation7 + $0x70c] ss:$28 sps:$4 sm:$0xff]  }
 0x29e   :  { %v5291_v4 = vpop.f32.mrf.mxu0  ;;  %5406 = vmatprep.subr.bf16.mxu0 %v7579_v57  ;;  %v7642_v56 = vld [vmem:[#allocation7 + $0x20c] ss:$28 sps:$4 sm:$0xff]  }
 0x29f   :  { %v8151_v6 = vadd.f32 %v5291_v4, %v5251_v1  ;;  %v7637_v57 = vld [vmem:[#allocation7 + $0x708] ss:$28 sps:$4 sm:$0xff]   ;;  %v7643_v1 = vld [vmem:[#allocation7 + $0xa50] ss:$28 sps:$4 sm:$0xff]  }
 0x2a0   :  { %5551 = vmatpush1.bf16.msra.mxu1 %v7574_v43  ;;  %v5293_v18 = vpop.f32.mrf.mxu0  ;;  %v7640_v43 = vld [vmem:[#allocation7 + $0x208] ss:$28 sps:$4 sm:$0xff]   ;;  %v7646_v4 = vld [vmem:[#allocation7 + $0x1d0] ss:$28 sps:$4 sm:$0xff]  }
 0x2a1   :  { %5552 = vmatprep.subr.bf16.mxu1 %v7582_v63  ;;  %v8153_v12 = vadd.f32 %v5293_v18, %v5253_v28  ;;  %5407 = vmatpush2.bf16.msra.mxu0 %v7577_v2  ;;  %v7648_v63 = vld [vmem:[#allocation7 + $0x1d4] ss:$28 sps:$4 sm:$0xff]   ;;  %v7651_v2 = vld [vmem:[#allocation7 + $0xa1c] ss:$28 sps:$4 sm:$0xff]  }
 0x2a2   :  { %v5295_v11 = vpop.f32.mrf.mxu0  ;;  %5408 = vmatprep.subr.bf16.mxu0 %v7585_v5  ;;  %v7654_v5 = vld [vmem:[#allocation7 + $0x89c] ss:$28 sps:$4 sm:$0xff]  }
 0x2a3   :  { %v7649_v28 = vld [vmem:[#allocation7 + $0xa18] ss:$28 sps:$4 sm:$0xff]   ;;  %v7663_v11 = vld [vmem:[#allocation7 + $0x9ac] ss:$28 sps:$4 sm:$0xff]  }
 0x2a4   :  { %5553 = vmatpush1.bf16.msra.mxu1 %v7580_v8  ;;  %v5296_v20 = vpop.f32.mrf.mxu0  ;;  %v7657_v8 = vld [vmem:[#allocation7 + $0x9e4] ss:$28 sps:$4 sm:$0xff]   ;;  %v7652_v18 = vld [vmem:[#allocation7 + $0x898] ss:$28 sps:$4 sm:$0xff]  }
 0x2a5   :  { %5554 = vmatprep.subr.bf16.mxu1 %v7588_v10  ;;  %5409 = vmatpush2.bf16.msra.mxu0 %v7583_v15  ;;  %v7660_v10 = vld [vmem:[#allocation7 + $0x864] ss:$28 sps:$4 sm:$0xff]  }
 0x2a6   :  { %5410 = vmatprep.subr.bf16.mxu0 %v7591_v16  ;;  %v7655_v15 = vld [vmem:[#allocation7 + $0x9e0] ss:$28 sps:$4 sm:$0xff]   ;;  %v7661_v20 = vld [vmem:[#allocation7 + $0x9a8] ss:$28 sps:$4 sm:$0xff]  }
 0x2a7   :  { %v7658_v16 = vld [vmem:[#allocation7 + $0x860] ss:$28 sps:$4 sm:$0xff]  }
 0x2a8   :  { %5555 = vmatpush1.bf16.msra.mxu1 %v7586_v19  ;;  %v7666_v19 = vld [vmem:[#allocation7 + $0x82c] ss:$28 sps:$4 sm:$0xff]  }
 0x2a9   :  { %5556 = vmatprep.subr.bf16.mxu1 %v7594_v21  ;;  %5411 = vmatpush2.bf16.msra.mxu0 %v7589_v0  ;;  %v7669_v21 = vld [vmem:[#allocation7 + $0x974] ss:$28 sps:$4 sm:$0xff]   ;;  %v7664_v0 = vld [vmem:[#allocation7 + $0x828] ss:$28 sps:$4 sm:$0xff]  }
 0x2aa   :  { %5462 = vmatprep.subr.bf16.mxu0 %v7597_v24  ;;  %v7672_v24 = vld [vmem:[#allocation7 + $0x7f4] ss:$28 sps:$4 sm:$0xff]  }
 0x2ac   :  { %5557 = vmatpush1.bf16.msra.mxu1 %v7592_v26  ;;  %5413 = vmatmul.mubr.bf16.vlgmr.msra.gmra.mxu0 %v8108_v39  ;;  %v7667_v26 = vld [vmem:[#allocation7 + $0x970] ss:$28 sps:$4 sm:$0xff]  }
 0x2ad   :  { %5558 = vmatprep.subr.bf16.mxu1 %v7600_v27  ;;  %5463 = vmatpush1.bf16.msra.mxu0 %v7595_v29  ;;  %v7675_v27 = vld [vmem:[#allocation7 + $0x93c] ss:$28 sps:$4 sm:$0xff]   ;;  %v7670_v29 = vld [vmem:[#allocation7 + $0x7f0] ss:$28 sps:$4 sm:$0xff]  }
 0x2ae   :  { %5494 = vmatprep.mubr.bf16.mxu0 %v8123_v9  ;;  %5464 = vmatprep.subr.bf16.mxu0 %v7603_v30  ;;  %v7678_v30 = vld [vmem:[#allocation7 + $0x7bc] ss:$28 sps:$4 sm:$0xff]  }
 0x2b0   :  { %5559 = vmatpush1.bf16.msra.mxu1 %v7598_v31  ;;  %v7673_v31 = vld [vmem:[#allocation7 + $0x938] ss:$28 sps:$4 sm:$0xff]  }
 0x2b1   :  { %5560 = vmatprep.subr.bf16.mxu1 %v7606_v23  ;;  %5465 = vmatpush1.bf16.msra.mxu0 %v7601_v33  ;;  %v7681_v23 = vld [vmem:[#allocation7 + $0x904] ss:$28 sps:$4 sm:$0xff]   ;;  %v7676_v33 = vld [vmem:[#allocation7 + $0x7b8] ss:$28 sps:$4 sm:$0xff]  }
 0x2b2   :  { %5466 = vmatprep.subr.bf16.mxu0 %v7609_v35  ;;  %v7684_v35 = vld [vmem:[#allocation7 + $0x784] ss:$28 sps:$4 sm:$0xff]  }
 0x2b4   :  { %5561 = vmatpush2.bf16.msra.mxu1 %v7604_v36  ;;  %v7679_v36 = vld [vmem:[#allocation7 + $0x900] ss:$28 sps:$4 sm:$0xff]  }
 0x2b5   :  { %5562 = vmatprep.subr.bf16.mxu1 %v7612_v37  ;;  %5467 = vmatpush1.bf16.msra.mxu0 %v7607_v38  ;;  %v7687_v37 = vld [vmem:[#allocation7 + $0x8cc] ss:$28 sps:$4 sm:$0xff]   ;;  %v7682_v38 = vld [vmem:[#allocation7 + $0x780] ss:$28 sps:$4 sm:$0xff]  }
 0x2b6   :  { %5468 = vmatprep.subr.bf16.mxu0 %v7615_v40  ;;  %v7690_v40 = vld [vmem:[#allocation7 + $0x74c] ss:$28 sps:$4 sm:$0xff]  }
 0x2b8   :  { %5563 = vmatpush2.bf16.msra.mxu1 %v7610_v3  ;;  %v7685_v3 = vld [vmem:[#allocation7 + $0x8c8] ss:$28 sps:$4 sm:$0xff]  }
 0x2b9   :  { %5564 = vmatprep.subr.bf16.mxu1 %v7618_v41  ;;  %5469 = vmatpush1.bf16.msra.mxu0 %v7613_v7  ;;  %v7693_v41 = vld [vmem:[#allocation7 + $0x51c] ss:$28 sps:$4 sm:$0xff]   ;;  %v7688_v7 = vld [vmem:[#allocation7 + $0x748] ss:$28 sps:$4 sm:$0xff]  }
 0x2ba   :  { %5470 = vmatprep.subr.bf16.mxu0 %v7621_v60  ;;  %v7696_v60 = vld [vmem:[#allocation7 + $0x714] ss:$28 sps:$4 sm:$0xff]  }
 0x2bc   :  { %5565 = vmatpush2.bf16.msra.mxu1 %v7616_v44  ;;  %v7691_v44 = vld [vmem:[#allocation7 + $0x518] ss:$28 sps:$4 sm:$0xff]  }
 0x2bd   :  { %5566 = vmatprep.subr.bf16.mxu1 %v7624_v47  ;;  %5471 = vmatpush1.bf16.msra.mxu0 %v7619_v45  ;;  %v7699_v47 = vld [vmem:[#allocation7 + $0x4e4] ss:$28 sps:$4 sm:$0xff]   ;;  %v7694_v45 = vld [vmem:[#allocation7 + $0x710] ss:$28 sps:$4 sm:$0xff]  }
 0x2be   :  { %5472 = vmatprep.subr.bf16.mxu0 %v7627_v49  ;;  %v7702_v49 = vld [vmem:[#allocation7 + $0xa5c] ss:$28 sps:$4 sm:$0xff]  }
 0x2c0   :  { %5567 = vmatpush2.bf16.msra.mxu1 %v7622_v51  ;;  %v7697_v51 = vld [vmem:[#allocation7 + $0x4e0] ss:$28 sps:$4 sm:$0xff]  }
 0x2c1   :  { %5568 = vmatprep.subr.bf16.mxu1 %v7630_v52  ;;  %5473 = vmatpush1.bf16.msra.mxu0 %v7625_v53  ;;  %v7705_v52 = vld [vmem:[#allocation7 + $0x4ac] ss:$28 sps:$4 sm:$0xff]   ;;  %v7700_v53 = vld [vmem:[#allocation7 + $0xa58] ss:$28 sps:$4 sm:$0xff]  }
 0x2c2   :  { %5474 = vmatprep.subr.bf16.mxu0 %v7633_v46  ;;  %v7708_v46 = vld [vmem:[#allocation7 + $0xa24] ss:$28 sps:$4 sm:$0xff]  }
 0x2c4   :  { %5569 = vmatpush2.bf16.msra.mxu1 %v7628_v14  ;;  %v7703_v14 = vld [vmem:[#allocation7 + $0x4a8] ss:$28 sps:$4 sm:$0xff]  }
 0x2c5   :  { %5570 = vmatprep.subr.bf16.mxu1 %v7636_v54  ;;  %5475 = vmatpush1.bf16.msra.mxu0 %v7631_v22  ;;  %v7711_v54 = vld [vmem:[#allocation7 + $0x474] ss:$28 sps:$4 sm:$0xff]   ;;  %v7706_v22 = vld [vmem:[#allocation7 + $0xa20] ss:$28 sps:$4 sm:$0xff]  }
 0x2c6   :  { %5476 = vmatprep.subr.bf16.mxu0 %v7639_v50  ;;  %v7714_v50 = vld [vmem:[#allocation7 + $0x9ec] ss:$28 sps:$4 sm:$0xff]  }
 0x2c8   :  { %5571 = vmatpush2.bf16.msra.mxu1 %v7634_v55  ;;  %v7709_v55 = vld [vmem:[#allocation7 + $0x470] ss:$28 sps:$4 sm:$0xff]  }
 0x2c9   :  { %5572 = vmatprep.subr.bf16.mxu1 %v7642_v56  ;;  %5477 = vmatpush1.bf16.msra.mxu0 %v7637_v57  ;;  %v7717_v56 = vld [vmem:[#allocation7 + $0x43c] ss:$28 sps:$4 sm:$0xff]   ;;  %v7712_v57 = vld [vmem:[#allocation7 + $0x9e8] ss:$28 sps:$4 sm:$0xff]  }
 0x2ca   :  { %5478 = vmatprep.subr.bf16.mxu0 %v7645_v62  ;;  %v7720_v62 = vld [vmem:[#allocation7 + $0x9b4] ss:$28 sps:$4 sm:$0xff]  }
 0x2cc   :  { %5573 = vmatpush2.bf16.msra.mxu1 %v7640_v43  ;;  %v7715_v43 = vld [vmem:[#allocation7 + $0x438] ss:$28 sps:$4 sm:$0xff]  }
 0x2cd   :  { %5574 = vmatprep.subr.bf16.mxu1 %v7648_v63  ;;  %5479 = vmatpush2.bf16.msra.mxu0 %v7643_v1  ;;  %v7723_v63 = vld [vmem:[#allocation7 + $0x404] ss:$28 sps:$4 sm:$0xff]   ;;  %v7718_v1 = vld [vmem:[#allocation7 + $0x9b0] ss:$28 sps:$4 sm:$0xff]  }
 0x2ce   :  { %5480 = vmatprep.subr.bf16.mxu0 %v7651_v2  ;;  %v7726_v2 = vld [vmem:[#allocation7 + $0x97c] ss:$28 sps:$4 sm:$0xff]  }
 0x2d0   :  { %5575 = vmatpush2.bf16.msra.mxu1 %v7646_v4  ;;  %v7721_v4 = vld [vmem:[#allocation7 + $0x400] ss:$28 sps:$4 sm:$0xff]  }
 0x2d1   :  { %5626 = vmatprep.subr.bf16.mxu1 %v7654_v5  ;;  %5481 = vmatpush2.bf16.msra.mxu0 %v7649_v28  ;;  %v7729_v5 = vld [vmem:[#allocation7 + $0x3cc] ss:$28 sps:$4 sm:$0xff]   ;;  %v7724_v28 = vld [vmem:[#allocation7 + $0x978] ss:$28 sps:$4 sm:$0xff]  }
 0x2d2   :  { %5482 = vmatprep.subr.bf16.mxu0 %v7657_v8  ;;  %v7732_v8 = vld [vmem:[#allocation7 + $0x944] ss:$28 sps:$4 sm:$0xff]  }
 0x2d3   :  { %5577 = vmatmul.mubr.bf16.vlgmr.msra.gmra.mxu1 %v8108_v39 }
 0x2d4   :  { %5627 = vmatpush1.bf16.msra.mxu1 %v7652_v18  ;;  %5658 = vmatprep.mubr.bf16.mxu1 %v8123_v9  ;;  %v7727_v18 = vld [vmem:[#allocation7 + $0x3c8] ss:$28 sps:$4 sm:$0xff]  }
 0x2d5   :  { %5628 = vmatprep.subr.bf16.mxu1 %v7660_v10  ;;  %5483 = vmatpush2.bf16.msra.mxu0 %v7655_v15  ;;  %v7735_v10 = vld [vmem:[#allocation7 + $0x394] ss:$28 sps:$4 sm:$0xff]   ;;  %v7730_v15 = vld [vmem:[#allocation7 + $0x940] ss:$28 sps:$4 sm:$0xff]  }
 0x2d6   :  { %5484 = vmatprep.subr.bf16.mxu0 %v7663_v11  ;;  %v7738_v11 = vld [vmem:[#allocation7 + $0x90c] ss:$28 sps:$4 sm:$0xff]  }
 0x2d8   :  { %5629 = vmatpush1.bf16.msra.mxu1 %v7658_v16  ;;  %v7733_v16 = vld [vmem:[#allocation7 + $0x390] ss:$28 sps:$4 sm:$0xff]  }
 0x2d9   :  { %5630 = vmatprep.subr.bf16.mxu1 %v7666_v19  ;;  %5485 = vmatpush2.bf16.msra.mxu0 %v7661_v20  ;;  %v7741_v19 = vld [vmem:[#allocation7 + $0x6dc] ss:$28 sps:$4 sm:$0xff]   ;;  %v7736_v20 = vld [vmem:[#allocation7 + $0x908] ss:$28 sps:$4 sm:$0xff]  }
 0x2da   :  { %5486 = vmatprep.subr.bf16.mxu0 %v7669_v21  ;;  %v7744_v21 = vld [vmem:[#allocation7 + $0x8d4] ss:$28 sps:$4 sm:$0xff]  }
 0x2dc   :  { %5631 = vmatpush1.bf16.msra.mxu1 %v7664_v0  ;;  %v7739_v0 = vld [vmem:[#allocation7 + $0x6d8] ss:$28 sps:$4 sm:$0xff]  }
 0x2dd   :  { %5632 = vmatprep.subr.bf16.mxu1 %v7672_v24  ;;  %5487 = vmatpush2.bf16.msra.mxu0 %v7667_v26  ;;  %v7747_v26 = vld [vmem:[#allocation7 + $0x6a4] ss:$28 sps:$4 sm:$0xff]  }
 0x2de   :  { %5488 = vmatprep.subr.bf16.mxu0 %v7675_v27 }
 0x2e0   :  { %5633 = vmatpush1.bf16.msra.mxu1 %v7670_v29  ;;  %v7742_v29 = vld [vmem:[#allocation7 + $0x8d0] ss:$28 sps:$4 sm:$0xff]  }
 0x2e1   :  { %5634 = vmatprep.subr.bf16.mxu1 %v7678_v30  ;;  %5489 = vmatpush2.bf16.msra.mxu0 %v7673_v31  ;;  %v7748_v31 = vld [vmem:[#allocation7 + $0xa60] ss:$28 sps:$4 sm:$0xff]  }
 0x2e2   :  { %5490 = vmatprep.subr.bf16.mxu0 %v7681_v23 }
 0x2e4   :  { %5635 = vmatpush1.bf16.msra.mxu1 %v7676_v33  ;;  %v7745_v33 = vld [vmem:[#allocation7 + $0x6a0] ss:$28 sps:$4 sm:$0xff]  }
 0x2e5   :  { %5636 = vmatprep.subr.bf16.mxu1 %v7684_v35  ;;  %5491 = vmatpush2.bf16.msra.mxu0 %v7679_v36  ;;  %v7752_v36 = vld [vmem:[#allocation7 + $0x66c] ss:$28 sps:$4 sm:$0xff]  }
 0x2e6   :  { %5492 = vmatprep.subr.bf16.mxu0 %v7687_v37  ;;  %v7749_v37 = vld [vmem:[#allocation7 + $0x8a0] ss:$28 sps:$4 sm:$0xff]  }
 0x2e8   :  { %5637 = vmatpush1.bf16.msra.mxu1 %v7682_v38 }
 0x2e9   :  { %5638 = vmatprep.subr.bf16.mxu1 %v7690_v40  ;;  %5493 = vmatpush2.bf16.msra.mxu0 %v7685_v3  ;;  %v7753_v40 = vld [vmem:[#allocation7 + $0xa28] ss:$28 sps:$4 sm:$0xff]   ;;  %v7757_v3 = vld [vmem:[#allocation7 + $0x634] ss:$28 sps:$4 sm:$0xff]  }
 0x2ea   :  { %5585 = vmatprep.subr.bf16.mxu0 %v7693_v41  ;;  %v7758_v41 = vld [vmem:[#allocation7 + $0x9f0] ss:$28 sps:$4 sm:$0xff]  }
 0x2ec   :  { %5639 = vmatpush1.bf16.msra.mxu1 %v7688_v7  ;;  %5495 = vmatmul.mubr.bf16.vlgmr.msra.gmra.mxu0 %v8125_v13  ;;  %v7755_v7 = vld [vmem:[#allocation7 + $0x630] ss:$28 sps:$4 sm:$0xff]  }
 0x2ed   :  { %5640 = vmatprep.subr.bf16.mxu1 %v7696_v60  ;;  %5586 = vmatpush1.bf16.msra.mxu0 %v7691_v44  ;;  %v7762_v60 = vld [vmem:[#allocation7 + $0x5fc] ss:$28 sps:$4 sm:$0xff]   ;;  %v7759_v44 = vld [vmem:[#allocation7 + $0x830] ss:$28 sps:$4 sm:$0xff]  }
 0x2ee   :  { %5617 = vmatprep.mubr.bf16.mxu0 %v8103_v34  ;;  %5587 = vmatprep.subr.bf16.mxu0 %v7699_v47  ;;  %v7763_v47 = vld [vmem:[#allocation7 + $0x9b8] ss:$28 sps:$4 sm:$0xff]  }
 0x2f0   :  { %5641 = vmatpush1.bf16.msra.mxu1 %v7694_v45  ;;  %v7760_v45 = vld [vmem:[#allocation7 + $0x5f8] ss:$28 sps:$4 sm:$0xff]  }
 0x2f1   :  { %5642 = vmatprep.subr.bf16.mxu1 %v7702_v49  ;;  %5588 = vmatpush1.bf16.msra.mxu0 %v7697_v51  ;;  %v7767_v49 = vld [vmem:[#allocation7 + $0x5c4] ss:$28 sps:$4 sm:$0xff]   ;;  %v7764_v51 = vld [vmem:[#allocation7 + $0x7f8] ss:$28 sps:$4 sm:$0xff]  }
 0x2f2   :  { %5589 = vmatprep.subr.bf16.mxu0 %v7705_v52  ;;  %v7768_v52 = vld [vmem:[#allocation7 + $0x980] ss:$28 sps:$4 sm:$0xff]  }
 0x2f4   :  { %5643 = vmatpush2.bf16.msra.mxu1 %v7700_v53  ;;  %v7772_v53 = vld [vmem:[#allocation7 + $0x58c] ss:$28 sps:$4 sm:$0xff]  }
 0x2f5   :  { %5644 = vmatprep.subr.bf16.mxu1 %v7708_v46  ;;  %5590 = vmatpush1.bf16.msra.mxu0 %v7703_v14  ;;  %v7769_v46 = vld [vmem:[#allocation7 + $0x7c0] ss:$28 sps:$4 sm:$0xff]   ;;  %v7773_v14 = vld [vmem:[#allocation7 + $0x948] ss:$28 sps:$4 sm:$0xff]  }
 0x2f6   :  { %5591 = vmatprep.subr.bf16.mxu0 %v7711_v54  ;;  %v7770_v54 = vld [vmem:[#allocation7 + $0x588] ss:$28 sps:$4 sm:$0xff]  }
 0x2f8   :  { %5645 = vmatpush2.bf16.msra.mxu1 %v7706_v22  ;;  %v7777_v22 = vld [vmem:[#allocation7 + $0x554] ss:$28 sps:$4 sm:$0xff]  }
 0x2f9   :  { %5646 = vmatprep.subr.bf16.mxu1 %v7714_v50  ;;  %5592 = vmatpush1.bf16.msra.mxu0 %v7709_v55  ;;  %v7774_v50 = vld [vmem:[#allocation7 + $0x788] ss:$28 sps:$4 sm:$0xff]   ;;  %v7778_v55 = vld [vmem:[#allocation7 + $0x910] ss:$28 sps:$4 sm:$0xff]  }
 0x2fa   :  { %5593 = vmatprep.subr.bf16.mxu0 %v7717_v56  ;;  %v7775_v56 = vld [vmem:[#allocation7 + $0x550] ss:$28 sps:$4 sm:$0xff]  }
 0x2fc   :  { %5647 = vmatpush2.bf16.msra.mxu1 %v7712_v57  ;;  %v7782_v57 = vld [vmem:[#allocation7 + $0xa94] ss:$28 sps:$4 sm:$0xff]  }
 0x2fd   :  { %5648 = vmatprep.subr.bf16.mxu1 %v7720_v62  ;;  %5594 = vmatpush1.bf16.msra.mxu0 %v7715_v43  ;;  %v7779_v62 = vld [vmem:[#allocation7 + $0x750] ss:$28 sps:$4 sm:$0xff]   ;;  %v8170_v43 = vsub.s32 3, %v7983_v42 }
 0x2fe   :  { %5595 = vmatprep.subr.bf16.mxu0 %v7723_v63  ;;  %v7783_v63 = vld [vmem:[#allocation7 + $0x8d8] ss:$28 sps:$4 sm:$0xff]  }
 0x300   :  { %5649 = vmatpush2.bf16.msra.mxu1 %v7718_v1  ;;  %v7780_v1 = vld [vmem:[#allocation7 + $0xa90] ss:$28 sps:$4 sm:$0xff]  }
 0x301   :  { %5650 = vmatprep.subr.bf16.mxu1 %v7726_v2  ;;  %5596 = vmatpush1.bf16.msra.mxu0 %v7721_v4  ;;  %v7785_v2 = vld [vmem:[#allocation7 + $0x360] ss:$28 sps:$4 sm:$0xff]  }
 0x302   :  { %5597 = vmatprep.subr.bf16.mxu0 %v7729_v5  ;;  %v7820_v4 = vld [vmem:[#allocation8] sm:$0xff] }
 0x303   :  { %v5878_v5 = vrot.slane %v7820_v4, %v8170_v43 }
 0x304   :  { %5651 = vmatpush2.bf16.msra.mxu1 %v7724_v28  ;;  %v7784_v28 = vld [vmem:[#allocation7 + $0x718] ss:$28 sps:$4 sm:$0xff]  }
 0x305   :  { %5652 = vmatprep.subr.bf16.mxu1 %v7732_v8  ;;  %5598 = vmatpush1.bf16.msra.mxu0 %v7727_v18 }
 0x306   :  { %5599 = vmatprep.subr.bf16.mxu0 %v7735_v10  ;;  %v5882_v10 = vrot.slane %v8147_v61, %v8170_v43 }
 0x308   :  { %5653 = vmatpush2.bf16.msra.mxu1 %v7730_v15 }
 0x309   :  { %5654 = vmatprep.subr.bf16.mxu1 %v7738_v11  ;;  %5600 = vmatpush1.bf16.msra.mxu0 %v7733_v16 }
 0x30a   :  { %5601 = vmatprep.subr.bf16.mxu0 %v7741_v19 }
 0x30b   :  { %v5332_v24 = vpop.f32.mrf.mxu1 }
 0x30c   :  { %5655 = vmatpush2.bf16.msra.mxu1 %v7736_v20  ;;  %v8162_v27 = vadd.f32 %v5332_v24, %v8151_v6  ;;  %v7750_v6 = vld [vmem:[#allocation7 + $0x668] ss:$28 sps:$4 sm:$0xff]  }
 0x30d   :  { %v5334_v30 = vpop.f32.mrf.mxu1  ;;  %5656 = vmatprep.subr.bf16.mxu1 %v7744_v21  ;;  %5602 = vmatpush2.bf16.msra.mxu0 %v7739_v0  ;;  %v7786_v21 = vld [vmem:[#allocation7 + $0x1a0] ss:$28 sps:$4 sm:$0xff]   ;;  %v7787_v24 = vld [vmem:[#allocation7 + $0x328] ss:$28 sps:$4 sm:$0xff]  }
 0x30e   :  { %v8165_v23 = vadd.f32 %v5334_v30, %v8153_v12  ;;  %5603 = vmatprep.subr.bf16.mxu0 %v7747_v26  ;;  %v7754_v12 = vld [vmem:[#allocation7 + $0x868] ss:$28 sps:$4 sm:$0xff]   ;;  %v7791_v30 = vld [vmem:[#allocation7 + $0x2b8] ss:$28 sps:$4 sm:$0xff]  }
 0x30f   :  { %v5336_v35 = vpop.f32.mrf.mxu1 }
 0x310   :  { %5657 = vmatpush2.bf16.msra.mxu1 %v7742_v29  ;;  %v7789_v29 = vld [vmem:[#allocation7 + $0x2f0] ss:$28 sps:$4 sm:$0xff]   ;;  %v7795_v35 = vld [vmem:[#allocation7 + $0x248] ss:$28 sps:$4 sm:$0xff]  }
 0x311   :  { %v5337_v38 = vpop.f32.mrf.mxu1  ;;  %6789 = vmatprep.subr.bf16.mxu1 %v7748_v31  ;;  %5604 = vmatpush2.bf16.msra.mxu0 %v7745_v33  ;;  %v7792_v31 = vld [vmem:[#allocation7 + $0xf8] ss:$28 sps:$4 sm:$0xff]   ;;  %v7794_v33 = vld [vmem:[#allocation7 + $0xc0] ss:$28 sps:$4 sm:$0xff]  }
 0x312   :  { %5605 = vmatprep.subr.bf16.mxu0 %v7752_v36  ;;  %v7796_v36 = vld [vmem:[#allocation7 + $0x88] ss:$28 sps:$4 sm:$0xff]  }
 0x313   :  { %5659 = vmatmul.mubr.bf16.vlgmr.msra.gmra.mxu1 %v8125_v13 }
 0x314   :  { %6790 = vmatpush3.bf16.msra.mxu1 %v7749_v37  ;;  %5820 = vmatprep.mubr.bf16.mxu1 %v8123_v9  ;;  %v7765_v9 = vld [vmem:[#allocation7 + $0x5c0] ss:$28 sps:$4 sm:$0xff]   ;;  %v7797_v37 = vld [vmem:[#allocation7 + $0x210] ss:$28 sps:$4 sm:$0xff]  }
 0x315   :  { %6791 = vmatprep.subr.bf16.mxu1 %v7753_v40  ;;  %5606 = vmatpush2.bf16.msra.mxu0 %v7750_v6  ;;  %v7799_v40 = vld [vmem:[#allocation7 + $0x1d8] ss:$28 sps:$4 sm:$0xff]  }
 0x316   :  { %5607 = vmatprep.subr.bf16.mxu0 %v7757_v3  ;;  %v7800_v3 = vld [vmem:[#allocation7 + $0x18] ss:$28 sps:$4 sm:$0xff]  }
 0x318   :  { %6792 = vmatpush3.bf16.msra.mxu1 %v7754_v12 }
 0x319   :  { %6793 = vmatprep.subr.bf16.mxu1 %v7758_v41  ;;  %5608 = vmatpush2.bf16.msra.mxu0 %v7755_v7  ;;  %v7801_v41 = vld [vmem:[#allocation7 + $0x6e0] ss:$28 sps:$4 sm:$0xff]  }
 0x31a   :  { %5609 = vmatprep.subr.bf16.mxu0 %v7762_v60  ;;  %v7802_v60 = vld [vmem:[#allocation7 + $0x520] ss:$28 sps:$4 sm:$0xff]  }
 0x31c   :  { %6794 = vmatpush3.bf16.msra.mxu1 %v7759_v44 }
 0x31d   :  { %6795 = vmatprep.subr.bf16.mxu1 %v7763_v47  ;;  %5610 = vmatpush2.bf16.msra.mxu0 %v7760_v45  ;;  %v7803_v47 = vld [vmem:[#allocation7 + $0x6a8] ss:$28 sps:$4 sm:$0xff]  }
 0x31e   :  { %5611 = vmatprep.subr.bf16.mxu0 %v7767_v49  ;;  %v7804_v49 = vld [vmem:[#allocation7 + $0x4e8] ss:$28 sps:$4 sm:$0xff]  }
 0x320   :  { %6796 = vmatpush3.bf16.msra.mxu1 %v7764_v51 }
 0x321   :  { %6797 = vmatprep.subr.bf16.mxu1 %v7768_v52  ;;  %5612 = vmatpush2.bf16.msra.mxu0 %v7765_v9  ;;  %v7805_v52 = vld [vmem:[#allocation7 + $0x670] ss:$28 sps:$4 sm:$0xff]  }
 0x322   :  { %5613 = vmatprep.subr.bf16.mxu0 %v7772_v53  ;;  %v7806_v53 = vld [vmem:[#allocation7 + $0x4b0] ss:$28 sps:$4 sm:$0xff]  }
 0x324   :  { %6798 = vmatpush3.bf16.msra.mxu1 %v7769_v46  ;;  %v7807_v46 = vld [vmem:[#allocation7 + $0x638] ss:$28 sps:$4 sm:$0xff]  }
 0x325   :  { %6799 = vmatprep.subr.bf16.mxu1 %v7773_v14  ;;  %5614 = vmatpush2.bf16.msra.mxu0 %v7770_v54  ;;  %v7808_v14 = vld [vmem:[#allocation7 + $0x478] ss:$28 sps:$4 sm:$0xff]   ;;  %v7809_v54 = vld [vmem:[#allocation7 + $0x600] ss:$28 sps:$4 sm:$0xff]  }
 0x326   :  { %5615 = vmatprep.subr.bf16.mxu0 %v7777_v22  ;;  %v7811_v22 = vld [vmem:[#allocation7 + $0x5c8] ss:$28 sps:$4 sm:$0xff]  }
 0x328   :  { %6800 = vmatpush3.bf16.msra.mxu1 %v7774_v50  ;;  %v7812_v50 = vld [vmem:[#allocation7 + $0x408] ss:$28 sps:$4 sm:$0xff]  }
 0x329   :  { %6801 = vmatprep.subr.bf16.mxu1 %v7778_v55  ;;  %5616 = vmatpush2.bf16.msra.mxu0 %v7775_v56  ;;  %v7814_v55 = vld [vmem:[#allocation7 + $0x3d0] ss:$28 sps:$4 sm:$0xff]   ;;  %v7815_v56 = vld [vmem:[#allocation7 + $0x558] ss:$28 sps:$4 sm:$0xff]  }
 0x32a   :  { %5681 = vmatprep.subr.bf16.mxu0 %v7782_v57 }
 0x32c   :  { %6802 = vmatpush3.bf16.msra.mxu1 %v7779_v62  ;;  %5618 = vmatmul.mubr.bf16.vlgmr.msra.gmra.mxu0 %v8115_v59  ;;  %v5373_v8 = vpop.f32.mrf.mxu0  ;;  %v7816_v62 = vld [vmem:[#allocation7 + $0x398] ss:$28 sps:$4 sm:$0xff]  }
 0x32d   :  { %6803 = vmatprep.subr.bf16.mxu1 %v7783_v63  ;;  %v5374_v18 = vadd.f32 %v5373_v8, %v8162_v27  ;;  %5682 = vmatpush1.bf16.msra.mxu0 %v7780_v1  ;;  %v7788_v27 = vld [vmem:[#allocation7 + $0x168] ss:$28 sps:$4 sm:$0xff]  }
 0x32e   :  { %5699 = vmatprep.mubr.bf16.mxu0 %v7941_v25  ;;  %v5375_v15 = vpop.f32.mrf.mxu0  ;;  %6745 = vmatprep.subr.bf16.mxu0 %v7785_v2  ;;  %v7817_v2 = vld [vmem:[#allocation7 + $0xa98] ss:$28 sps:$4 sm:$0xff]  }
 0x32f   :  { %v5903_v11 = vmul.f32 %v5878_v5, %v5374_v18  ;;  %v5376_v16 = vadd.f32 %v5375_v15, %v8165_v23  ;;  %vm5868_vm9 = vcmp.gt.f32.partialorder %v5374_v18, 0.0  ;;  %v7793_v23 = vld [vmem:[#allocation7 + $0x280] ss:$28 sps:$4 sm:$0xff]  }
 0x330   :  { %6804 = vmatpush3.bf16.msra.mxu1 %v7784_v28  ;;  %v5377_v19 = vpop.f32.mrf.mxu0 }
 0x331   :  { %vm5869_vm10 = vcmp.gt.f32.partialorder %v5376_v16, 0.0  ;;  %v5904_v20 = vmul.f32 %v5882_v10, %v5376_v16  ;;  %v8180_v26 = vsel %vm5868_vm9, %v5374_v18, %v5903_v11  ;;  %v7821_v10 = vld [vmem:[#allocation8 + $0x10] sm:$0xff]  ;;  %v7822_v11 = vld [vmem:[#allocation8 + $0x18] sm:$0xff] }
 0x332   :  { %v5378_v0 = vpop.f32.mrf.mxu0  ;;  %v3432_v15 = vrot.slane %v7821_v10, %v8143_v32 }
 0x333   :  { %5821 = vmatmul.mubr.bf16.vlgmr.msra.gmra.mxu1 %v8125_v13  ;;  %v8182_v61 = vsel %vm5869_vm10, %v5376_v16, %v5904_v20  ;;  %v7790_v13 = vld [vmem:[#allocation7 + $0x130] ss:$28 sps:$4 sm:$0xff]   ;;  %v3436_v16 = vrot.slane %v7822_v11, %v8143_v32  ;;  %v7944_v0 = vmov 1983009808  }
 0x334   :  { %v5924_v25 = vcombine.low %v8180_v26, %v8182_v61  ;;  %6675 = vmatmul.mubr.msk.bf16.vlgmr.msra.gmra.mxu0 %vm2317_vm0, %v8132_v17 }
 0x335   :  { %6746 = vmatpush3.bf16.msra.mxu0 %v7786_v21  ;;  %5740 = vmatprep.mubr.bf16.mxu0 %v8080_v58  ;;  %v7798_v58 = vld [vmem:[#allocation7 + $0x50] ss:$28 sps:$4 sm:$0xff]  }
 0x336   :  { %6747 = vmatprep.subr.bf16.mxu0 %v7787_v24 }
 0x339   :  { %6748 = vmatpush3.bf16.msra.mxu0 %v7788_v27 }
 0x33a   :  { %6749 = vmatprep.subr.bf16.mxu0 %v7789_v29 }
 0x33d   :  { %6750 = vmatpush3.bf16.msra.mxu0 %v7790_v13 }
 0x33e   :  { %6751 = vmatprep.subr.bf16.mxu0 %v7791_v30 }
 0x341   :  { %6752 = vmatpush3.bf16.msra.mxu0 %v7792_v31  ;;  %v5890_v31 = vrot.slane %v7822_v11, %v8170_v43 }
 0x342   :  { %6753 = vmatprep.subr.bf16.mxu0 %v7793_v23 }
 0x345   :  { %6754 = vmatpush3.bf16.msra.mxu0 %v7794_v33 }
 0x346   :  { %6755 = vmatprep.subr.bf16.mxu0 %v7795_v35 }
 0x349   :  { %6756 = vmatpush3.bf16.msra.mxu0 %v7796_v36 }
 0x34a   :  { %6757 = vmatprep.subr.bf16.mxu0 %v7797_v37 }
 0x34b   :  { %v8189_v38 = vpop.f32.mrf.mxu1 }
 0x34d   :  { %v8191_v6 = vpop.f32.mrf.mxu1  ;;  %6758 = vmatpush3.bf16.msra.mxu0 %v7798_v58 }
 0x34e   :  { %6759 = vmatprep.subr.bf16.mxu0 %v7799_v40 }
 0x34f   :  { %v5459_v12 = vpop.f32.mrf.mxu1 }
 0x351   :  { %v5460_v7 = vpop.f32.mrf.mxu1  ;;  %6760 = vmatpush3.bf16.msra.mxu0 %v7800_v3 }
 0x352   :  { %6767 = vmatprep.subr.bf16.mxu0 %v7801_v41 }
 0x353   :  { %v8193_v44 = vpop.f32.mrf.mxu1 }
 0x354   :  { %5741 = vmatmul.mubr.bf16.vlgmr.msra.gmra.mxu0 %v8108_v39  ;;  %v7810_v39 = vld [vmem:[#allocation7 + $0x440] ss:$28 sps:$4 sm:$0xff]  }
 0x355   :  { %v8196_v45 = vpop.f32.mrf.mxu1  ;;  %6768 = vmatpush3.bf16.msra.mxu0 %v7802_v60  ;;  %5780 = vmatprep.mubr.bf16.mxu0 %v8103_v34  ;;  %v7813_v34 = vld [vmem:[#allocation7 + $0x590] ss:$28 sps:$4 sm:$0xff]  }
 0x356   :  { %6769 = vmatprep.subr.bf16.mxu0 %v7803_v47 }
 0x357   :  { %v5541_v51 = vpop.f32.mrf.mxu1 }
 0x358   :  { %v7824_v51 = vld [vmem:[#allocation8 + $0x28] sm:$0xff] }
 0x359   :  { %v5542_v9 = vpop.f32.mrf.mxu1  ;;  %6770 = vmatpush3.bf16.msra.mxu0 %v7804_v49  ;;  %v7823_v49 = vld [vmem:[#allocation8 + $0x20] sm:$0xff] }
 0x35a   :  { %6771 = vmatprep.subr.bf16.mxu0 %v7805_v52  ;;  %v3444_v52 = vrot.slane %v7824_v51, %v8143_v32 }
 0x35d   :  { %6772 = vmatpush3.bf16.msra.mxu0 %v7806_v53 }
 0x35e   :  { %6773 = vmatprep.subr.bf16.mxu0 %v7807_v46 }
 0x361   :  { %6774 = vmatpush3.bf16.msra.mxu0 %v7808_v14 }
 0x362   :  { %6775 = vmatprep.subr.bf16.mxu0 %v7809_v54 }
 0x365   :  { %6776 = vmatpush3.bf16.msra.mxu0 %v7810_v39 }
 0x366   :  { %6777 = vmatprep.subr.bf16.mxu0 %v7811_v22 }
 0x369   :  { %6778 = vmatpush3.bf16.msra.mxu0 %v7812_v50 }
 0x36a   :  { %6779 = vmatprep.subr.bf16.mxu0 %v7813_v34  ;;  %v5894_v34 = vrot.slane %v7823_v49, %v8170_v43 }
 0x36c   :  { %v5414_v57 = vpop.f32.mrf.mxu0 }
 0x36d   :  { %6780 = vmatpush3.bf16.msra.mxu0 %v7814_v55  ;;  %v5415_v19 = vadd.f32 %v5414_v57, %v3432_v15 }
 0x36e   :  { %v5416_v63 = vpop.f32.mrf.mxu0  ;;  %6781 = vmatprep.subr.bf16.mxu0 %v7815_v56 }
 0x36f   :  { %v5417_v20 = vadd.f32 %v5416_v63, %v3436_v16  ;;  %v5898_v63 = vrot.slane %v7824_v51, %v8170_v43 }
 0x370   :  { %v5418_v1 = vpop.f32.mrf.mxu0 }
 0x371   :  { %6782 = vmatpush3.bf16.msra.mxu0 %v7816_v62  ;;  %v5458_v27 = vadd.f32 %v8191_v6, %v5417_v20 }
 0x372   :  { %v5419_v4 = vpop.f32.mrf.mxu0  ;;  %6819 = vmatprep.subr.bf16.mxu0 %v7942_v48 }
 0x374   :  { %5781 = vmatmul.mubr.bf16.vlgmr.msra.gmra.mxu0 %v8115_v59  ;;  %v5456_v59 = vadd.f32 %v8189_v38, %v5415_v19 }
 0x375   :  { %6820 = vmatpush3.bf16.msra.mxu0 %v7817_v2  ;;  %6821 = vmatprep.mubr.msk.bf16.mxu0 %vm7943_vm2, %v7942_v48  ;;  %v5927_v48 = vunpack.c.l.s4 %v7944_v0  ;;  %v7825_v0 = vld [vmem:[#allocation8 + $0x30] sm:$0xff] }
 0x377   :  { %v5928_v33 = vunpack.c.0.s8 %v5927_v48  ;;  %v3448_v48 = vrot.slane %v7825_v0, %v8143_v32 }
 0x379   :  { %v8214_v38 = vsub.s32 %v5928_v33, %v7983_v42  ;;  %v3440_v42 = vrot.slane %v7823_v49, %v8143_v32 }
 0x37b   :  { %v5932_v12 = vrot.slane %v5924_v25, %v8214_v38 }
 0x37c   :  { %6822 = vmatmul.mubr.msk.bf16.vlgmr.msra.gmra.mxu0 %vm2317_vm0, %v8132_v17  ;;  %v5886_v17 = vrot.slane %v7821_v10, %v8170_v43  ;;  %vm5961_vm0 = vcmask 1043458  }
 0x37d   :  { %vm5962_vm2 = vmor %vm5961_vm0, %vm5960_vm15 }
 0x37e   :  { %vm5964_vm4 = vmor %vm5963_vm3, %vm5962_vm2 }
 0x393   :  { %v5578_v5 = vpop.f32.mrf.mxu1 }
 0x394   :  { %v5579_v9 = vadd.f32 %v5578_v5, %v3440_v42 }
 0x395   :  { %v5580_v28 = vpop.f32.mrf.mxu1 }
 0x396   :  { %v5581_v46 = vadd.f32 %v5580_v28, %v3444_v52 }
 0x397   :  { %v5582_v8 = vpop.f32.mrf.mxu1 }
 0x399   :  { %v5583_v18 = vpop.f32.mrf.mxu1 }
 0x3ac   :  { %v5496_v21 = vpop.f32.mrf.mxu0 }
 0x3ad   :  { %v5497_v24 = vadd.f32 %v5496_v21, %v5456_v59 }
 0x3ae   :  { %v5498_v29 = vpop.f32.mrf.mxu0 }
 0x3af   :  { %v5538_v13 = vadd.f32 %v8193_v44, %v5497_v24  ;;  %v5499_v30 = vadd.f32 %v5498_v29, %v5458_v27 }
 0x3b0   :  { %v5500_v23 = vpop.f32.mrf.mxu0 }
 0x3b1   :  { %v5905_v35 = vmul.f32 %v5886_v17, %v5538_v13  ;;  %v5540_v36 = vadd.f32 %v8196_v45, %v5499_v30  ;;  %vm5870_vm11 = vcmp.gt.f32.partialorder %v5538_v13, 0.0 }
 0x3b2   :  { %v5501_v37 = vpop.f32.mrf.mxu0 }
 0x3b3   :  { %vm5871_vm12 = vcmp.gt.f32.partialorder %v5540_v36, 0.0  ;;  %v5906_v58 = vmul.f32 %v5890_v31, %v5540_v36  ;;  %v5912_v40 = vsel %vm5870_vm11, %v5538_v13, %v5905_v35  ;;  %v5902_v35 = vrot.slane %v7825_v0, %v8170_v43 }
 0x3b5   :  { %v5913_v6 = vsel %vm5871_vm12, %v5540_v36, %v5906_v58 }
 0x3b6   :  { %v5925_v3 = vcombine.low %v5912_v40, %v5913_v6 }
 0x3b8   :  { %v5939_v41 = vrot.slane %v5925_v3, %v8214_v38 }
 0x3ba   :  { %v5940_v7 = vcombine.low %v5932_v12, %v5939_v41 }
 0x3bc   :  { %5959 = vst [vmem:[#allocation10] sm:$0xff] %v5940_v7 }
 0x3d3   :  { %v5660_v60 = vpop.f32.mrf.mxu1 }
 0x3d5   :  { %v5662_v44 = vpop.f32.mrf.mxu1 }
 0x3d7   :  { %v5664_v47 = vpop.f32.mrf.mxu1 }
 0x3d9   :  { %v5665_v45 = vpop.f32.mrf.mxu1 }
 0x3ec   :  { %v5619_v53 = vpop.f32.mrf.mxu0 }
 0x3ed   :  { %v5620_v14 = vadd.f32 %v5619_v53, %v5579_v9 }
 0x3ee   :  { %v5621_v26 = vpop.f32.mrf.mxu0 }
 0x3ef   :  { %v5622_v61 = vadd.f32 %v5621_v26, %v5581_v46  ;;  %v5661_v25 = vadd.f32 %v5660_v60, %v5620_v14 }
 0x3f0   :  { %v5623_v54 = vpop.f32.mrf.mxu0 }
 0x3f1   :  { %v5663_v39 = vadd.f32 %v5662_v44, %v5622_v61 }
 0x3f2   :  { %v5624_v22 = vpop.f32.mrf.mxu0 }
 0x3f3   :  { %v6805_v50 = vpop.f32.mrf.mxu1 }
 0x3f4   :  { %v5701_v55 = vpop.f32.mrf.mxu0 }
 0x3f5   :  { %v6806_v56 = vpop.f32.mrf.mxu1  ;;  %v5702_v57 = vadd.f32 %v5701_v55, %v5661_v25 }
 0x3f6   :  { %v6807_v62 = vadd.f32 %v6806_v56, %v6805_v50  ;;  %v5703_v1 = vpop.f32.mrf.mxu0 }
 0x3f7   :  { %v6808_v2 = vpop.f32.mrf.mxu1  ;;  %v5907_v4 = vmul.f32 %v5894_v34, %v5702_v57  ;;  %v5704_v5 = vadd.f32 %v5703_v1, %v5663_v39  ;;  %vm5872_vm13 = vcmp.gt.f32.partialorder %v5702_v57, 0.0 }
 0x3f8   :  { %v5705_v28 = vpop.f32.mrf.mxu0 }
 0x3f9   :  { %v6809_v8 = vpop.f32.mrf.mxu1  ;;  %vm5873_vm14 = vcmp.gt.f32.partialorder %v5704_v5, 0.0  ;;  %v5908_v18 = vmul.f32 %v5898_v63, %v5704_v5  ;;  %v5914_v15 = vsel %vm5872_vm13, %v5702_v57, %v5907_v4 }
 0x3fa   :  { %v5706_v10 = vpop.f32.mrf.mxu0 }
 0x3fb   :  { %v5915_v11 = vsel %vm5873_vm14, %v5704_v5, %v5908_v18 }
 0x3fc   :  { %v5941_v16 = vcombine.low %v5914_v15, %v5915_v11 }
 0x3fe   :  { %v5948_v3 = vrot.slane %v5941_v16, %v8214_v38 }
 0x414   :  { %v6761_v19 = vpop.f32.mrf.mxu0 }
 0x416   :  { %v6762_v20 = vpop.f32.mrf.mxu0 }
 0x417   :  { %v6763_v24 = vadd.f32 %v6762_v20, %v6761_v19 }
 0x418   :  { %v6764_v59 = vpop.f32.mrf.mxu0 }
 0x419   :  { %v5743_v29 = vadd.f32 %v6763_v24, %v3448_v48 }
 0x41a   :  { %v6765_v21 = vpop.f32.mrf.mxu0 }
 0x434   :  { %v6783_v17 = vpop.f32.mrf.mxu0 }
 0x436   :  { %v6784_v27 = vpop.f32.mrf.mxu0 }
 0x437   :  { %v6785_v13 = vadd.f32 %v6784_v27, %v6783_v17 }
 0x438   :  { %v6786_v30 = vpop.f32.mrf.mxu0 }
 0x439   :  { %v5783_v31 = vadd.f32 %v6785_v13, %v5743_v29 }
 0x43a   :  { %v6787_v23 = vpop.f32.mrf.mxu0 }
 0x43b   :  { %v5823_v33 = vadd.f32 %v6807_v62, %v5783_v31 }
 0x43c   :  { %v5862_v36 = vpop.f32.mrf.mxu0 }
 0x43d   :  { %v5863_v37 = vadd.f32 %v5862_v36, %v5823_v33 }
 0x43e   :  { %v6823_v58 = vpop.f32.mrf.mxu0 }
 0x43f   :  { %vm5874_vm1 = vcmp.gt.f32.partialorder %v5863_v37, 0.0  ;;  %v5909_v40 = vmul.f32 %v5902_v35, %v5863_v37 }
 0x440   :  { %v5865_v6 = vpop.f32.mrf.mxu0 }
 0x441   :  { %v5916_v32 = vsel %vm5874_vm1, %v5863_v37, %v5909_v40 }
 0x442   :  { %v5955_v12 = vrot.slane %v5916_v32, %v8214_v38  ;;  %v6824_v41 = vpop.f32.mrf.mxu0 }
 0x444   :  { %v5956_v43 = vcombine.low %v5948_v3, %v5955_v12 }
 0x446   :  { %5965 = vst.msk [vmem:[#allocation10 + $0x8] sm:$0x3f] %vm5964_vm4, %v5956_v43 }
 0x447   :  { %7917 = shalt.err (!%p7914_p10)
}
 0x448   :  { %5975 = dma.vmem_to_hbm [thread:$0]  %s5973_s3, 224, %s8236_s4, [#allocation4]  }
 0x449   :  { %7932 = dma.done.wait [#allocation4], 224  }
 0x44a   :  { %7933 = vsyncadd [#allocation4], 4294967072 }
 0x44b   :  { %5979 = vsyncpa [#allocation3], 1 }
 0x44c   :  { %5980 = vsyncpa [#allocation6], 1 }
 0x44d   :  { %5981 = vsyncpa [#allocation9], 1 }
 0x44e   :  { %5982 = vsyncpa [#allocation4], 1 }

</bundles_post_ra>
